<compile_context>
chip_gen: v7x
topology: tpu7x:2x2x1
jax: 0.10.0
libtpu: 0.0.40
codegen_flags: <defaults>
</compile_context>

<pallas_src>
import functools

import jax
import jax.numpy as jnp
import numpy as np
from jax.experimental import pallas as pl
from jax.experimental.pallas import tpu as pltpu

EPS = 1e-5
# Above the scoped-VMEM defaults (16/32 MiB) and safe on every generation
# (v5e/v6e 128 MiB, v7x 64 MiB per TensorCore).
VMEM_LIMIT_BYTES = 48 * 1024 * 1024


def _compiler_params():
    return pltpu.CompilerParams(
        dimension_semantics=("parallel",),       # R tiles independent -> megacore shards
        vmem_limit_bytes=VMEM_LIMIT_BYTES,
    )


def _pick_row_tile(r, cap=512):
    """Largest divisor of R <= cap, preferring multiples of 8 (sublane granularity)."""
    divs = [t for t in range(1, min(r, cap) + 1) if r % t == 0]
    mult8 = [t for t in divs if t % 8 == 0]
    return (mult8 or divs)[-1]


def _bn_scale_shift(ssum, ssq, count, gamma, beta):
    """Per-channel BN affine (scale, shift) from f32 sum / sum-of-squares rows (1, C)."""
    mean = ssum / count
    var = ssq / count - mean * mean              # biased variance (PyTorch batch stats)
    scale = gamma * jax.lax.rsqrt(var + EPS)
    return scale, beta - mean * scale


# --------------------------------------------------------------------------------------
# Stage 1: conv1x1_1 + relu; per-tile BN1 partial stats.
# --------------------------------------------------------------------------------------
def _conv1_kernel(x_ref, w1_ref, b1_ref, y1_ref, st_ref, *, cdt):
    wn, tr, cin = x_ref.shape
    m = wn * tr
    x2d = x_ref[...].reshape(m, cin).astype(cdt)
    y = jnp.dot(x2d, w1_ref[...], preferred_element_type=jnp.float32) + b1_ref[...]
    y = jnp.maximum(y, 0.0)
    yc = y.astype(y1_ref.dtype)
    y1_ref[...] = yc.reshape(wn, tr, -1)
    yf = yc.astype(jnp.float32)                  # stats over exactly the stored values
    st_ref[0] = jnp.concatenate(
        [jnp.sum(yf, axis=0, keepdims=True),
         jnp.sum(yf * yf, axis=0, keepdims=True)], axis=0)


# --------------------------------------------------------------------------------------
# Stage 2: ConvTranspose2d k=(1,4), s=(1,2), p=(0,1) with BN1 folded into the weights,
#          + relu; per-tile BN2 partial stats.  dec is stored parity-major (2, W, tR, D).
#   out[2w]   = y1bn[w]   @ Wd[1] + y1bn[w-1] @ Wd[3]
#   out[2w+1] = y1bn[w+1] @ Wd[0] + y1bn[w]   @ Wd[2]
# --------------------------------------------------------------------------------------
def _deconv_kernel(y1_ref, wde_ref, be_ref, wdo_ref, bo_ref, bd_ref,
                   dec_ref, st_ref, scr_e, scr_o, *, cdt):
    wn, tr, c1 = y1_ref.shape
    m = wn * tr
    d = bd_ref.shape[1]
    y1 = y1_ref[...].reshape(m, c1).astype(cdt)

    # Two 2D-wide MXU matmuls; columns pre-ordered so even/odd each read one result.
    # The BN1-shift bias (be/bo) is baked in BEFORE the W-shift so the zeroed boundary
    # row contributes exactly nothing (matches the transposed-conv boundary).
    te = (jnp.dot(y1, wde_ref[...], preferred_element_type=jnp.float32)
          + be_ref[...]).reshape(wn, tr, 2 * d)            # [tap1 | tap3]
    to = (jnp.dot(y1, wdo_ref[...], preferred_element_type=jnp.float32)
          + bo_ref[...]).reshape(wn, tr, 2 * d)            # [tap0 | tap2]

    # +-1 W shifts via scratch with a zeroed boundary row; pl.ds views, no concat copies.
    # Boundary rows are re-zeroed every iteration (grid axis is 'parallel' -> each core
    # owns its scratch and may never see iteration 0).
    zrow = jnp.zeros((tr, d), jnp.float32)
    scr_e[0] = zrow
    scr_e[pl.ds(1, wn)] = te[:, :, d:]                     # tap3, shifted by +1 in W
    scr_o[wn] = zrow
    scr_o[pl.ds(0, wn)] = to[:, :, :d]                     # tap0

    bd = bd_ref[...]
    even = jnp.maximum(te[:, :, :d] + scr_e[pl.ds(0, wn)] + bd, 0.0)   # tap1[w] + tap3[w-1]
    odd = jnp.maximum(to[:, :, d:] + scr_o[pl.ds(1, wn)] + bd, 0.0)    # tap2[w] + tap0[w+1]

    evc = even.astype(dec_ref.dtype)
    odc = odd.astype(dec_ref.dtype)
    dec_ref[0] = evc
    dec_ref[1] = odc

    evf = evc.astype(jnp.float32).reshape(m, d)
    odf = odc.astype(jnp.float32).reshape(m, d)
    st_ref[0] = jnp.concatenate(
        [jnp.sum(evf, axis=0, keepdims=True) + jnp.sum(odf, axis=0, keepdims=True),
         jnp.sum(evf * evf, axis=0, keepdims=True)
         + jnp.sum(odf * odf, axis=0, keepdims=True)], axis=0)


# --------------------------------------------------------------------------------------
# Stage 3: fused branch conv (w2||w3) with BN2 folded into the weights, + relu;
#          ONE merged (2*W*tR, D) matmul over both parities; per-tile BN3/BN4 stats.
#          Output is lane-dense: (W, tR, 2*C23) with parity folded into lanes.
# --------------------------------------------------------------------------------------
def _branch_kernel(dec_ref, w23_ref, b23_ref, y23_ref, st_ref, *, cdt):
    _, wn, tr, d = dec_ref.shape
    m2 = 2 * wn * tr
    dec = dec_ref[...].reshape(m2, d).astype(cdt)
    y = jnp.dot(dec, w23_ref[...], preferred_element_type=jnp.float32) + b23_ref[...]
    y = jnp.maximum(y, 0.0)
    yc = y.astype(y23_ref.dtype)
    yf = yc.astype(jnp.float32)
    st_ref[0] = jnp.concatenate(
        [jnp.sum(yf, axis=0, keepdims=True),
         jnp.sum(yf * yf, axis=0, keepdims=True)], axis=0)
    c23 = y.shape[1]
    y4 = yc.reshape(2, wn, tr, c23)
    y23_ref[:, :, :c23] = y4[0]                            # even half of the lane axis
    y23_ref[:, :, c23:] = y4[1]                            # odd half


# --------------------------------------------------------------------------------------
# Stage 4: BN3 || BN4 affine apply (elementwise epilogue), lane-dense in/out.
# --------------------------------------------------------------------------------------
def _bn_apply_kernel(y_ref, sc_ref, sh_ref, o_ref):
    o_ref[...] = y_ref[...].astype(jnp.float32) * sc_ref[...] + sh_ref[...]


# --------------------------------------------------------------------------------------
# Wrapper.
# --------------------------------------------------------------------------------------
def fire_deconv_forward(x_nchw, p, *, compute_dtype=jnp.bfloat16, row_tile=None):
    n, cin, h, w = x_nchw.shape
    r = n * h
    tr = row_tile if row_tile is not None else _pick_row_tile(r)
    assert r % tr == 0, "row_tile must divide N*H (pad R for production shapes)"
    nr = r // tr
    cdt = compute_dtype            # matmul-operand dtype (bf16 on v6e/v7x; f32 possible)
    sdt = compute_dtype            # HBM storage dtype of intermediates
    cp = _compiler_params()

    # NCHW -> kernel layout (W, N*H, Cin)
    xk = jnp.transpose(x_nchw, (3, 0, 2, 1)).reshape(w, r, cin)

    c1 = p["w1"].shape[1]
    d = p["wd"].shape[2]
    c2 = p["w2"].shape[1]
    c3 = p["w3"].shape[1]
    c23 = c2 + c3

    # ---- stage 1: conv1x1_1 + relu + BN1 partial stats ------------------------------
    y1, st1 = pl.pallas_call(
        functools.partial(_conv1_kernel, cdt=cdt),
        grid=(nr,),
        in_specs=[
            pl.BlockSpec((w, tr, cin), lambda i: (0, i, 0)),
            pl.BlockSpec((cin, c1), lambda i: (0, 0)),
            pl.BlockSpec((1, c1), lambda i: (0, 0)),
        ],
        out_specs=[
            pl.BlockSpec((w, tr, c1), lambda i: (0, i, 0)),
            pl.BlockSpec((1, 2, c1), lambda i: (i, 0, 0)),
        ],
        out_shape=[
            jax.ShapeDtypeStruct((w, r, c1), sdt),
            jax.ShapeDtypeStruct((nr, 2, c1), jnp.float32),
        ],
        compiler_params=cp,
    )(xk, p["w1"].astype(cdt), p["b1"].astype(jnp.float32))

    # Tiny cross-tile reduction + BN1 fold into the deconv weights (per-channel sized).
    scale1, shift1 = _bn_scale_shift(
        jnp.sum(st1[:, 0, :], axis=0, keepdims=True),
        jnp.sum(st1[:, 1, :], axis=0, keepdims=True),
        float(w * r), p["g1"], p["be1"])
    wd = p["wd"]                                           # (4, C1, D), taps 0..3
    wd_e = jnp.concatenate([wd[1], wd[3]], axis=-1)        # even uses taps 1,3
    wd_o = jnp.concatenate([wd[0], wd[2]], axis=-1)        # odd uses taps 0,2
    wde_f = (wd_e * scale1.reshape(c1, 1)).astype(cdt)
    wdo_f = (wd_o * scale1.reshape(c1, 1)).astype(cdt)
    be_f = shift1 @ wd_e                                   # (1, 2D) f32
    bo_f = shift1 @ wd_o

    # ---- stage 2: deconv (BN1 folded) + relu + BN2 partial stats ---------------------
    dec, st2 = pl.pallas_call(
        functools.partial(_deconv_kernel, cdt=cdt),
        grid=(nr,),
        in_specs=[
            pl.BlockSpec((w, tr, c1), lambda i: (0, i, 0)),
            pl.BlockSpec((c1, 2 * d), lambda i: (0, 0)),
            pl.BlockSpec((1, 2 * d), lambda i: (0, 0)),
            pl.BlockSpec((c1, 2 * d), lambda i: (0, 0)),
            pl.BlockSpec((1, 2 * d), lambda i: (0, 0)),
            pl.BlockSpec((1, d), lambda i: (0, 0)),
        ],
        out_specs=[
            pl.BlockSpec((2, w, tr, d), lambda i: (0, 0, i, 0)),
            pl.BlockSpec((1, 2, d), lambda i: (i, 0, 0)),
        ],
        out_shape=[
            jax.ShapeDtypeStruct((2, w, r, d), sdt),
            jax.ShapeDtypeStruct((nr, 2, d), jnp.float32),
        ],
        scratch_shapes=[
            pltpu.VMEM((w + 1, tr, d), jnp.float32),       # even-side shift scratch
            pltpu.VMEM((w + 1, tr, d), jnp.float32),       # odd-side shift scratch
        ],
        compiler_params=cp,
    )(y1, wde_f, be_f, wdo_f, bo_f, p["bd"].astype(jnp.float32))

    # BN2 fold into the fused branch weights.
    scale2, shift2 = _bn_scale_shift(
        jnp.sum(st2[:, 0, :], axis=0, keepdims=True),
        jnp.sum(st2[:, 1, :], axis=0, keepdims=True),
        float(2 * w * r), p["g2"], p["be2"])
    w23 = jnp.concatenate([p["w2"], p["w3"]], axis=-1)     # channel order == torch.cat
    b23 = jnp.concatenate([p["b2"], p["b3"]], axis=-1)
    w23_f = (w23 * scale2.reshape(d, 1)).astype(cdt)
    b23_f = shift2 @ w23 + b23

    # ---- stage 3: fused branch conv (BN2 folded) + relu + BN3/BN4 partial stats ------
    y23, st3 = pl.pallas_call(
        functools.partial(_branch_kernel, cdt=cdt),
        grid=(nr,),
        in_specs=[
            pl.BlockSpec((2, w, tr, d), lambda i: (0, 0, i, 0)),
            pl.BlockSpec((d, c23), lambda i: (0, 0)),
            pl.BlockSpec((1, c23), lambda i: (0, 0)),
        ],
        out_specs=[
            pl.BlockSpec((w, tr, 2 * c23), lambda i: (0, i, 0)),
            pl.BlockSpec((1, 2, c23), lambda i: (i, 0, 0)),
        ],
        out_shape=[
            jax.ShapeDtypeStruct((w, r, 2 * c23), sdt),
            jax.ShapeDtypeStruct((nr, 2, c23), jnp.float32),
        ],
        compiler_params=cp,
    )(dec, w23_f, b23_f)

    scale3, shift3 = _bn_scale_shift(
        jnp.sum(st3[:, 0, :], axis=0, keepdims=True),
        jnp.sum(st3[:, 1, :], axis=0, keepdims=True),
        float(2 * w * r),
        jnp.concatenate([p["g3"], p["g4"]], axis=-1),
        jnp.concatenate([p["be3"], p["be4"]], axis=-1))
    sc2 = jnp.concatenate([scale3, scale3], axis=-1)       # same channels for both parities
    sh2 = jnp.concatenate([shift3, shift3], axis=-1)

    # ---- stage 4: BN3 || BN4 apply (elementwise epilogue) ----------------------------
    out = pl.pallas_call(
        _bn_apply_kernel,
        grid=(nr,),
        in_specs=[
            pl.BlockSpec((w, tr, 2 * c23), lambda i: (0, i, 0)),
            pl.BlockSpec((1, 2 * c23), lambda i: (0, 0)),
            pl.BlockSpec((1, 2 * c23), lambda i: (0, 0)),
        ],
        out_specs=pl.BlockSpec((w, tr, 2 * c23), lambda i: (0, i, 0)),
        out_shape=jax.ShapeDtypeStruct((w, r, 2 * c23), jnp.float32),
        compiler_params=cp,
    )(y23, sc2, sh2)

    # (W, R, 2*C23) -> (N, C23, H, 2W): parity (major half of the lane axis) interleaves
    # into width.  Fused channel order already equals torch.cat([bn3, bn4], dim=1).
    o = out.reshape(w, n, h, 2, c23)
    o = jnp.transpose(o, (1, 4, 2, 0, 3))                  # (N, C, H, W, parity)
    return o.reshape(n, c23, h, 2 * w)


# --------------------------------------------------------------------------------------
# Parameter init and pure-JAX reference (training-mode BN batch statistics).
# --------------------------------------------------------------------------------------
def init_params(key, in_channels, c1, d, c2, c3):
    ks = jax.random.split(key, 8)
    p = {
        "w1": 0.1 * jax.random.normal(ks[0], (in_channels, c1), jnp.float32),
        "b1": 0.1 * jax.random.normal(ks[1], (1, c1), jnp.float32),
        "wd": 0.1 * jax.random.normal(ks[2], (4, c1, d), jnp.float32),  # (kw, Cin, Cout)
        "bd": 0.1 * jax.random.normal(ks[3], (1, d), jnp.float32),
        "w2": 0.1 * jax.random.normal(ks[4], (d, c2), jnp.float32),
        "b2": 0.1 * jax.random.normal(ks[5], (1, c2), jnp.float32),
        "w3": 0.1 * jax.random.normal(ks[6], (d, c3), jnp.float32),
        "b3": 0.1 * jax.random.normal(ks[7], (1, c3), jnp.float32),
    }
    for i, c in zip((1, 2, 3, 4), (c1, d, c2, c3)):   # BatchNorm2d default: weight=1, bias=0
        p[f"g{i}"] = jnp.ones((1, c), jnp.float32)
        p[f"be{i}"] = jnp.zeros((1, c), jnp.float32)
    return p


def reference_forward(x, p):
    """Pure-JAX NCHW reference (independent deconv formulation via lhs_dilation)."""
    def bn(y, g, b):
        mean = y.mean(axis=(0, 2, 3), keepdims=True)
        var = ((y - mean) ** 2).mean(axis=(0, 2, 3), keepdims=True)
        g = g.reshape(1, -1, 1, 1)
        b = b.reshape(1, -1, 1, 1)
        return (y - mean) * jax.lax.rsqrt(var + EPS) * g + b

    def pw(y, w, b):  # 1x1 conv
        return jnp.einsum("nchw,cd->ndhw", y, w) + b.reshape(1, -1, 1, 1)

    y1 = bn(jnp.maximum(pw(x, p["w1"], p["b1"]), 0.0), p["g1"], p["be1"])
    # ConvTranspose2d == dilated conv with flipped kernel, pad = k-1-p = 2 each side.
    wflip = jnp.transpose(p["wd"][::-1], (2, 1, 0))[:, :, None, :]   # (D, C1, 1, 4)
    dec = jax.lax.conv_general_dilated(
        y1, wflip, window_strides=(1, 1), padding=((0, 0), (2, 2)),
        lhs_dilation=(1, 2), dimension_numbers=("NCHW", "OIHW", "NCHW"))
    dec = bn(jnp.maximum(dec + p["bd"].reshape(1, -1, 1, 1), 0.0), p["g2"], p["be2"])
    y2 = bn(jnp.maximum(pw(dec, p["w2"], p["b2"]), 0.0), p["g3"], p["be3"])
    y3 = bn(jnp.maximum(pw(dec, p["w3"], p["b3"]), 0.0), p["g4"], p["be4"])
    return jnp.concatenate([y2, y3], axis=1)


if __name__ == "__main__":
    N, Cin, H, W = 2, 4, 16, 16
    c1, d, c2, c3 = 8, 8, 8, 8

    key = jax.random.PRNGKey(0)
    kx, kp = jax.random.split(key)
    x = jax.random.normal(kx, (N, Cin, H, W), jnp.float32)
    params = init_params(kp, Cin, c1, d, c2, c3)

    ref = jax.block_until_ready(reference_forward(x, params))

    # row_tile=8 -> 4 R-tiles, exercising the parallel grid / per-tile stat reduction.
    fwd_f32 = jax.jit(functools.partial(
        fire_deconv_forward, compute_dtype=jnp.float32, row_tile=8))
    out_f32 = jax.block_until_ready(fwd_f32(x, params))
    assert out_f32.shape == (N, c2 + c3, H, 2 * W), out_f32.shape
    if not np.allclose(np.asarray(out_f32), np.asarray(ref), rtol=1e-2, atol=1e-2):
        raise SystemExit("Pallas kernel (f32) does not match reference")

    # Default bf16-matmul path (MXU-native on v6e/v7x); looser tolerance covers the
    # bf16-operand vs f32-reference rounding gap only.
    fwd_bf16 = jax.jit(functools.partial(
        fire_deconv_forward, compute_dtype=jnp.bfloat16, row_tile=8))
    out_bf16 = jax.block_until_ready(fwd_bf16(x, params))
    assert out_bf16.shape == (N, c2 + c3, H, 2 * W), out_bf16.shape
    if not np.allclose(np.asarray(out_bf16), np.asarray(ref), rtol=6e-2, atol=6e-2):
        raise SystemExit("Pallas kernel (bf16) does not match reference")

    print("KERNEL_OK")
</pallas_src>

<mosaic_0001>
module attributes {stable_mosaic.version = 11 : i64} {
  func.func @_conv1_kernel(%arg0: i32, %arg1: memref<16x8x4xf32, #tpu.memory_space<vmem>>, %arg2: memref<4x8xf32, #tpu.memory_space<vmem>>, %arg3: memref<1x8xf32, #tpu.memory_space<vmem>>, %arg4: memref<16x8x8xf32, #tpu.memory_space<vmem>>, %arg5: memref<1x2x8xf32, #tpu.memory_space<vmem>>) attributes {dimension_semantics = [#tpu.dimension_semantics<parallel>], iteration_bounds = array<i64: 4>, scalar_prefetch = 0 : i64, scratch_operands = 0 : i64, tpu.core_type = #tpu.core_type<tc>, window_params = [{transform_indices = @transform_0, window_bounds = array<i64: 16, 8, 4>}, {pipeline_mode = #tpu.pipeline_mode<synchronous>, transform_indices = @transform_1, window_bounds = array<i64: 4, 8>}, {pipeline_mode = #tpu.pipeline_mode<synchronous>, transform_indices = @transform_2, window_bounds = array<i64: 1, 8>}, {transform_indices = @transform_3, window_bounds = array<i64: 16, 8, 8>}, {transform_indices = @transform_4, window_bounds = array<i64: 1, 2, 8>}]} {
    %c0 = arith.constant 0 : index
    %c0_0 = arith.constant 0 : index
    %c0_1 = arith.constant 0 : index
    %0 = vector.load %arg1[%c0, %c0_0, %c0_1] : memref<16x8x4xf32, #tpu.memory_space<vmem>>, vector<16x8x4xf32>
    %1 = vector.shape_cast %0 : vector<16x8x4xf32> to vector<128x4xf32>
    %c0_2 = arith.constant 0 : index
    %c0_3 = arith.constant 0 : index
    %2 = vector.load %arg2[%c0_2, %c0_3] : memref<4x8xf32, #tpu.memory_space<vmem>>, vector<4x8xf32>
    %cst = arith.constant dense<0.000000e+00> : vector<128x8xf32>
    %3 = tpu.matmul %1, %2, %cst {dimension_numbers = #tpu.dot_dimension_numbers<[1], [0], [0], [1], [0, 0, 1, 1], [], []>} : vector<128x4xf32>, vector<4x8xf32>, vector<128x8xf32> -> vector<128x8xf32>
    %c0_4 = arith.constant 0 : index
    %c0_5 = arith.constant 0 : index
    %4 = vector.load %arg3[%c0_4, %c0_5] : memref<1x8xf32, #tpu.memory_space<vmem>>, vector<1x8xf32>
    %5 = vector.broadcast %4 : vector<1x8xf32> to vector<128x8xf32>
    %6 = arith.addf %3, %5 : vector<128x8xf32>
    %cst_6 = arith.constant 0.000000e+00 : f32
    %7 = vector.broadcast %cst_6 : f32 to vector<128x8xf32>
    %8 = arith.maximumf %6, %7 : vector<128x8xf32>
    %9 = vector.shape_cast %8 : vector<128x8xf32> to vector<16x8x8xf32>
    %c0_7 = arith.constant 0 : index
    %c0_8 = arith.constant 0 : index
    %c0_9 = arith.constant 0 : index
    %10 = vector.load %arg4[%c0_7, %c0_8, %c0_9] : memref<16x8x8xf32, #tpu.memory_space<vmem>>, vector<16x8x8xf32>
    tpu.vector_store %arg4[%c0_7, %c0_8, %c0_9], %9 {strides = array<i32>} : memref<16x8x8xf32, #tpu.memory_space<vmem>>, vector<16x8x8xf32>,
    %cst_10 = arith.constant dense<0.000000e+00> : vector<8xf32>
    %11 = vector.multi_reduction <add>, %8, %cst_10 [0] : vector<128x8xf32> to vector<8xf32>
    %12 = vector.shape_cast %11 : vector<8xf32> to vector<1x8xf32>
    %13 = arith.mulf %8, %8 : vector<128x8xf32>
    %cst_11 = arith.constant dense<0.000000e+00> : vector<8xf32>
    %14 = vector.multi_reduction <add>, %13, %cst_11 [0] : vector<128x8xf32> to vector<8xf32>
    %15 = vector.shape_cast %14 : vector<8xf32> to vector<1x8xf32>
    %16 = tpu.concatenate %12, %15 in 0 : vector<1x8xf32>, vector<1x8xf32> -> vector<2x8xf32>
    %c0_12 = arith.constant 0 : index
    %c0_13 = arith.constant 0 : index
    %c0_14 = arith.constant 0 : index
    %17 = vector.load %arg5[%c0_12, %c0_13, %c0_14] : memref<1x2x8xf32, #tpu.memory_space<vmem>>, vector<1x2x8xf32>
    %18 = vector.shape_cast %17 : vector<1x2x8xf32> to vector<2x8xf32>
    %19 = vector.shape_cast %16 : vector<2x8xf32> to vector<1x2x8xf32>
    tpu.vector_store %arg5[%c0_12, %c0_13, %c0_14], %19 {strides = array<i32>} : memref<1x2x8xf32, #tpu.memory_space<vmem>>, vector<1x2x8xf32>,
    return
  }
  func.func @transform_0(%arg0: i32) -> (i32, i32, i32) {
    %c0_i32 = arith.constant 0 : i32
    %c0_i32_0 = arith.constant 0 : i32
    %c0_i32_1 = arith.constant 0 : i32
    return %c0_i32, %arg0, %c0_i32_0 : i32, i32, i32
  }
  func.func @transform_1(%arg0: i32) -> (i32, i32) {
    %c0_i32 = arith.constant 0 : i32
    %c0_i32_0 = arith.constant 0 : i32
    %c0_i32_1 = arith.constant 0 : i32
    return %c0_i32, %c0_i32_0 : i32, i32
  }
  func.func @transform_2(%arg0: i32) -> (i32, i32) {
    %c0_i32 = arith.constant 0 : i32
    %c0_i32_0 = arith.constant 0 : i32
    %c0_i32_1 = arith.constant 0 : i32
    return %c0_i32, %c0_i32_0 : i32, i32
  }
  func.func @transform_3(%arg0: i32) -> (i32, i32, i32) {
    %c0_i32 = arith.constant 0 : i32
    %c0_i32_0 = arith.constant 0 : i32
    %c0_i32_1 = arith.constant 0 : i32
    return %c0_i32, %arg0, %c0_i32_0 : i32, i32, i32
  }
  func.func @transform_4(%arg0: i32) -> (i32, i32, i32) {
    %c0_i32 = arith.constant 0 : i32
    %c0_i32_0 = arith.constant 0 : i32
    %c0_i32_1 = arith.constant 0 : i32
    return %arg0, %c0_i32, %c0_i32_0 : i32, i32, i32
  }
}

module attributes {stable_mosaic.version = 11 : i64} {
  func.func @_deconv_kernel(%arg0: i32, %arg1: memref<16x8x8xf32, #tpu.memory_space<vmem>>, %arg2: memref<8x16xf32, #tpu.memory_space<vmem>>, %arg3: memref<1x16xf32, #tpu.memory_space<vmem>>, %arg4: memref<8x16xf32, #tpu.memory_space<vmem>>, %arg5: memref<1x16xf32, #tpu.memory_space<vmem>>, %arg6: memref<1x8xf32, #tpu.memory_space<vmem>>, %arg7: memref<2x16x8x8xf32, #tpu.memory_space<vmem>>, %arg8: memref<1x2x8xf32, #tpu.memory_space<vmem>>, %arg9: memref<17x8x8xf32, #tpu.memory_space<vmem>>, %arg10: memref<17x8x8xf32, #tpu.memory_space<vmem>>) attributes {dimension_semantics = [#tpu.dimension_semantics<parallel>], iteration_bounds = array<i64: 4>, scalar_prefetch = 0 : i64, scratch_operands = 2 : i64, tpu.core_type = #tpu.core_type<tc>, window_params = [{transform_indices = @transform_0, window_bounds = array<i64: 16, 8, 8>}, {pipeline_mode = #tpu.pipeline_mode<synchronous>, transform_indices = @transform_1, window_bounds = array<i64: 8, 16>}, {pipeline_mode = #tpu.pipeline_mode<synchronous>, transform_indices = @transform_2, window_bounds = array<i64: 1, 16>}, {pipeline_mode = #tpu.pipeline_mode<synchronous>, transform_indices = @transform_3, window_bounds = array<i64: 8, 16>}, {pipeline_mode = #tpu.pipeline_mode<synchronous>, transform_indices = @transform_4, window_bounds = array<i64: 1, 16>}, {pipeline_mode = #tpu.pipeline_mode<synchronous>, transform_indices = @transform_5, window_bounds = array<i64: 1, 8>}, {transform_indices = @transform_6, window_bounds = array<i64: 2, 16, 8, 8>}, {transform_indices = @transform_7, window_bounds = array<i64: 1, 2, 8>}]} {
    %c0 = arith.constant 0 : index
    %c0_0 = arith.constant 0 : index
    %c0_1 = arith.constant 0 : index
    %0 = vector.load %arg1[%c0, %c0_0, %c0_1] : memref<16x8x8xf32, #tpu.memory_space<vmem>>, vector<16x8x8xf32>
    %1 = vector.shape_cast %0 : vector<16x8x8xf32> to vector<128x8xf32>
    %c0_2 = arith.constant 0 : index
    %c0_3 = arith.constant 0 : index
    %2 = vector.load %arg2[%c0_2, %c0_3] : memref<8x16xf32, #tpu.memory_space<vmem>>, vector<8x16xf32>
    %cst = arith.constant dense<0.000000e+00> : vector<128x16xf32>
    %3 = tpu.matmul %1, %2, %cst {dimension_numbers = #tpu.dot_dimension_numbers<[1], [0], [0], [1], [0, 0, 1, 1], [], []>} : vector<128x8xf32>, vector<8x16xf32>, vector<128x16xf32> -> vector<128x16xf32>
    %c0_4 = arith.constant 0 : index
    %c0_5 = arith.constant 0 : index
    %4 = vector.load %arg3[%c0_4, %c0_5] : memref<1x16xf32, #tpu.memory_space<vmem>>, vector<1x16xf32>
    %5 = vector.broadcast %4 : vector<1x16xf32> to vector<128x16xf32>
    %6 = arith.addf %3, %5 : vector<128x16xf32>
    %7 = vector.shape_cast %6 : vector<128x16xf32> to vector<16x8x16xf32>
    %c0_6 = arith.constant 0 : index
    %c0_7 = arith.constant 0 : index
    %8 = vector.load %arg4[%c0_6, %c0_7] : memref<8x16xf32, #tpu.memory_space<vmem>>, vector<8x16xf32>
    %cst_8 = arith.constant dense<0.000000e+00> : vector<128x16xf32>
    %9 = tpu.matmul %1, %8, %cst_8 {dimension_numbers = #tpu.dot_dimension_numbers<[1], [0], [0], [1], [0, 0, 1, 1], [], []>} : vector<128x8xf32>, vector<8x16xf32>, vector<128x16xf32> -> vector<128x16xf32>
    %c0_9 = arith.constant 0 : index
    %c0_10 = arith.constant 0 : index
    %10 = vector.load %arg5[%c0_9, %c0_10] : memref<1x16xf32, #tpu.memory_space<vmem>>, vector<1x16xf32>
    %11 = vector.broadcast %10 : vector<1x16xf32> to vector<128x16xf32>
    %12 = arith.addf %9, %11 : vector<128x16xf32>
    %13 = vector.shape_cast %12 : vector<128x16xf32> to vector<16x8x16xf32>
    %cst_11 = arith.constant 0.000000e+00 : f32
    %14 = vector.broadcast %cst_11 : f32 to vector<8x8xf32>
    %c0_12 = arith.constant 0 : index
    %c0_13 = arith.constant 0 : index
    %c0_14 = arith.constant 0 : index
    %15 = vector.load %arg9[%c0_12, %c0_13, %c0_14] : memref<17x8x8xf32, #tpu.memory_space<vmem>>, vector<1x8x8xf32>
    %16 = vector.shape_cast %15 : vector<1x8x8xf32> to vector<8x8xf32>
    %17 = vector.shape_cast %14 : vector<8x8xf32> to vector<1x8x8xf32>
    tpu.vector_store %arg9[%c0_12, %c0_13, %c0_14], %17 {strides = array<i32>} : memref<17x8x8xf32, #tpu.memory_space<vmem>>, vector<1x8x8xf32>,
    %18 = vector.extract_strided_slice %7 {offsets = [0, 0, 8], sizes = [16, 8, 8], strides = [1, 1, 1]} : vector<16x8x16xf32> to vector<16x8x8xf32>
    %c1 = arith.constant 1 : index
    %c0_15 = arith.constant 0 : index
    %c0_16 = arith.constant 0 : index
    %19 = vector.load %arg9[%c1, %c0_15, %c0_16] : memref<17x8x8xf32, #tpu.memory_space<vmem>>, vector<16x8x8xf32>
    tpu.vector_store %arg9[%c1, %c0_15, %c0_16], %18 {strides = array<i32>} : memref<17x8x8xf32, #tpu.memory_space<vmem>>, vector<16x8x8xf32>,
    %c16 = arith.constant 16 : index
    %c0_17 = arith.constant 0 : index
    %c0_18 = arith.constant 0 : index
    %20 = vector.load %arg10[%c16, %c0_17, %c0_18] : memref<17x8x8xf32, #tpu.memory_space<vmem>>, vector<1x8x8xf32>
    %21 = vector.shape_cast %20 : vector<1x8x8xf32> to vector<8x8xf32>
    %22 = vector.shape_cast %14 : vector<8x8xf32> to vector<1x8x8xf32>
    tpu.vector_store %arg10[%c16, %c0_17, %c0_18], %22 {strides = array<i32>} : memref<17x8x8xf32, #tpu.memory_space<vmem>>, vector<1x8x8xf32>,
    %23 = vector.extract_strided_slice %13 {offsets = [0, 0, 0], sizes = [16, 8, 8], strides = [1, 1, 1]} : vector<16x8x16xf32> to vector<16x8x8xf32>
    %c0_19 = arith.constant 0 : index
    %c0_20 = arith.constant 0 : index
    %c0_21 = arith.constant 0 : index
    %24 = vector.load %arg10[%c0_19, %c0_20, %c0_21] : memref<17x8x8xf32, #tpu.memory_space<vmem>>, vector<16x8x8xf32>
    tpu.vector_store %arg10[%c0_19, %c0_20, %c0_21], %23 {strides = array<i32>} : memref<17x8x8xf32, #tpu.memory_space<vmem>>, vector<16x8x8xf32>,
    %c0_22 = arith.constant 0 : index
    %c0_23 = arith.constant 0 : index
    %25 = vector.load %arg6[%c0_22, %c0_23] : memref<1x8xf32, #tpu.memory_space<vmem>>, vector<1x8xf32>
    %26 = vector.extract_strided_slice %7 {offsets = [0, 0, 0], sizes = [16, 8, 8], strides = [1, 1, 1]} : vector<16x8x16xf32> to vector<16x8x8xf32>
    %c0_24 = arith.constant 0 : index
    %c0_25 = arith.constant 0 : index
    %c0_26 = arith.constant 0 : index
    %27 = vector.load %arg9[%c0_24, %c0_25, %c0_26] : memref<17x8x8xf32, #tpu.memory_space<vmem>>, vector<16x8x8xf32>
    %28 = arith.addf %26, %27 : vector<16x8x8xf32>
    %29 = vector.shape_cast %25 : vector<1x8xf32> to vector<1x1x8xf32>
    %30 = vector.broadcast %29 : vector<1x1x8xf32> to vector<16x8x8xf32>
    %31 = arith.addf %28, %30 : vector<16x8x8xf32>
    %cst_27 = arith.constant 0.000000e+00 : f32
    %32 = vector.broadcast %cst_27 : f32 to vector<16x8x8xf32>
    %33 = arith.maximumf %31, %32 : vector<16x8x8xf32>
    %34 = vector.extract_strided_slice %13 {offsets = [0, 0, 8], sizes = [16, 8, 8], strides = [1, 1, 1]} : vector<16x8x16xf32> to vector<16x8x8xf32>
    %c1_28 = arith.constant 1 : index
    %c0_29 = arith.constant 0 : index
    %c0_30 = arith.constant 0 : index
    %35 = vector.load %arg10[%c1_28, %c0_29, %c0_30] : memref<17x8x8xf32, #tpu.memory_space<vmem>>, vector<16x8x8xf32>
    %36 = arith.addf %34, %35 : vector<16x8x8xf32>
    %37 = vector.shape_cast %25 : vector<1x8xf32> to vector<1x1x8xf32>
    %38 = vector.broadcast %37 : vector<1x1x8xf32> to vector<16x8x8xf32>
    %39 = arith.addf %36, %38 : vector<16x8x8xf32>
    %cst_31 = arith.constant 0.000000e+00 : f32
    %40 = vector.broadcast %cst_31 : f32 to vector<16x8x8xf32>
    %41 = arith.maximumf %39, %40 : vector<16x8x8xf32>
    %c0_32 = arith.constant 0 : index
    %c0_33 = arith.constant 0 : index
    %c0_34 = arith.constant 0 : index
    %c0_35 = arith.constant 0 : index
    %42 = vector.load %arg7[%c0_32, %c0_33, %c0_34, %c0_35] : memref<2x16x8x8xf32, #tpu.memory_space<vmem>>, vector<1x16x8x8xf32>
    %43 = vector.shape_cast %42 : vector<1x16x8x8xf32> to vector<16x8x8xf32>
    %44 = vector.shape_cast %33 : vector<16x8x8xf32> to vector<1x16x8x8xf32>
    tpu.vector_store %arg7[%c0_32, %c0_33, %c0_34, %c0_35], %44 {strides = array<i32>} : memref<2x16x8x8xf32, #tpu.memory_space<vmem>>, vector<1x16x8x8xf32>,
    %c1_36 = arith.constant 1 : index
    %c0_37 = arith.constant 0 : index
    %c0_38 = arith.constant 0 : index
    %c0_39 = arith.constant 0 : index
    %45 = vector.load %arg7[%c1_36, %c0_37, %c0_38, %c0_39] : memref<2x16x8x8xf32, #tpu.memory_space<vmem>>, vector<1x16x8x8xf32>
    %46 = vector.shape_cast %45 : vector<1x16x8x8xf32> to vector<16x8x8xf32>
    %47 = vector.shape_cast %41 : vector<16x8x8xf32> to vector<1x16x8x8xf32>
    tpu.vector_store %arg7[%c1_36, %c0_37, %c0_38, %c0_39], %47 {strides = array<i32>} : memref<2x16x8x8xf32, #tpu.memory_space<vmem>>, vector<1x16x8x8xf32>,
    %48 = vector.shape_cast %33 : vector<16x8x8xf32> to vector<128x8xf32>
    %49 = vector.shape_cast %41 : vector<16x8x8xf32> to vector<128x8xf32>
    %cst_40 = arith.constant dense<0.000000e+00> : vector<8xf32>
    %50 = vector.multi_reduction <add>, %48, %cst_40 [0] : vector<128x8xf32> to vector<8xf32>
    %51 = vector.shape_cast %50 : vector<8xf32> to vector<1x8xf32>
    %cst_41 = arith.constant dense<0.000000e+00> : vector<8xf32>
    %52 = vector.multi_reduction <add>, %49, %cst_41 [0] : vector<128x8xf32> to vector<8xf32>
    %53 = vector.shape_cast %52 : vector<8xf32> to vector<1x8xf32>
    %54 = arith.addf %51, %53 : vector<1x8xf32>
    %55 = arith.mulf %48, %48 : vector<128x8xf32>
    %cst_42 = arith.constant dense<0.000000e+00> : vector<8xf32>
    %56 = vector.multi_reduction <add>, %55, %cst_42 [0] : vector<128x8xf32> to vector<8xf32>
    %57 = vector.shape_cast %56 : vector<8xf32> to vector<1x8xf32>
    %58 = arith.mulf %49, %49 : vector<128x8xf32>
    %cst_43 = arith.constant dense<0.000000e+00> : vector<8xf32>
    %59 = vector.multi_reduction <add>, %58, %cst_43 [0] : vector<128x8xf32> to vector<8xf32>
    %60 = vector.shape_cast %59 : vector<8xf32> to vector<1x8xf32>
    %61 = arith.addf %57, %60 : vector<1x8xf32>
    %62 = tpu.concatenate %54, %61 in 0 : vector<1x8xf32>, vector<1x8xf32> -> vector<2x8xf32>
    %c0_44 = arith.constant 0 : index
    %c0_45 = arith.constant 0 : index
    %c0_46 = arith.constant 0 : index
    %63 = vector.load %arg8[%c0_44, %c0_45, %c0_46] : memref<1x2x8xf32, #tpu.memory_space<vmem>>, vector<1x2x8xf32>
    %64 = vector.shape_cast %63 : vector<1x2x8xf32> to vector<2x8xf32>
    %65 = vector.shape_cast %62 : vector<2x8xf32> to vector<1x2x8xf32>
    tpu.vector_store %arg8[%c0_44, %c0_45, %c0_46], %65 {strides = array<i32>} : memref<1x2x8xf32, #tpu.memory_space<vmem>>, vector<1x2x8xf32>,
    return
  }
  func.func @transform_0(%arg0: i32) -> (i32, i32, i32) {
    %c0_i32 = arith.constant 0 : i32
    %c0_i32_0 = arith.constant 0 : i32
    %c0_i32_1 = arith.constant 0 : i32
    return %c0_i32, %arg0, %c0_i32_0 : i32, i32, i32
  }
  func.func @transform_1(%arg0: i32) -> (i32, i32) {
    %c0_i32 = arith.constant 0 : i32
    %c0_i32_0 = arith.constant 0 : i32
    %c0_i32_1 = arith.constant 0 : i32
    return %c0_i32, %c0_i32_0 : i32, i32
  }
  func.func @transform_2(%arg0: i32) -> (i32, i32) {
    %c0_i32 = arith.constant 0 : i32
    %c0_i32_0 = arith.constant 0 : i32
    %c0_i32_1 = arith.constant 0 : i32
    return %c0_i32, %c0_i32_0 : i32, i32
  }
  func.func @transform_3(%arg0: i32) -> (i32, i32) {
    %c0_i32 = arith.constant 0 : i32
    %c0_i32_0 = arith.constant 0 : i32
    %c0_i32_1 = arith.constant 0 : i32
    return %c0_i32, %c0_i32_0 : i32, i32
  }
  func.func @transform_4(%arg0: i32) -> (i32, i32) {
    %c0_i32 = arith.constant 0 : i32
    %c0_i32_0 = arith.constant 0 : i32
    %c0_i32_1 = arith.constant 0 : i32
    return %c0_i32, %c0_i32_0 : i32, i32
  }
  func.func @transform_5(%arg0: i32) -> (i32, i32) {
    %c0_i32 = arith.constant 0 : i32
    %c0_i32_0 = arith.constant 0 : i32
    %c0_i32_1 = arith.constant 0 : i32
    return %c0_i32, %c0_i32_0 : i32, i32
  }
  func.func @transform_6(%arg0: i32) -> (i32, i32, i32, i32) {
    %c0_i32 = arith.constant 0 : i32
    %c0_i32_0 = arith.constant 0 : i32
    %c0_i32_1 = arith.constant 0 : i32
    %c0_i32_2 = arith.constant 0 : i32
    return %c0_i32, %c0_i32_0, %arg0, %c0_i32_1 : i32, i32, i32, i32
  }
  func.func @transform_7(%arg0: i32) -> (i32, i32, i32) {
    %c0_i32 = arith.constant 0 : i32
    %c0_i32_0 = arith.constant 0 : i32
    %c0_i32_1 = arith.constant 0 : i32
    return %arg0, %c0_i32, %c0_i32_0 : i32, i32, i32
  }
}

module attributes {stable_mosaic.version = 11 : i64} {
  func.func @_branch_kernel(%arg0: i32, %arg1: memref<2x16x8x8xf32, #tpu.memory_space<vmem>>, %arg2: memref<8x16xf32, #tpu.memory_space<vmem>>, %arg3: memref<1x16xf32, #tpu.memory_space<vmem>>, %arg4: memref<16x8x32xf32, #tpu.memory_space<vmem>>, %arg5: memref<1x2x16xf32, #tpu.memory_space<vmem>>) attributes {dimension_semantics = [#tpu.dimension_semantics<parallel>], iteration_bounds = array<i64: 4>, scalar_prefetch = 0 : i64, scratch_operands = 0 : i64, tpu.core_type = #tpu.core_type<tc>, window_params = [{transform_indices = @transform_0, window_bounds = array<i64: 2, 16, 8, 8>}, {pipeline_mode = #tpu.pipeline_mode<synchronous>, transform_indices = @transform_1, window_bounds = array<i64: 8, 16>}, {pipeline_mode = #tpu.pipeline_mode<synchronous>, transform_indices = @transform_2, window_bounds = array<i64: 1, 16>}, {transform_indices = @transform_3, window_bounds = array<i64: 16, 8, 32>}, {transform_indices = @transform_4, window_bounds = array<i64: 1, 2, 16>}]} {
    %c0 = arith.constant 0 : index
    %c0_0 = arith.constant 0 : index
    %c0_1 = arith.constant 0 : index
    %c0_2 = arith.constant 0 : index
    %0 = vector.load %arg1[%c0, %c0_0, %c0_1, %c0_2] : memref<2x16x8x8xf32, #tpu.memory_space<vmem>>, vector<2x16x8x8xf32>
    %1 = vector.shape_cast %0 : vector<2x16x8x8xf32> to vector<256x8xf32>
    %c0_3 = arith.constant 0 : index
    %c0_4 = arith.constant 0 : index
    %2 = vector.load %arg2[%c0_3, %c0_4] : memref<8x16xf32, #tpu.memory_space<vmem>>, vector<8x16xf32>
    %cst = arith.constant dense<0.000000e+00> : vector<256x16xf32>
    %3 = tpu.matmul %1, %2, %cst {dimension_numbers = #tpu.dot_dimension_numbers<[1], [0], [0], [1], [0, 0, 1, 1], [], []>} : vector<256x8xf32>, vector<8x16xf32>, vector<256x16xf32> -> vector<256x16xf32>
    %c0_5 = arith.constant 0 : index
    %c0_6 = arith.constant 0 : index
    %4 = vector.load %arg3[%c0_5, %c0_6] : memref<1x16xf32, #tpu.memory_space<vmem>>, vector<1x16xf32>
    %5 = vector.broadcast %4 : vector<1x16xf32> to vector<256x16xf32>
    %6 = arith.addf %3, %5 : vector<256x16xf32>
    %cst_7 = arith.constant 0.000000e+00 : f32
    %7 = vector.broadcast %cst_7 : f32 to vector<256x16xf32>
    %8 = arith.maximumf %6, %7 : vector<256x16xf32>
    %cst_8 = arith.constant dense<0.000000e+00> : vector<16xf32>
    %9 = vector.multi_reduction <add>, %8, %cst_8 [0] : vector<256x16xf32> to vector<16xf32>
    %10 = vector.shape_cast %9 : vector<16xf32> to vector<1x16xf32>
    %11 = arith.mulf %8, %8 : vector<256x16xf32>
    %cst_9 = arith.constant dense<0.000000e+00> : vector<16xf32>
    %12 = vector.multi_reduction <add>, %11, %cst_9 [0] : vector<256x16xf32> to vector<16xf32>
    %13 = vector.shape_cast %12 : vector<16xf32> to vector<1x16xf32>
    %14 = tpu.concatenate %10, %13 in 0 : vector<1x16xf32>, vector<1x16xf32> -> vector<2x16xf32>
    %c0_10 = arith.constant 0 : index
    %c0_11 = arith.constant 0 : index
    %c0_12 = arith.constant 0 : index
    %15 = vector.load %arg5[%c0_10, %c0_11, %c0_12] : memref<1x2x16xf32, #tpu.memory_space<vmem>>, vector<1x2x16xf32>
    %16 = vector.shape_cast %15 : vector<1x2x16xf32> to vector<2x16xf32>
    %17 = vector.shape_cast %14 : vector<2x16xf32> to vector<1x2x16xf32>
    tpu.vector_store %arg5[%c0_10, %c0_11, %c0_12], %17 {strides = array<i32>} : memref<1x2x16xf32, #tpu.memory_space<vmem>>, vector<1x2x16xf32>,
    %18 = vector.shape_cast %8 : vector<256x16xf32> to vector<2x16x8x16xf32>
    %19 = vector.extract_strided_slice %18 {offsets = [0, 0, 0, 0], sizes = [1, 16, 8, 16], strides = [1, 1, 1, 1]} : vector<2x16x8x16xf32> to vector<1x16x8x16xf32>
    %20 = vector.shape_cast %19 : vector<1x16x8x16xf32> to vector<16x8x16xf32>
    %c0_13 = arith.constant 0 : index
    %c0_14 = arith.constant 0 : index
    %c0_15 = arith.constant 0 : index
    %21 = vector.load %arg4[%c0_13, %c0_14, %c0_15] : memref<16x8x32xf32, #tpu.memory_space<vmem>>, vector<16x8x16xf32>
    tpu.vector_store %arg4[%c0_13, %c0_14, %c0_15], %20 {strides = array<i32>} : memref<16x8x32xf32, #tpu.memory_space<vmem>>, vector<16x8x16xf32>,
    %22 = vector.extract_strided_slice %18 {offsets = [1, 0, 0, 0], sizes = [1, 16, 8, 16], strides = [1, 1, 1, 1]} : vector<2x16x8x16xf32> to vector<1x16x8x16xf32>
    %23 = vector.shape_cast %22 : vector<1x16x8x16xf32> to vector<16x8x16xf32>
    %c0_16 = arith.constant 0 : index
    %c0_17 = arith.constant 0 : index
    %c16 = arith.constant 16 : index
    %24 = vector.load %arg4[%c0_16, %c0_17, %c16] : memref<16x8x32xf32, #tpu.memory_space<vmem>>, vector<16x8x16xf32>
    tpu.vector_store %arg4[%c0_16, %c0_17, %c16], %23 {strides = array<i32>} : memref<16x8x32xf32, #tpu.memory_space<vmem>>, vector<16x8x16xf32>,
    return
  }
  func.func @transform_0(%arg0: i32) -> (i32, i32, i32, i32) {
    %c0_i32 = arith.constant 0 : i32
    %c0_i32_0 = arith.constant 0 : i32
    %c0_i32_1 = arith.constant 0 : i32
    %c0_i32_2 = arith.constant 0 : i32
    return %c0_i32, %c0_i32_0, %arg0, %c0_i32_1 : i32, i32, i32, i32
  }
  func.func @transform_1(%arg0: i32) -> (i32, i32) {
    %c0_i32 = arith.constant 0 : i32
    %c0_i32_0 = arith.constant 0 : i32
    %c0_i32_1 = arith.constant 0 : i32
    return %c0_i32, %c0_i32_0 : i32, i32
  }
  func.func @transform_2(%arg0: i32) -> (i32, i32) {
    %c0_i32 = arith.constant 0 : i32
    %c0_i32_0 = arith.constant 0 : i32
    %c0_i32_1 = arith.constant 0 : i32
    return %c0_i32, %c0_i32_0 : i32, i32
  }
  func.func @transform_3(%arg0: i32) -> (i32, i32, i32) {
    %c0_i32 = arith.constant 0 : i32
    %c0_i32_0 = arith.constant 0 : i32
    %c0_i32_1 = arith.constant 0 : i32
    return %c0_i32, %arg0, %c0_i32_0 : i32, i32, i32
  }
  func.func @transform_4(%arg0: i32) -> (i32, i32, i32) {
    %c0_i32 = arith.constant 0 : i32
    %c0_i32_0 = arith.constant 0 : i32
    %c0_i32_1 = arith.constant 0 : i32
    return %arg0, %c0_i32, %c0_i32_0 : i32, i32, i32
  }
}

module attributes {stable_mosaic.version = 11 : i64} {
  func.func @_bn_apply_kernel(%arg0: i32, %arg1: memref<16x8x32xf32, #tpu.memory_space<vmem>>, %arg2: memref<1x32xf32, #tpu.memory_space<vmem>>, %arg3: memref<1x32xf32, #tpu.memory_space<vmem>>, %arg4: memref<16x8x32xf32, #tpu.memory_space<vmem>>) attributes {dimension_semantics = [#tpu.dimension_semantics<parallel>], iteration_bounds = array<i64: 4>, scalar_prefetch = 0 : i64, scratch_operands = 0 : i64, tpu.core_type = #tpu.core_type<tc>, window_params = [{transform_indices = @transform_0, window_bounds = array<i64: 16, 8, 32>}, {pipeline_mode = #tpu.pipeline_mode<synchronous>, transform_indices = @transform_1, window_bounds = array<i64: 1, 32>}, {pipeline_mode = #tpu.pipeline_mode<synchronous>, transform_indices = @transform_2, window_bounds = array<i64: 1, 32>}, {transform_indices = @transform_3, window_bounds = array<i64: 16, 8, 32>}]} {
    %c0 = arith.constant 0 : index
    %c0_0 = arith.constant 0 : index
    %c0_1 = arith.constant 0 : index
    %0 = vector.load %arg1[%c0, %c0_0, %c0_1] : memref<16x8x32xf32, #tpu.memory_space<vmem>>, vector<16x8x32xf32>
    %c0_2 = arith.constant 0 : index
    %c0_3 = arith.constant 0 : index
    %1 = vector.load %arg2[%c0_2, %c0_3] : memref<1x32xf32, #tpu.memory_space<vmem>>, vector<1x32xf32>
    %2 = vector.shape_cast %1 : vector<1x32xf32> to vector<1x1x32xf32>
    %3 = vector.broadcast %2 : vector<1x1x32xf32> to vector<16x8x32xf32>
    %4 = arith.mulf %0, %3 : vector<16x8x32xf32>
    %c0_4 = arith.constant 0 : index
    %c0_5 = arith.constant 0 : index
    %5 = vector.load %arg3[%c0_4, %c0_5] : memref<1x32xf32, #tpu.memory_space<vmem>>, vector<1x32xf32>
    %6 = vector.shape_cast %5 : vector<1x32xf32> to vector<1x1x32xf32>
    %7 = vector.broadcast %6 : vector<1x1x32xf32> to vector<16x8x32xf32>
    %8 = arith.addf %4, %7 : vector<16x8x32xf32>
    %c0_6 = arith.constant 0 : index
    %c0_7 = arith.constant 0 : index
    %c0_8 = arith.constant 0 : index
    %9 = vector.load %arg4[%c0_6, %c0_7, %c0_8] : memref<16x8x32xf32, #tpu.memory_space<vmem>>, vector<16x8x32xf32>
    tpu.vector_store %arg4[%c0_6, %c0_7, %c0_8], %8 {strides = array<i32>} : memref<16x8x32xf32, #tpu.memory_space<vmem>>, vector<16x8x32xf32>,
    return
  }
  func.func @transform_0(%arg0: i32) -> (i32, i32, i32) {
    %c0_i32 = arith.constant 0 : i32
    %c0_i32_0 = arith.constant 0 : i32
    %c0_i32_1 = arith.constant 0 : i32
    return %c0_i32, %arg0, %c0_i32_0 : i32, i32, i32
  }
  func.func @transform_1(%arg0: i32) -> (i32, i32) {
    %c0_i32 = arith.constant 0 : i32
    %c0_i32_0 = arith.constant 0 : i32
    %c0_i32_1 = arith.constant 0 : i32
    return %c0_i32, %c0_i32_0 : i32, i32
  }
  func.func @transform_2(%arg0: i32) -> (i32, i32) {
    %c0_i32 = arith.constant 0 : i32
    %c0_i32_0 = arith.constant 0 : i32
    %c0_i32_1 = arith.constant 0 : i32
    return %c0_i32, %c0_i32_0 : i32, i32
  }
  func.func @transform_3(%arg0: i32) -> (i32, i32, i32) {
    %c0_i32 = arith.constant 0 : i32
    %c0_i32_0 = arith.constant 0 : i32
    %c0_i32_1 = arith.constant 0 : i32
    return %c0_i32, %arg0, %c0_i32_0 : i32, i32, i32
  }
}

</mosaic_0001>

<bundles_post_ra>
// kernel: fire_deconv_forward.4
= control target key start
LH: loop header
LB: loop body
LE: loop exit
PB: predicated region body
PF: predicated region fallthrough
CT: control target
= control target key end

     0   :  { %s984_s15 = smov 0   ;;  %s986_s16 = smov 0   ;;  %s1205_s0 = inlined_call_operand.vmem [shape: f32[16,32,4], index: 0, kind: input, shape index: {}]   ;;  %s1206_s1 = inlined_call_operand.vmem [shape: f32[4,8], index: 1, kind: input, shape index: {}]   ;;  %s1207_s2 = inlined_call_operand.vmem [shape: f32[1,8], index: 2, kind: input, shape index: {}]   ;;  %s1208_s3 = inlined_call_operand.vmem [shape: f32[16,32,8], index: 3, kind: output, shape index: {0}]   ;;  %s1209_s4 = inlined_call_operand.vmem [shape: f32[4,2,8], index: 4, kind: output, shape index: {1}]  }
   0x1   :  { %s988_s17 = smov 0  }
   0x2 LB: > { %s1000_s18 = sadd.s32 4294967295, %s957_s17   ;;  %s1003_s19 = sadd.s32 1, %s957_s17   ;;  %s957_s17 = sphi %s988_s17, %s1213_s17   ;;  %s953_s16 = sphi %s986_s16, %s1212_s16   ;;  %s949_s15 = sphi %s984_s15, %s1211_s15  }
   0x3   : > { %s19_s20 = ssub.s32 %s957_s17, %s1003_s19  ;;  %s22_s21 = sadd.s32 1, %s953_s16 }
   0x4   : > { %p20_p0 = scmp.eq.s32.totalorder %s19_s20, 0  ;;  %p29_p1 = scmp.ne.s32.totalorder %s953_s16, %s949_s15 }
   0x5   : > { %p30_p2 = scmp.eq.s32.totalorder %s957_s17, 0  ;;  %p101_p3 = scmp.eq.s32.totalorder %s1000_s18, 3 }
   0x6   : > { %s1013_s22 = scalar_select %p20_p0, %s953_s16, %s22_s21  }
   0x7   : > { %p31_p4 = por %p30_p2, %p29_p1  ;;  %p1015_p5 = por %p101_p3, %p29_p1 }
   0x8   : > { %p837_p6 = scmp.ge.s32.totalorder %s957_s17, 4 }
   0xa   : > { %155 = sbr.rel (%p837_p6) target bundleno = 37 (0x25), region = 24 }
  0x11   : > { %158 = sbr.rel (!%p31_p4) target bundleno = 37 (0x25), region = 28  ;;  %s160_s24 = sand.u32 (%p31_p4), 1, %s953_s16  }
  0x12   : > { %s839_s25 = sshll.u32 (%p31_p4), %s957_s17, 3  ;;  %s838_s26 = sshll.u32 (%p31_p4), %s160_s24, 7 }
  0x13   : > { %s1025_s29 = scalar_lea.vmem (%p31_p4), %s1205_s0, %s839_s25  ;;  %s162_s30 = scalar_lea.vmem (%p31_p4), [#allocation2], %s838_s26 }
  0x14   : > { %v222_v0 = vld [vmem:[%s1025_s29] sm:$0xff] (%p31_p4) }
  0x15   : > { %v224_v1 = vld [vmem:[%s1025_s29 + $0x20] sm:$0xff] (%p31_p4)  ;;  %223 = vst [vmem:[%s162_s30] sm:$0xff] (%p31_p4), %v222_v0 }
  0x16   : > { %v226_v2 = vld [vmem:[%s1025_s29 + $0x40] sm:$0xff] (%p31_p4)  ;;  %225 = vst [vmem:[%s162_s30 + $0x8] sm:$0xff] (%p31_p4), %v224_v1 }
  0x17   : > { %227 = vst [vmem:[%s162_s30 + $0x10] sm:$0xff] (%p31_p4), %v226_v2  ;;  %v228_v3 = vld [vmem:[%s1025_s29 + $0x60] sm:$0xff] (%p31_p4) }
  0x18   : > { %v230_v4 = vld [vmem:[%s1025_s29 + $0x80] sm:$0xff]  ;;  %229 = vst [vmem:[%s162_s30 + $0x18] sm:$0xff] %v228_v3 }
  0x19   : > { %v232_v5 = vld [vmem:[%s1025_s29 + $0xa0] sm:$0xff]  ;;  %231 = vst [vmem:[%s162_s30 + $0x20] sm:$0xff] %v230_v4 }
  0x1a   : > { %233 = vst [vmem:[%s162_s30 + $0x28] sm:$0xff] %v232_v5  ;;  %v234_v6 = vld [vmem:[%s1025_s29 + $0xc0] sm:$0xff] }
  0x1b   : > { %v236_v7 = vld [vmem:[%s1025_s29 + $0xe0] sm:$0xff]  ;;  %235 = vst [vmem:[%s162_s30 + $0x30] sm:$0xff] %v234_v6 }
  0x1c   : > { %v238_v8 = vld [vmem:[%s1025_s29 + $0x100] sm:$0xff]  ;;  %237 = vst [vmem:[%s162_s30 + $0x38] sm:$0xff] %v236_v7 }
  0x1d   : > { %239 = vst [vmem:[%s162_s30 + $0x40] sm:$0xff] %v238_v8  ;;  %v240_v9 = vld [vmem:[%s1025_s29 + $0x120] sm:$0xff] }
  0x1e   : > { %v242_v10 = vld [vmem:[%s1025_s29 + $0x140] sm:$0xff]  ;;  %241 = vst [vmem:[%s162_s30 + $0x48] sm:$0xff] %v240_v9 }
  0x1f   : > { %v244_v11 = vld [vmem:[%s1025_s29 + $0x160] sm:$0xff]  ;;  %243 = vst [vmem:[%s162_s30 + $0x50] sm:$0xff] %v242_v10 }
  0x20   : > { %245 = vst [vmem:[%s162_s30 + $0x58] sm:$0xff] %v244_v11  ;;  %v246_v12 = vld [vmem:[%s1025_s29 + $0x180] sm:$0xff] }
  0x21   : > { %v248_v13 = vld [vmem:[%s1025_s29 + $0x1a0] sm:$0xff]  ;;  %247 = vst [vmem:[%s162_s30 + $0x60] sm:$0xff] %v246_v12 }
  0x22   : > { %v250_v14 = vld [vmem:[%s1025_s29 + $0x1c0] sm:$0xff]  ;;  %249 = vst [vmem:[%s162_s30 + $0x68] sm:$0xff] %v248_v13 }
  0x23   : > { %251 = vst [vmem:[%s162_s30 + $0x70] sm:$0xff] %v250_v14  ;;  %v252_v15 = vld [vmem:[%s1025_s29 + $0x1e0] sm:$0xff] }
  0x24   : > { %253 = vst [vmem:[%s162_s30 + $0x78] sm:$0xff] %v252_v15 }
  0x25 PF: > { %p840_p7 = scmp.ge.s32.totalorder %s957_s17, 1  ;;  %p258_p8 = scmp.lt.s32.totalorder %s957_s17, 5 }
  0x27   : > { %p259_p9 = pnand %p840_p7, %p258_p8 }
  0x28   : > { %v313_v16 = vld [vmem:[%s1206_s1] sm:$0xf] (!%p259_p9)  ;;  %vm370_vm0 = vcmask (!%p259_p9), 1043456   ;;  %s265_s7 = sand.u32 (!%p259_p9), 1, %s949_s15   ;;  %vm321_vm1 = vcmask (!%p259_p9), 31744   ;;  %vm535_vm2 = vcmask (!%p259_p9), 64512  }
  0x29   : > { %262 = sbr.rel (%p259_p9) target bundleno = 311 (0x137), region = 66  ;;  %883 = vmatprep.subr.msk.mxu0 (!%p259_p9), %vm370_vm0, %v313_v16  ;;  %s1049_s8 = sshll.u32 (!%p259_p9), %s265_s7, 7  ;;  %909 = vmatprep.subr.msk.mxu1 (!%p259_p9), %vm370_vm0, %v313_v16  ;;  %v1071_v33 = vld [vmem:[%s1207_s2] ss:$0 sm:$0xff] (!%p259_p9)  ;;  %vm642_vm3 = vcmask (!%p259_p9), 1040384   ;;  %vm644_vm4 = vcmask (!%p259_p9), 58368  }
  0x2a   : > { %884 = vmatpush3.msk.msra.mxu0 (!%p259_p9), %vm370_vm0, %v313_v16  ;;  %910 = vmatpush3.msk.msra.mxu1 (!%p259_p9), %vm370_vm0, %v313_v16  ;;  %s267_s9 = scalar_lea.vmem (!%p259_p9), [#allocation2], %s1049_s8  ;;  %s1078_s12 = scalar_lea.vmem (!%p259_p9), [#allocation3], %s1049_s8 }
  0x2b   : > { %v297_v17 = vld [vmem:[%s267_s9] sm:$0xff] (!%p259_p9)  ;;  %v298_v18 = vld [vmem:[%s267_s9 + $0x8] sm:$0xff] (!%p259_p9)  ;;  %v299_v19 = vld [vmem:[%s267_s9 + $0x10] sm:$0xff] (!%p259_p9)  ;;  %p293_p10 = scmp.lt.s32.totalorder (!%p259_p9), %s1000_s18, 3 }
  0x2c   : > { %885 = vmatprep.mubr.msk.f32.mxu0 (!%p259_p9), %vm321_vm1, %v297_v17  ;;  %v305_v20 = vld [vmem:[%s267_s9 + $0x40] sm:$0xff] (!%p259_p9)  ;;  %v300_v21 = vld [vmem:[%s267_s9 + $0x18] sm:$0xff] (!%p259_p9)  ;;  %v306_v22 = vld [vmem:[%s267_s9 + $0x48] sm:$0xff] (!%p259_p9) }
  0x2d   : > { %886 = vmatmul.mubr.msk.f32.vlgmr.msra.gmra.mrb[0].mxu0 (!%p259_p9), %vm321_vm1, %v298_v18  ;;  %897 = vmatprep.mubr.msk.f32.mxu1 (!%p259_p9), %vm321_vm1, %v305_v20  ;;  %v307_v23 = vld [vmem:[%s267_s9 + $0x50] sm:$0xff] (!%p259_p9)  ;;  %v301_v24 = vld [vmem:[%s267_s9 + $0x20] sm:$0xff] (!%p259_p9)  ;;  %v308_v25 = vld [vmem:[%s267_s9 + $0x58] sm:$0xff] (!%p259_p9) }
  0x2e   : > { %888 = vmatprep.mubr.msk.f32.mxu0 (!%p259_p9), %vm321_vm1, %v299_v19  ;;  %898 = vmatmul.mubr.msk.f32.vlgmr.msra.gmra.mrb[0].mxu1 (!%p259_p9), %vm321_vm1, %v306_v22  ;;  %v309_v26 = vld [vmem:[%s267_s9 + $0x60] sm:$0xff] (!%p259_p9)  ;;  %v302_v27 = vld [vmem:[%s267_s9 + $0x28] sm:$0xff] (!%p259_p9)  ;;  %v303_v28 = vld [vmem:[%s267_s9 + $0x30] sm:$0xff] (!%p259_p9) }
  0x2f   : > { %900 = vmatprep.mubr.msk.f32.mxu1 (!%p259_p9), %vm321_vm1, %v307_v23  ;;  %v310_v29 = vld [vmem:[%s267_s9 + $0x68] sm:$0xff] (!%p259_p9)  ;;  %v311_v30 = vld [vmem:[%s267_s9 + $0x70] sm:$0xff] (!%p259_p9)  ;;  %v304_v31 = vld [vmem:[%s267_s9 + $0x38] sm:$0xff] (!%p259_p9) }
  0x30   : > { %v312_v32 = vld [vmem:[%s267_s9 + $0x78] sm:$0xff]  ;;  %s294_s13 = scalar_select %p293_p10, %s1000_s18, 3 }
  0x31   : > { %889 = vmatmul.mubr.msk.f32.gmra.mrb[2].mxu0 %vm321_vm1, %v300_v21  ;;  %s863_s21 = sshll.u32 (%p1015_p5), %s1000_s18, 3 }
  0x32   : > { %891 = vmatprep.mubr.msk.f32.mxu0 %vm321_vm1, %v301_v24  ;;  %901 = vmatmul.mubr.msk.f32.gmra.mrb[2].mxu1 %vm321_vm1, %v308_v25  ;;  %s843_s14 = sshll.u32 %s294_s13, 1  ;;  %s658_s26 = scalar_lea.vmem (%p1015_p5), %s1208_s3, %s863_s21 }
  0x33   : > { %903 = vmatprep.mubr.msk.f32.mxu1 %vm321_vm1, %v309_v26  ;;  %s296_s20 = scalar_lea.vmem %s1209_s4, %s843_s14 }
  0x35   : > { %892 = vmatmul.mubr.msk.f32.gmra.mrb[4].mxu0 %vm321_vm1, %v302_v27 }
  0x36   : > { %894 = vmatprep.mubr.msk.f32.mxu0 %vm321_vm1, %v303_v28  ;;  %904 = vmatmul.mubr.msk.f32.gmra.mrb[4].mxu1 %vm321_vm1, %v310_v29 }
  0x37   : > { %906 = vmatprep.mubr.msk.f32.mxu1 %vm321_vm1, %v311_v30 }
  0x39   : > { %895 = vmatmul.mubr.msk.f32.gmra.mrb[6].mxu0 %vm321_vm1, %v304_v31 }
  0x3a   : > { %907 = vmatmul.mubr.msk.f32.gmra.mrb[6].mxu1 %vm321_vm1, %v312_v32 }
 0x100   : > { %v887_v34 = vpop.f32.mrb[0].mxu0 }
 0x101   : > { %v446_v35 = vadd.f32 %v887_v34, %v1071_v33  ;;  %v440_v36 = vpop.f32.mrb[1].mxu0  ;;  %v899_v38 = vpop.f32.mrb[0].mxu1 }
 0x102   : > { %v441_v37 = vadd.f32 %v1071_v33, %v440_v36  ;;  %v486_v40 = vadd.f32 %v899_v38, %v1071_v33  ;;  %v480_v41 = vpop.f32.mrb[1].mxu1 }
 0x103   : > { %v520_v39 = vmax.f32 %v446_v35, 0.0  ;;  %v481_v44 = vadd.f32 %v1071_v33, %v480_v41 }
 0x104   : > { %v519_v42 = vmax.f32 %v441_v37, 0.0  ;;  %v890_v43 = vpop.f32.mrb[2].mxu0  ;;  %v1084_v49 = vmax.f32 %v486_v40, 0.0 }
 0x105   : > { %537 = vst.msk [vmem:[%s1078_s12 + $0x8] sm:$0xff] %vm535_vm2, %v520_v39  ;;  %v553_v45 = vsel %vm535_vm2, %v520_v39, 0.0  ;;  %v590_v46 = vmul.f32 %v520_v39, %v520_v39  ;;  %v456_v47 = vadd.f32 %v890_v43, %v1071_v33  ;;  %v450_v48 = vpop.f32.mrb[3].mxu0  ;;  %v1090_v53 = vmax.f32 %v481_v44, 0.0  ;;  %v902_v54 = vpop.f32.mrb[2].mxu1 }
 0x106   : > { %536 = vst.msk [vmem:[%s1078_s12] sm:$0xff] %vm535_vm2, %v519_v42  ;;  %v552_v50 = vsel %vm535_vm2, %v519_v42, 0.0  ;;  %v589_v51 = vmul.f32 %v519_v42, %v519_v42  ;;  %v451_v52 = vadd.f32 %v1071_v33, %v450_v48  ;;  %545 = vst.msk [vmem:[%s1078_s12 + $0x48] sm:$0xff] %vm535_vm2, %v1084_v49  ;;  %v490_v58 = vpop.f32.mrb[3].mxu1  ;;  %v496_v14 = vadd.f32 %v902_v54, %v1071_v33 }
 0x107   : > { %v606_v55 = vsel %vm535_vm2, %v590_v46, 0.0  ;;  %v554_v56 = vadd.f32 %v553_v45, %v552_v50  ;;  %v522_v57 = vmax.f32 %v456_v47, 0.0  ;;  %544 = vst.msk [vmem:[%s1078_s12 + $0x40] sm:$0xff] %vm535_vm2, %v1090_v53  ;;  %v491_v19 = vadd.f32 %v1071_v33, %v490_v58 }
 0x108   : > { %v605_v59 = vsel %vm535_vm2, %v589_v51, 0.0  ;;  %v521_v60 = vmax.f32 %v451_v52, 0.0  ;;  %v893_v61 = vpop.f32.mrb[4].mxu0  ;;  %v597_v28 = vmul.f32 %v1090_v53, %v1090_v53  ;;  %v530_v34 = vmax.f32 %v496_v14, 0.0 }
 0x109   : > { %v607_v62 = vadd.f32 %v606_v55, %v605_v59  ;;  %539 = vst.msk [vmem:[%s1078_s12 + $0x18] sm:$0xff] %vm535_vm2, %v522_v57  ;;  %v592_v63 = vmul.f32 %v522_v57, %v522_v57  ;;  %v466_v0 = vadd.f32 %v893_v61, %v1071_v33  ;;  %v460_v1 = vpop.f32.mrb[5].mxu0  ;;  %v905_v5 = vpop.f32.mrb[4].mxu1  ;;  %v557_v6 = vsel %vm535_vm2, %v522_v57, 0.0 }
 0x10a   : > { %538 = vst.msk [vmem:[%s1078_s12 + $0x10] sm:$0xff] %vm535_vm2, %v521_v60  ;;  %v555_v2 = vsel %vm535_vm2, %v521_v60, 0.0  ;;  %v591_v3 = vmul.f32 %v521_v60, %v521_v60  ;;  %v461_v4 = vadd.f32 %v1071_v33, %v460_v1  ;;  %v500_v9 = vpop.f32.mrb[5].mxu1  ;;  %v529_v37 = vmax.f32 %v491_v19, 0.0  ;;  %547 = vst.msk [vmem:[%s1078_s12 + $0x58] sm:$0xff] %vm535_vm2, %v530_v34 }
 0x10b   : > { %v556_v7 = vadd.f32 %v555_v2, %v554_v56  ;;  %v524_v8 = vmax.f32 %v466_v0, 0.0  ;;  %v610_v10 = vsel %vm535_vm2, %v592_v63, 0.0  ;;  %v506_v38 = vadd.f32 %v905_v5, %v1071_v33 }
 0x10c   : > { %v608_v11 = vsel %vm535_vm2, %v591_v3, 0.0  ;;  %v523_v12 = vmax.f32 %v461_v4, 0.0  ;;  %v896_v13 = vpop.f32.mrb[6].mxu0  ;;  %v598_v45 = vmul.f32 %v1084_v49, %v1084_v49  ;;  %546 = vst.msk [vmem:[%s1078_s12 + $0x50] sm:$0xff] %vm535_vm2, %v529_v37  ;;  %v567_v48 = vsel %vm535_vm2, %v1090_v53, 0.0 }
 0x10d   : > { %v609_v15 = vadd.f32 %v608_v11, %v607_v62  ;;  %541 = vst.msk [vmem:[%s1078_s12 + $0x28] sm:$0xff] %vm535_vm2, %v524_v8  ;;  %v594_v16 = vmul.f32 %v524_v8, %v524_v8  ;;  %v558_v17 = vadd.f32 %v557_v6, %v556_v7  ;;  %v470_v18 = vpop.f32.mrb[7].mxu0  ;;  %v476_v22 = vadd.f32 %v896_v13, %v1071_v33  ;;  %v908_v24 = vpop.f32.mrb[6].mxu1 }
 0x10e   : > { %540 = vst.msk [vmem:[%s1078_s12 + $0x20] sm:$0xff] %vm535_vm2, %v523_v12  ;;  %v559_v20 = vsel %vm535_vm2, %v523_v12, 0.0  ;;  %v593_v21 = vmul.f32 %v523_v12, %v523_v12  ;;  %v471_v23 = vadd.f32 %v1071_v33, %v470_v18  ;;  %v561_v25 = vsel %vm535_vm2, %v524_v8, 0.0  ;;  %v510_v29 = vpop.f32.mrb[7].mxu1 }
 0x10f   : > { %v560_v26 = vadd.f32 %v559_v20, %v558_v17  ;;  %v611_v27 = vadd.f32 %v610_v10, %v609_v15  ;;  %v526_v31 = vmax.f32 %v476_v22, 0.0  ;;  %v614_v39 = vsel %vm535_vm2, %v594_v16, 0.0 }
 0x110   : > { %v612_v30 = vsel %vm535_vm2, %v593_v21, 0.0  ;;  %v525_v32 = vmax.f32 %v471_v23, 0.0  ;;  %v620_v50 = vsel %vm535_vm2, %v597_v28, 0.0  ;;  %v532_v55 = vmax.f32 %v506_v38, 0.0 }
 0x111   : > { %v613_v35 = vadd.f32 %v612_v30, %v611_v27  ;;  %v562_v36 = vadd.f32 %v561_v25, %v560_v26  ;;  %543 = vst.msk [vmem:[%s1078_s12 + $0x38] sm:$0xff] %vm535_vm2, %v526_v31  ;;  %v596_v40 = vmul.f32 %v526_v31, %v526_v31  ;;  %v565_v46 = vsel %vm535_vm2, %v526_v31, 0.0 }
 0x112   : > { %542 = vst.msk [vmem:[%s1078_s12 + $0x30] sm:$0xff] %vm535_vm2, %v525_v32  ;;  %v563_v41 = vsel %vm535_vm2, %v525_v32, 0.0  ;;  %v595_v42 = vmul.f32 %v525_v32, %v525_v32  ;;  %v599_v56 = vmul.f32 %v529_v37, %v529_v37  ;;  %v501_v57 = vadd.f32 %v1071_v33, %v500_v9  ;;  %549 = vst.msk [vmem:[%s1078_s12 + $0x68] sm:$0xff] %vm535_vm2, %v532_v55 }
 0x113   : > { %v564_v43 = vadd.f32 %v563_v41, %v562_v36  ;;  %v615_v44 = vadd.f32 %v614_v39, %v613_v35  ;;  %v618_v51 = vsel %vm535_vm2, %v596_v40, 0.0  ;;  %v516_v58 = vadd.f32 %v908_v24, %v1071_v33 }
 0x114   : > { %v616_v47 = vsel %vm535_vm2, %v595_v42, 0.0  ;;  %v511_v59 = vadd.f32 %v1071_v33, %v510_v29  ;;  %v569_v60 = vsel %vm535_vm2, %v1084_v49, 0.0  ;;  %v571_v62 = vsel %vm535_vm2, %v529_v37, 0.0 }
 0x115   : > { %v617_v52 = vadd.f32 %v616_v47, %v615_v44  ;;  %v566_v54 = vadd.f32 %v565_v46, %v564_v43  ;;  %v531_v63 = vmax.f32 %v501_v57, 0.0  ;;  %v534_v0 = vmax.f32 %v516_v58, 0.0  ;;  %v716_v46 = vld [vmem:[%s1078_s12] sm:$0xff] (%p1015_p5)  ;;  %v718_v47 = vld [vmem:[%s1078_s12 + $0x8] sm:$0xff] (%p1015_p5)  ;;  %v736_v58 = vld [vmem:[%s1078_s12 + $0x50] sm:$0xff] (%p1015_p5) }
 0x116   : > { %v533_v1 = vmax.f32 %v511_v59, 0.0  ;;  %v622_v4 = vsel %vm535_vm2, %v598_v45, 0.0  ;;  %v600_v5 = vmul.f32 %v530_v34, %v530_v34  ;;  %v624_v33 = vsel %vm535_vm2, %v599_v56, 0.0  ;;  %717 = vst [vmem:[%s658_s26] sm:$0xff] (%p1015_p5), %v716_v46  ;;  %719 = vst [vmem:[%s658_s26 + $0x20] sm:$0xff] (%p1015_p5), %v718_v47  ;;  %v732_v56 = vld [vmem:[%s1078_s12 + $0x40] sm:$0xff] (%p1015_p5)  ;;  %v734_v57 = vld [vmem:[%s1078_s12 + $0x48] sm:$0xff] (%p1015_p5) }
 0x117   : > { %v568_v53 = vadd.f32 %v567_v48, %v566_v54  ;;  %v619_v61 = vadd.f32 %v618_v51, %v617_v52  ;;  %548 = vst.msk [vmem:[%s1078_s12 + $0x60] sm:$0xff] %vm535_vm2, %v531_v63  ;;  %v601_v49 = vmul.f32 %v531_v63, %v531_v63  ;;  %551 = vst.msk [vmem:[%s1078_s12 + $0x78] sm:$0xff] %vm535_vm2, %v534_v0  ;;  %v573_v8 = vsel %vm535_vm2, %v530_v34, 0.0  ;;  %v720_v48 = vld [vmem:[%s1078_s12 + $0x10] sm:$0xff] (%p1015_p5)  ;;  %v724_v51 = vld [vmem:[%s1078_s12 + $0x20] sm:$0xff] (%p1015_p5) }
 0x118   : > { %550 = vst.msk [vmem:[%s1078_s12 + $0x70] sm:$0xff] %vm535_vm2, %v533_v1  ;;  %v575_v9 = vsel %vm535_vm2, %v531_v63, 0.0  ;;  %v626_v12 = vsel %vm535_vm2, %v600_v5, 0.0  ;;  %v602_v13 = vmul.f32 %v532_v55, %v532_v55  ;;  %v603_v15 = vmul.f32 %v533_v1, %v533_v1  ;;  %v726_v52 = vld [vmem:[%s1078_s12 + $0x28] sm:$0xff] (%p1015_p5)  ;;  %721 = vst [vmem:[%s658_s26 + $0x40] sm:$0xff] (%p1015_p5), %v720_v48  ;;  %v738_v59 = vld [vmem:[%s1078_s12 + $0x58] sm:$0xff] (%p1015_p5) }
 0x119   : > { %v621_v2 = vadd.f32 %v620_v50, %v619_v61  ;;  %v570_v3 = vadd.f32 %v569_v60, %v568_v53  ;;  %v628_v14 = vsel %vm535_vm2, %v601_v49, 0.0  ;;  %v577_v18 = vsel %vm535_vm2, %v532_v55, 0.0  ;;  %v722_v50 = vld [vmem:[%s1078_s12 + $0x18] sm:$0xff] (%p1015_p5)  ;;  %725 = vst [vmem:[%s658_s26 + $0x80] sm:$0xff] (%p1015_p5), %v724_v51  ;;  %727 = vst [vmem:[%s658_s26 + $0xa0] sm:$0xff] (%p1015_p5), %v726_v52  ;;  %v728_v54 = vld [vmem:[%s1078_s12 + $0x30] sm:$0xff] (%p1015_p5) }
 0x11a   : > { %v579_v19 = vsel %vm535_vm2, %v533_v1, 0.0  ;;  %v630_v22 = vsel %vm535_vm2, %v602_v13, 0.0  ;;  %v604_v23 = vmul.f32 %v534_v0, %v534_v0  ;;  %v632_v24 = vsel %vm535_vm2, %v603_v15, 0.0  ;;  %723 = vst [vmem:[%s658_s26 + $0x60] sm:$0xff] (%p1015_p5), %v722_v50  ;;  %v730_v55 = vld [vmem:[%s1078_s12 + $0x38] sm:$0xff] (%p1015_p5)  ;;  %729 = vst [vmem:[%s658_s26 + $0xc0] sm:$0xff] (%p1015_p5), %v728_v54 }
 0x11b   : > { %v572_v6 = vadd.f32 %v571_v62, %v570_v3  ;;  %v623_v7 = vadd.f32 %v622_v4, %v621_v2  ;;  %v581_v27 = vsel %vm535_vm2, %v534_v0, 0.0  ;;  %731 = vst [vmem:[%s658_s26 + $0xe0] sm:$0xff] (%p1015_p5), %v730_v55  ;;  %733 = vst [vmem:[%s658_s26 + $0x100] sm:$0xff] (%p1015_p5), %v732_v56  ;;  %v742_v53 = vld [vmem:[%s1078_s12 + $0x68] sm:$0xff] (%p1015_p5) }
 0x11c   : > { %v634_v30 = vsel %vm535_vm2, %v604_v23, 0.0  ;;  %735 = vst [vmem:[%s658_s26 + $0x120] sm:$0xff] (%p1015_p5), %v734_v57  ;;  %737 = vst [vmem:[%s658_s26 + $0x140] sm:$0xff] (%p1015_p5), %v736_v58 }
 0x11d   : > { %v625_v10 = vadd.f32 %v624_v33, %v623_v7  ;;  %v574_v11 = vadd.f32 %v573_v8, %v572_v6  ;;  %739 = vst [vmem:[%s658_s26 + $0x160] sm:$0xff] (%p1015_p5), %v738_v59  ;;  %743 = vst [vmem:[%s658_s26 + $0x1a0] sm:$0xff] (%p1015_p5), %v742_v53 }
 0x11e   : > { %v740_v60 = vld [vmem:[%s1078_s12 + $0x60] sm:$0xff] (%p1015_p5)  ;;  %v746_v62 = vld [vmem:[%s1078_s12 + $0x78] sm:$0xff] (%p1015_p5) }
 0x11f   : > { %v576_v16 = vadd.f32 %v575_v9, %v574_v11  ;;  %v627_v17 = vadd.f32 %v626_v12, %v625_v10  ;;  %v744_v61 = vld [vmem:[%s1078_s12 + $0x70] sm:$0xff] (%p1015_p5)  ;;  %741 = vst [vmem:[%s658_s26 + $0x180] sm:$0xff] (%p1015_p5), %v740_v60  ;;  %747 = vst [vmem:[%s658_s26 + $0x1e0] sm:$0xff] (%p1015_p5), %v746_v62 }
 0x120   : > { %745 = vst [vmem:[%s658_s26 + $0x1c0] sm:$0xff] (%p1015_p5), %v744_v61 }
 0x121   : > { %v629_v20 = vadd.f32 %v628_v14, %v627_v17  ;;  %v578_v21 = vadd.f32 %v577_v18, %v576_v16 }
 0x123   : > { %v580_v25 = vadd.f32 %v579_v19, %v578_v21  ;;  %v631_v26 = vadd.f32 %v630_v22, %v629_v20 }
 0x125   : > { %v582_v28 = vadd.f32 %v581_v27, %v580_v25  ;;  %v633_v29 = vadd.f32 %v632_v24, %v631_v26 }
 0x127   : > { %v583_v31 = vrot.slane %v582_v28, 4  ;;  %v635_v32 = vadd.f32 %v634_v30, %v633_v29 }
 0x129   : > { %v584_v34 = vadd.f32 %v583_v31, %v582_v28  ;;  %v636_v35 = vrot.slane %v635_v32, 4 }
 0x12b   : > { %v585_v36 = vrot.slane %v584_v34, 2  ;;  %v637_v37 = vadd.f32 %v636_v35, %v635_v32 }
 0x12d   : > { %v586_v38 = vadd.f32 %v585_v36, %v584_v34  ;;  %v638_v39 = vrot.slane %v637_v37, 2 }
 0x12f   : > { %v587_v40 = vrot.slane %v586_v38, 1  ;;  %v639_v41 = vadd.f32 %v638_v39, %v637_v37 }
 0x130   : > { %656 = sbr.rel (!%p1015_p5) target bundleno = 311 (0x137), region = 74 }
 0x131   : > { %v640_v42 = vrot.slane %v639_v41, 1  ;;  %v588_v43 = vadd.f32 %v587_v40, %v586_v38 }
 0x133   : > { %v641_v44 = vadd.f32 %v640_v42, %v639_v41 }
 0x135   : > { %v643_v45 = vsel %vm642_vm3, %v588_v43, %v641_v44 }
 0x136   : > { %645 = vst.msk [vmem:[%s296_s20] sm:$0x3] %vm644_vm4, %v643_v45 }
 0x137 PF: > { %p12_p11 = scmp.ge.s32.totalorder %s1003_s19, 6   ;;  %s1211_s15 = smov %s953_s16 }
 0x138   : > { %s1212_s16 = smov %s1013_s22  ;;  %s1213_s17 = smov %s1003_s19 }
 0x139   :  { %14 = sbr.rel (!%p12_p11) target bundleno = 2 (0x2), region = 155 }

// kernel: fire_deconv_forward.7
= control target key start
LH: loop header
LB: loop body
LE: loop exit
PB: predicated region body
PF: predicated region fallthrough
CT: control target
= control target key end

     0   :  { %s578_s12 = smov 0   ;;  %s580_s13 = smov 0   ;;  %s752_s0 = inlined_call_operand.vmem [shape: f32[16,32,32], index: 0, kind: input, shape index: {}]   ;;  %s753_s1 = inlined_call_operand.vmem [shape: f32[1,32], index: 1, kind: input, shape index: {}]   ;;  %s754_s2 = inlined_call_operand.vmem [shape: f32[1,32], index: 2, kind: input, shape index: {}]   ;;  %s755_s3 = inlined_call_operand.vmem [shape: f32[16,32,32], index: 3, kind: output, shape index: {}]  }
   0x1   :  { %s582_s14 = smov 0  }
   0x2 LB: > { %s495_s15 = sadd.s32 4294967295, %s556_s14   ;;  %s595_s16 = sadd.s32 1, %s556_s14   ;;  %s556_s14 = sphi %s582_s14, %s759_s14   ;;  %s552_s13 = sphi %s580_s13, %s758_s13   ;;  %s548_s12 = sphi %s578_s12, %s757_s12  }
   0x3   : > { %s17_s17 = ssub.s32 %s556_s14, %s595_s16  ;;  %s20_s18 = sadd.s32 1, %s552_s13 }
   0x4   : > { %p18_p0 = scmp.eq.s32.totalorder %s17_s17, 0  ;;  %p27_p1 = scmp.ne.s32.totalorder %s552_s13, %s548_s12 }
   0x5   : > { %p28_p2 = scmp.eq.s32.totalorder %s556_s14, 0  ;;  %p99_p3 = scmp.eq.s32.totalorder %s495_s15, 3 }
   0x6   : > { %s606_s19 = scalar_select %p18_p0, %s552_s13, %s20_s18  }
   0x7   : > { %p29_p4 = por %p28_p2, %p27_p1  ;;  %p608_p5 = por %p99_p3, %p27_p1 }
   0x8   : > { %p498_p6 = scmp.ge.s32.totalorder %s556_s14, 4 }
   0xa   : > { %127 = sbr.rel (%p498_p6) target bundleno = 37 (0x25), region = 24 }
  0x11   : > { %130 = sbr.rel (!%p29_p4) target bundleno = 37 (0x25), region = 28  ;;  %s132_s21 = sand.u32 (%p29_p4), 1, %s552_s13  }
  0x12   : > { %s500_s22 = sshll.u32 (%p29_p4), %s556_s14, 3  ;;  %s499_s23 = sshll.u32 (%p29_p4), %s132_s21, 7 }
  0x13   : > { %s618_s26 = scalar_lea.vmem (%p29_p4), %s752_s0, %s500_s22  ;;  %s134_s27 = scalar_lea.vmem (%p29_p4), [#allocation2], %s499_s23 }
  0x14   : > { %v194_v0 = vld [vmem:[%s618_s26] sm:$0xff] (%p29_p4) }
  0x15   : > { %v196_v1 = vld [vmem:[%s618_s26 + $0x20] sm:$0xff] (%p29_p4)  ;;  %195 = vst [vmem:[%s134_s27] sm:$0xff] (%p29_p4), %v194_v0 }
  0x16   : > { %v198_v2 = vld [vmem:[%s618_s26 + $0x40] sm:$0xff] (%p29_p4)  ;;  %197 = vst [vmem:[%s134_s27 + $0x8] sm:$0xff] (%p29_p4), %v196_v1 }
  0x17   : > { %199 = vst [vmem:[%s134_s27 + $0x10] sm:$0xff] (%p29_p4), %v198_v2  ;;  %v200_v3 = vld [vmem:[%s618_s26 + $0x60] sm:$0xff] (%p29_p4) }
  0x18   : > { %v202_v4 = vld [vmem:[%s618_s26 + $0x80] sm:$0xff]  ;;  %201 = vst [vmem:[%s134_s27 + $0x18] sm:$0xff] %v200_v3 }
  0x19   : > { %v204_v5 = vld [vmem:[%s618_s26 + $0xa0] sm:$0xff]  ;;  %203 = vst [vmem:[%s134_s27 + $0x20] sm:$0xff] %v202_v4 }
  0x1a   : > { %205 = vst [vmem:[%s134_s27 + $0x28] sm:$0xff] %v204_v5  ;;  %v206_v6 = vld [vmem:[%s618_s26 + $0xc0] sm:$0xff] }
  0x1b   : > { %v208_v7 = vld [vmem:[%s618_s26 + $0xe0] sm:$0xff]  ;;  %207 = vst [vmem:[%s134_s27 + $0x30] sm:$0xff] %v206_v6 }
  0x1c   : > { %v210_v8 = vld [vmem:[%s618_s26 + $0x100] sm:$0xff]  ;;  %209 = vst [vmem:[%s134_s27 + $0x38] sm:$0xff] %v208_v7 }
  0x1d   : > { %211 = vst [vmem:[%s134_s27 + $0x40] sm:$0xff] %v210_v8  ;;  %v212_v9 = vld [vmem:[%s618_s26 + $0x120] sm:$0xff] }
  0x1e   : > { %v214_v10 = vld [vmem:[%s618_s26 + $0x140] sm:$0xff]  ;;  %213 = vst [vmem:[%s134_s27 + $0x48] sm:$0xff] %v212_v9 }
  0x1f   : > { %v216_v11 = vld [vmem:[%s618_s26 + $0x160] sm:$0xff]  ;;  %215 = vst [vmem:[%s134_s27 + $0x50] sm:$0xff] %v214_v10 }
  0x20   : > { %217 = vst [vmem:[%s134_s27 + $0x58] sm:$0xff] %v216_v11  ;;  %v218_v12 = vld [vmem:[%s618_s26 + $0x180] sm:$0xff] }
  0x21   : > { %v220_v13 = vld [vmem:[%s618_s26 + $0x1a0] sm:$0xff]  ;;  %219 = vst [vmem:[%s134_s27 + $0x60] sm:$0xff] %v218_v12 }
  0x22   : > { %v222_v14 = vld [vmem:[%s618_s26 + $0x1c0] sm:$0xff]  ;;  %221 = vst [vmem:[%s134_s27 + $0x68] sm:$0xff] %v220_v13 }
  0x23   : > { %223 = vst [vmem:[%s134_s27 + $0x70] sm:$0xff] %v222_v14  ;;  %v224_v15 = vld [vmem:[%s618_s26 + $0x1e0] sm:$0xff] }
  0x24   : > { %225 = vst [vmem:[%s134_s27 + $0x78] sm:$0xff] %v224_v15 }
  0x25 PF: > { %p501_p7 = scmp.ge.s32.totalorder %s556_s14, 1  ;;  %p230_p8 = scmp.lt.s32.totalorder %s556_s14, 5 }
  0x27   : > { %p231_p9 = pnand %p501_p7, %p230_p8 }
  0x28   : > { %s237_s28 = sand.u32 (!%p231_p9), 1, %s548_s12   ;;  %v504_v16 = vld [vmem:[%s753_s1] ss:$0 sm:$0xff] (!%p231_p9)  ;;  %vm321_vm0 = vcmask (!%p231_p9), 261120  }
  0x29   : > { %234 = sbr.rel (%p231_p9) target bundleno = 65 (0x41), region = 66  ;;  %s639_s29 = sshll.u32 (!%p231_p9), %s237_s28, 7  ;;  %v647_v17 = vld [vmem:[%s754_s2] ss:$0 sm:$0xff] (!%p231_p9) }
  0x2a   : > { %s650_s7 = scalar_lea.vmem (!%p231_p9), [#allocation2], %s639_s29  ;;  %s674_s8 = scalar_lea.vmem (!%p231_p9), [#allocation3], %s639_s29 }
  0x2b   : > { %v259_v18 = vld [vmem:[%s650_s7] sm:$0xff] (!%p231_p9)  ;;  %v260_v19 = vld [vmem:[%s650_s7 + $0x8] sm:$0xff] (!%p231_p9)  ;;  %v261_v20 = vld [vmem:[%s650_s7 + $0x10] sm:$0xff] (!%p231_p9) }
  0x2c   : > { %v282_v21 = vmul.f32 (!%p231_p9), %v504_v16, %v259_v18  ;;  %v283_v22 = vmul.f32 (!%p231_p9), %v504_v16, %v260_v19  ;;  %v284_v23 = vmul.f32 (!%p231_p9), %v504_v16, %v261_v20  ;;  %v262_v24 = vld [vmem:[%s650_s7 + $0x18] sm:$0xff] (!%p231_p9)  ;;  %v263_v25 = vld [vmem:[%s650_s7 + $0x20] sm:$0xff] (!%p231_p9)  ;;  %v264_v26 = vld [vmem:[%s650_s7 + $0x28] sm:$0xff] (!%p231_p9) }
  0x2d   : > { %v285_v27 = vmul.f32 (!%p231_p9), %v504_v16, %v262_v24  ;;  %v286_v28 = vmul.f32 (!%p231_p9), %v504_v16, %v263_v25  ;;  %v287_v29 = vmul.f32 (!%p231_p9), %v504_v16, %v264_v26  ;;  %v265_v30 = vld [vmem:[%s650_s7 + $0x30] sm:$0xff] (!%p231_p9)  ;;  %v266_v31 = vld [vmem:[%s650_s7 + $0x38] sm:$0xff] (!%p231_p9)  ;;  %v267_v32 = vld [vmem:[%s650_s7 + $0x40] sm:$0xff] (!%p231_p9) }
  0x2e   : > { %v305_v33 = vadd.f32 (!%p231_p9), %v647_v17, %v282_v21  ;;  %v306_v34 = vadd.f32 (!%p231_p9), %v647_v17, %v283_v22  ;;  %v307_v35 = vadd.f32 (!%p231_p9), %v647_v17, %v284_v23  ;;  %v288_v36 = vmul.f32 (!%p231_p9), %v504_v16, %v265_v30  ;;  %v268_v37 = vld [vmem:[%s650_s7 + $0x48] sm:$0xff] (!%p231_p9)  ;;  %v269_v38 = vld [vmem:[%s650_s7 + $0x50] sm:$0xff] (!%p231_p9)  ;;  %v270_v39 = vld [vmem:[%s650_s7 + $0x58] sm:$0xff] (!%p231_p9) }
  0x2f   : > { %v308_v40 = vadd.f32 (!%p231_p9), %v647_v17, %v285_v27  ;;  %v309_v41 = vadd.f32 (!%p231_p9), %v647_v17, %v286_v28  ;;  %v310_v42 = vadd.f32 (!%p231_p9), %v647_v17, %v287_v29  ;;  %v289_v43 = vmul.f32 (!%p231_p9), %v504_v16, %v266_v31  ;;  %v271_v44 = vld [vmem:[%s650_s7 + $0x60] sm:$0xff] (!%p231_p9)  ;;  %v272_v45 = vld [vmem:[%s650_s7 + $0x68] sm:$0xff] (!%p231_p9)  ;;  %v273_v46 = vld [vmem:[%s650_s7 + $0x70] sm:$0xff] (!%p231_p9) }
  0x30   : > { %322 = vst.msk [vmem:[%s674_s8] sm:$0xff] %vm321_vm0, %v305_v33  ;;  %323 = vst.msk [vmem:[%s674_s8 + $0x8] sm:$0xff] %vm321_vm0, %v306_v34  ;;  %v311_v47 = vadd.f32 %v647_v17, %v288_v36  ;;  %v290_v48 = vmul.f32 %v504_v16, %v267_v32  ;;  %v291_v49 = vmul.f32 %v504_v16, %v268_v37  ;;  %v274_v51 = vld [vmem:[%s650_s7 + $0x78] sm:$0xff]  ;;  %s507_s9 = sshll.u32 (%p608_p5), %s495_s15, 3 }
  0x31   : > { %324 = vst.msk [vmem:[%s674_s8 + $0x10] sm:$0xff] %vm321_vm0, %v307_v35  ;;  %v292_v50 = vmul.f32 %v504_v16, %v269_v38  ;;  %325 = vst.msk [vmem:[%s674_s8 + $0x18] sm:$0xff] %vm321_vm0, %v308_v40  ;;  %v312_v52 = vadd.f32 %v647_v17, %v289_v43  ;;  %v293_v53 = vmul.f32 %v504_v16, %v270_v39  ;;  %s346_s12 = scalar_lea.vmem (%p608_p5), %s755_s3, %s507_s9 }
  0x32   : > { %326 = vst.msk [vmem:[%s674_s8 + $0x20] sm:$0xff] %vm321_vm0, %v309_v41  ;;  %327 = vst.msk [vmem:[%s674_s8 + $0x28] sm:$0xff] %vm321_vm0, %v310_v42  ;;  %v294_v54 = vmul.f32 %v504_v16, %v271_v44  ;;  %v295_v55 = vmul.f32 %v504_v16, %v272_v45  ;;  %v313_v56 = vadd.f32 %v647_v17, %v290_v48  ;;  %344 = sbr.rel (!%p608_p5) target bundleno = 65 (0x41), region = 74 }
  0x33   : > { %328 = vst.msk [vmem:[%s674_s8 + $0x30] sm:$0xff] %vm321_vm0, %v311_v47  ;;  %v314_v57 = vadd.f32 %v647_v17, %v291_v49  ;;  %v315_v58 = vadd.f32 %v647_v17, %v292_v50  ;;  %v296_v59 = vmul.f32 %v504_v16, %v273_v46  ;;  %329 = vst.msk [vmem:[%s674_s8 + $0x38] sm:$0xff] %vm321_vm0, %v312_v52 }
  0x34   : > { %v316_v60 = vadd.f32 %v647_v17, %v293_v53  ;;  %v317_v61 = vadd.f32 %v647_v17, %v294_v54  ;;  %v318_v62 = vadd.f32 %v647_v17, %v295_v55  ;;  %v297_v63 = vmul.f32 %v504_v16, %v274_v51  ;;  %330 = vst.msk [vmem:[%s674_s8 + $0x40] sm:$0xff] %vm321_vm0, %v313_v56 }
  0x35   : > { %331 = vst.msk [vmem:[%s674_s8 + $0x48] sm:$0xff] %vm321_vm0, %v314_v57  ;;  %332 = vst.msk [vmem:[%s674_s8 + $0x50] sm:$0xff] %vm321_vm0, %v315_v58  ;;  %v319_v0 = vadd.f32 %v647_v17, %v296_v59 }
  0x36   : > { %333 = vst.msk [vmem:[%s674_s8 + $0x58] sm:$0xff] %vm321_vm0, %v316_v60  ;;  %334 = vst.msk [vmem:[%s674_s8 + $0x60] sm:$0xff] %vm321_vm0, %v317_v61  ;;  %v320_v1 = vadd.f32 %v647_v17, %v297_v63 }
  0x37   : > { %335 = vst.msk [vmem:[%s674_s8 + $0x68] sm:$0xff] %vm321_vm0, %v318_v62  ;;  %336 = vst.msk [vmem:[%s674_s8 + $0x70] sm:$0xff] %vm321_vm0, %v319_v0  ;;  %v404_v2 = vld [vmem:[%s674_s8] sm:$0xff] (%p608_p5)  ;;  %v406_v3 = vld [vmem:[%s674_s8 + $0x8] sm:$0xff] (%p608_p5) }
  0x38   : > { %337 = vst.msk [vmem:[%s674_s8 + $0x78] sm:$0xff] %vm321_vm0, %v320_v1  ;;  %v408_v4 = vld [vmem:[%s674_s8 + $0x10] sm:$0xff] (%p608_p5)  ;;  %v410_v5 = vld [vmem:[%s674_s8 + $0x18] sm:$0xff] (%p608_p5)  ;;  %405 = vst [vmem:[%s346_s12] sm:$0xff] (%p608_p5), %v404_v2 }
  0x39   : > { %v412_v6 = vld [vmem:[%s674_s8 + $0x20] sm:$0xff]  ;;  %v414_v7 = vld [vmem:[%s674_s8 + $0x28] sm:$0xff]  ;;  %407 = vst [vmem:[%s346_s12 + $0x20] sm:$0xff] %v406_v3  ;;  %409 = vst [vmem:[%s346_s12 + $0x40] sm:$0xff] %v408_v4 }
  0x3a   : > { %411 = vst [vmem:[%s346_s12 + $0x60] sm:$0xff] %v410_v5  ;;  %413 = vst [vmem:[%s346_s12 + $0x80] sm:$0xff] %v412_v6  ;;  %v416_v8 = vld [vmem:[%s674_s8 + $0x30] sm:$0xff]  ;;  %v418_v9 = vld [vmem:[%s674_s8 + $0x38] sm:$0xff] }
  0x3b   : > { %415 = vst [vmem:[%s346_s12 + $0xa0] sm:$0xff] %v414_v7  ;;  %v420_v10 = vld [vmem:[%s674_s8 + $0x40] sm:$0xff]  ;;  %417 = vst [vmem:[%s346_s12 + $0xc0] sm:$0xff] %v416_v8 }
  0x3c   : > { %419 = vst [vmem:[%s346_s12 + $0xe0] sm:$0xff] %v418_v9  ;;  %421 = vst [vmem:[%s346_s12 + $0x100] sm:$0xff] %v420_v10  ;;  %v422_v11 = vld [vmem:[%s674_s8 + $0x48] sm:$0xff]  ;;  %v424_v12 = vld [vmem:[%s674_s8 + $0x50] sm:$0xff] }
  0x3d   : > { %v426_v13 = vld [vmem:[%s674_s8 + $0x58] sm:$0xff]  ;;  %423 = vst [vmem:[%s346_s12 + $0x120] sm:$0xff] %v422_v11  ;;  %425 = vst [vmem:[%s346_s12 + $0x140] sm:$0xff] %v424_v12  ;;  %v428_v14 = vld [vmem:[%s674_s8 + $0x60] sm:$0xff] }
  0x3e   : > { %427 = vst [vmem:[%s346_s12 + $0x160] sm:$0xff] %v426_v13  ;;  %v430_v15 = vld [vmem:[%s674_s8 + $0x68] sm:$0xff]  ;;  %v432_v16 = vld [vmem:[%s674_s8 + $0x70] sm:$0xff]  ;;  %429 = vst [vmem:[%s346_s12 + $0x180] sm:$0xff] %v428_v14 }
  0x3f   : > { %431 = vst [vmem:[%s346_s12 + $0x1a0] sm:$0xff] %v430_v15  ;;  %433 = vst [vmem:[%s346_s12 + $0x1c0] sm:$0xff] %v432_v16  ;;  %v434_v17 = vld [vmem:[%s674_s8 + $0x78] sm:$0xff] }
  0x40   : > { %435 = vst [vmem:[%s346_s12 + $0x1e0] sm:$0xff] %v434_v17 }
  0x41 PF: > { %p10_p10 = scmp.ge.s32.totalorder %s595_s16, 6   ;;  %s757_s12 = smov %s552_s13 }
  0x42   : > { %s758_s13 = smov %s606_s19  ;;  %s759_s14 = smov %s595_s16 }
  0x43   :  { %12 = sbr.rel (!%p10_p10) target bundleno = 2 (0x2), region = 143 }

// kernel: fire_deconv_forward.6
= control target key start
LH: loop header
LB: loop body
LE: loop exit
PB: predicated region body
PF: predicated region fallthrough
CT: control target
= control target key end

     0   :  { %s1422_s15 = smov 0   ;;  %s1424_s16 = smov 0   ;;  %s1926_s0 = inlined_call_operand.vmem [shape: f32[2,16,32,8], index: 0, kind: input, shape index: {}]   ;;  %s1927_s1 = inlined_call_operand.vmem [shape: f32[8,16], index: 1, kind: input, shape index: {}]   ;;  %s1928_s2 = inlined_call_operand.vmem [shape: f32[1,16], index: 2, kind: input, shape index: {}]   ;;  %s1929_s3 = inlined_call_operand.vmem [shape: f32[16,32,32], index: 3, kind: output, shape index: {0}]   ;;  %s1930_s4 = inlined_call_operand.vmem [shape: f32[4,2,16], index: 4, kind: output, shape index: {1}]  }
   0x1   :  { %s1426_s17 = smov 0  }
   0x2 LB: > { %s1438_s18 = sadd.s32 4294967295, %s1394_s17   ;;  %s1441_s19 = sadd.s32 1, %s1394_s17   ;;  %s1394_s17 = sphi %s1426_s17, %s1934_s17   ;;  %s1390_s16 = sphi %s1424_s16, %s1933_s16   ;;  %s1386_s15 = sphi %s1422_s15, %s1932_s15  }
   0x3   : > { %s19_s20 = ssub.s32 %s1394_s17, %s1441_s19  ;;  %s22_s21 = sadd.s32 1, %s1390_s16 }
   0x4   : > { %p20_p0 = scmp.eq.s32.totalorder %s19_s20, 0  ;;  %p29_p1 = scmp.ne.s32.totalorder %s1390_s16, %s1386_s15 }
   0x5   : > { %p30_p2 = scmp.eq.s32.totalorder %s1394_s17, 0  ;;  %p101_p3 = scmp.eq.s32.totalorder %s1438_s18, 3 }
   0x6   : > { %s1451_s22 = scalar_select %p20_p0, %s1390_s16, %s22_s21  }
   0x7   : > { %p31_p4 = por %p30_p2, %p29_p1  ;;  %p1453_p5 = por %p101_p3, %p29_p1 }
   0x8   : > { %p1218_p6 = scmp.ge.s32.totalorder %s1394_s17, 4 }
   0xa   : > { %155 = sbr.rel (%p1218_p6) target bundleno = 53 (0x35), region = 24 }
  0x11   : > { %158 = sbr.rel (!%p31_p4) target bundleno = 53 (0x35), region = 28  ;;  %s160_s24 = sand.u32 (%p31_p4), 1, %s1390_s16  }
  0x12   : > { %s1220_s25 = sshll.u32 (%p31_p4), %s1394_s17, 3  ;;  %s1219_s26 = sshll.u32 (%p31_p4), %s160_s24, 8 }
  0x13   : > { %s1463_s29 = scalar_lea.vmem (%p31_p4), %s1926_s0, %s1220_s25  ;;  %s1468_s30 = scalar_lea.vmem (%p31_p4), [#allocation2], %s1219_s26 }
  0x14   : > { %v254_v0 = vld [vmem:[%s1463_s29] sm:$0xff] (%p31_p4) }
  0x15   : > { %v256_v1 = vld [vmem:[%s1463_s29 + $0x20] sm:$0xff] (%p31_p4)  ;;  %255 = vst [vmem:[%s1468_s30] sm:$0xff] (%p31_p4), %v254_v0 }
  0x16   : > { %v258_v2 = vld [vmem:[%s1463_s29 + $0x40] sm:$0xff] (%p31_p4)  ;;  %257 = vst [vmem:[%s1468_s30 + $0x8] sm:$0xff] (%p31_p4), %v256_v1 }
  0x17   : > { %259 = vst [vmem:[%s1468_s30 + $0x10] sm:$0xff] (%p31_p4), %v258_v2  ;;  %v260_v3 = vld [vmem:[%s1463_s29 + $0x60] sm:$0xff] (%p31_p4) }
  0x18   : > { %v262_v4 = vld [vmem:[%s1463_s29 + $0x80] sm:$0xff]  ;;  %261 = vst [vmem:[%s1468_s30 + $0x18] sm:$0xff] %v260_v3 }
  0x19   : > { %v264_v5 = vld [vmem:[%s1463_s29 + $0xa0] sm:$0xff]  ;;  %263 = vst [vmem:[%s1468_s30 + $0x20] sm:$0xff] %v262_v4 }
  0x1a   : > { %265 = vst [vmem:[%s1468_s30 + $0x28] sm:$0xff] %v264_v5  ;;  %v266_v6 = vld [vmem:[%s1463_s29 + $0xc0] sm:$0xff] }
  0x1b   : > { %v268_v7 = vld [vmem:[%s1463_s29 + $0xe0] sm:$0xff]  ;;  %267 = vst [vmem:[%s1468_s30 + $0x30] sm:$0xff] %v266_v6 }
  0x1c   : > { %v270_v8 = vld [vmem:[%s1463_s29 + $0x100] sm:$0xff]  ;;  %269 = vst [vmem:[%s1468_s30 + $0x38] sm:$0xff] %v268_v7 }
  0x1d   : > { %271 = vst [vmem:[%s1468_s30 + $0x40] sm:$0xff] %v270_v8  ;;  %v272_v9 = vld [vmem:[%s1463_s29 + $0x120] sm:$0xff] }
  0x1e   : > { %v274_v10 = vld [vmem:[%s1463_s29 + $0x140] sm:$0xff]  ;;  %273 = vst [vmem:[%s1468_s30 + $0x48] sm:$0xff] %v272_v9 }
  0x1f   : > { %v276_v11 = vld [vmem:[%s1463_s29 + $0x160] sm:$0xff]  ;;  %275 = vst [vmem:[%s1468_s30 + $0x50] sm:$0xff] %v274_v10 }
  0x20   : > { %277 = vst [vmem:[%s1468_s30 + $0x58] sm:$0xff] %v276_v11  ;;  %v278_v12 = vld [vmem:[%s1463_s29 + $0x180] sm:$0xff] }
  0x21   : > { %v280_v13 = vld [vmem:[%s1463_s29 + $0x1a0] sm:$0xff]  ;;  %279 = vst [vmem:[%s1468_s30 + $0x60] sm:$0xff] %v278_v12 }
  0x22   : > { %v282_v14 = vld [vmem:[%s1463_s29 + $0x1c0] sm:$0xff]  ;;  %281 = vst [vmem:[%s1468_s30 + $0x68] sm:$0xff] %v280_v13 }
  0x23   : > { %283 = vst [vmem:[%s1468_s30 + $0x70] sm:$0xff] %v282_v14  ;;  %v284_v15 = vld [vmem:[%s1463_s29 + $0x1e0] sm:$0xff] }
  0x24   : > { %v286_v16 = vld [vmem:[%s1463_s29 + $0x200] sm:$0xff]  ;;  %285 = vst [vmem:[%s1468_s30 + $0x78] sm:$0xff] %v284_v15 }
  0x25   : > { %v288_v17 = vld [vmem:[%s1463_s29 + $0x220] sm:$0xff]  ;;  %287 = vst [vmem:[%s1468_s30 + $0x80] sm:$0xff] %v286_v16 }
  0x26   : > { %289 = vst [vmem:[%s1468_s30 + $0x88] sm:$0xff] %v288_v17  ;;  %v290_v18 = vld [vmem:[%s1463_s29 + $0x240] sm:$0xff] }
  0x27   : > { %v292_v19 = vld [vmem:[%s1463_s29 + $0x260] sm:$0xff]  ;;  %291 = vst [vmem:[%s1468_s30 + $0x90] sm:$0xff] %v290_v18 }
  0x28   : > { %v294_v20 = vld [vmem:[%s1463_s29 + $0x280] sm:$0xff]  ;;  %293 = vst [vmem:[%s1468_s30 + $0x98] sm:$0xff] %v292_v19 }
  0x29   : > { %295 = vst [vmem:[%s1468_s30 + $0xa0] sm:$0xff] %v294_v20  ;;  %v296_v21 = vld [vmem:[%s1463_s29 + $0x2a0] sm:$0xff] }
  0x2a   : > { %v298_v22 = vld [vmem:[%s1463_s29 + $0x2c0] sm:$0xff]  ;;  %297 = vst [vmem:[%s1468_s30 + $0xa8] sm:$0xff] %v296_v21 }
  0x2b   : > { %v300_v23 = vld [vmem:[%s1463_s29 + $0x2e0] sm:$0xff]  ;;  %299 = vst [vmem:[%s1468_s30 + $0xb0] sm:$0xff] %v298_v22 }
  0x2c   : > { %301 = vst [vmem:[%s1468_s30 + $0xb8] sm:$0xff] %v300_v23  ;;  %v302_v24 = vld [vmem:[%s1463_s29 + $0x300] sm:$0xff] }
  0x2d   : > { %v304_v25 = vld [vmem:[%s1463_s29 + $0x320] sm:$0xff]  ;;  %303 = vst [vmem:[%s1468_s30 + $0xc0] sm:$0xff] %v302_v24 }
  0x2e   : > { %v306_v26 = vld [vmem:[%s1463_s29 + $0x340] sm:$0xff]  ;;  %305 = vst [vmem:[%s1468_s30 + $0xc8] sm:$0xff] %v304_v25 }
  0x2f   : > { %307 = vst [vmem:[%s1468_s30 + $0xd0] sm:$0xff] %v306_v26  ;;  %v308_v27 = vld [vmem:[%s1463_s29 + $0x360] sm:$0xff] }
  0x30   : > { %v310_v28 = vld [vmem:[%s1463_s29 + $0x380] sm:$0xff]  ;;  %309 = vst [vmem:[%s1468_s30 + $0xd8] sm:$0xff] %v308_v27 }
  0x31   : > { %v312_v29 = vld [vmem:[%s1463_s29 + $0x3a0] sm:$0xff]  ;;  %311 = vst [vmem:[%s1468_s30 + $0xe0] sm:$0xff] %v310_v28 }
  0x32   : > { %313 = vst [vmem:[%s1468_s30 + $0xe8] sm:$0xff] %v312_v29  ;;  %v314_v30 = vld [vmem:[%s1463_s29 + $0x3c0] sm:$0xff] }
  0x33   : > { %v316_v31 = vld [vmem:[%s1463_s29 + $0x3e0] sm:$0xff]  ;;  %315 = vst [vmem:[%s1468_s30 + $0xf0] sm:$0xff] %v314_v30 }
  0x34   : > { %317 = vst [vmem:[%s1468_s30 + $0xf8] sm:$0xff] %v316_v31 }
  0x35 PF: > { %p1221_p7 = scmp.ge.s32.totalorder %s1394_s17, 1  ;;  %p322_p8 = scmp.lt.s32.totalorder %s1394_s17, 5 }
  0x37   : > { %p323_p9 = pnand %p1221_p7, %p322_p8 }
  0x38   : > { %v393_v32 = vld [vmem:[%s1927_s1] sm:$0xff] (!%p323_p9)  ;;  %s329_s7 = sand.u32 (!%p323_p9), 1, %s1386_s15   ;;  %vm401_vm0 = vcmask (!%p323_p9), 64512   ;;  %vm755_vm1 = vcmask (!%p323_p9), 130048   ;;  %s1396_s14 = smov (!%p323_p9), 16   ;;  %vm926_vm2 = vcmask (!%p323_p9), 1040384  }
  0x39   : > { %326 = sbr.rel (%p323_p9) target bundleno = 441 (0x1b9), region = 66  ;;  %1295 = vmatprep.subr.mxu0 (!%p323_p9), %v393_v32  ;;  %1345 = vmatprep.subr.mxu1 (!%p323_p9), %v393_v32  ;;  %s1222_s8 = sshll.u32 (!%p323_p9), %s329_s7, 8  ;;  %v1608_v1 = vld [vmem:[%s1928_s2] ss:$0 sm:$0xff] (!%p323_p9)  ;;  %vm928_vm3 = vcmask (!%p323_p9), 123904   ;;  %vm1010_vm4 = vcmask (!%p323_p9), 261248  }
  0x3a   : > { %1296 = vmatpush3.msra.mxu0 (!%p323_p9), %v393_v32  ;;  %1346 = vmatpush3.msra.mxu1 (!%p323_p9), %v393_v32  ;;  %s1539_s9 = scalar_lea.vmem (!%p323_p9), [#allocation2], %s1222_s8  ;;  %s1223_s12 = sshll.u32 (!%p323_p9), %s329_s7, 7 }
  0x3b   : > { %v361_v33 = vld [vmem:[%s1539_s9] sm:$0xff] (!%p323_p9)  ;;  %v362_v35 = vld [vmem:[%s1539_s9 + $0x8] sm:$0xff] (!%p323_p9)  ;;  %v363_v37 = vld [vmem:[%s1539_s9 + $0x10] sm:$0xff] (!%p323_p9)  ;;  %s1619_s13 = scalar_lea.vmem (!%p323_p9), [#allocation3], %s1223_s12  ;;  %p357_p10 = scmp.lt.s32.totalorder (!%p323_p9), %s1438_s18, 3 }
  0x3c   : > { %v377_v34 = vld [vmem:[%s1539_s9 + $0x80] sm:$0xff] (!%p323_p9)  ;;  %1297 = vmatprep.mubr.msk.f32.mxu0 (!%p323_p9), %vm401_vm0, %v361_v33  ;;  %v378_v36 = vld [vmem:[%s1539_s9 + $0x88] sm:$0xff] (!%p323_p9)  ;;  %v379_v38 = vld [vmem:[%s1539_s9 + $0x90] sm:$0xff] (!%p323_p9) }
  0x3d   : > { %1321 = vmatprep.mubr.msk.f32.mxu1 (!%p323_p9), %vm401_vm0, %v377_v34  ;;  %1298 = vmatmul.mubr.msk.f32.vlgmr.msra.gmra.mrb[0].mxu0 (!%p323_p9), %vm401_vm0, %v362_v35  ;;  %v364_v39 = vld [vmem:[%s1539_s9 + $0x18] sm:$0xff] (!%p323_p9)  ;;  %v365_v41 = vld [vmem:[%s1539_s9 + $0x20] sm:$0xff] (!%p323_p9)  ;;  %v366_v43 = vld [vmem:[%s1539_s9 + $0x28] sm:$0xff] (!%p323_p9) }
  0x3e   : > { %1322 = vmatmul.mubr.msk.f32.vlgmr.msra.gmra.mrb[0].mxu1 (!%p323_p9), %vm401_vm0, %v378_v36  ;;  %1300 = vmatprep.mubr.msk.f32.mxu0 (!%p323_p9), %vm401_vm0, %v363_v37  ;;  %v380_v40 = vld [vmem:[%s1539_s9 + $0x98] sm:$0xff] (!%p323_p9)  ;;  %v381_v42 = vld [vmem:[%s1539_s9 + $0xa0] sm:$0xff] (!%p323_p9)  ;;  %v382_v44 = vld [vmem:[%s1539_s9 + $0xa8] sm:$0xff] (!%p323_p9) }
  0x3f   : > { %1324 = vmatprep.mubr.msk.f32.mxu1 (!%p323_p9), %vm401_vm0, %v379_v38  ;;  %v367_v45 = vld [vmem:[%s1539_s9 + $0x30] sm:$0xff] (!%p323_p9)  ;;  %v368_v47 = vld [vmem:[%s1539_s9 + $0x38] sm:$0xff] (!%p323_p9)  ;;  %v369_v49 = vld [vmem:[%s1539_s9 + $0x40] sm:$0xff] (!%p323_p9) }
  0x40   : > { %v383_v46 = vld [vmem:[%s1539_s9 + $0xb0] sm:$0xff]  ;;  %v384_v48 = vld [vmem:[%s1539_s9 + $0xb8] sm:$0xff]  ;;  %v385_v50 = vld [vmem:[%s1539_s9 + $0xc0] sm:$0xff]  ;;  %s358_s15 = scalar_select %p357_p10, %s1438_s18, 3 }
  0x41   : > { %1301 = vmatmul.mubr.msk.f32.gmra.mrb[2].mxu0 %vm401_vm0, %v364_v39  ;;  %v370_v51 = vld [vmem:[%s1539_s9 + $0x48] sm:$0xff]  ;;  %v371_v53 = vld [vmem:[%s1539_s9 + $0x50] sm:$0xff]  ;;  %v372_v55 = vld [vmem:[%s1539_s9 + $0x58] sm:$0xff]  ;;  %s1259_s25 = sshll.u32 (%p1453_p5), %s1438_s18, 3 }
  0x42   : > { %1325 = vmatmul.mubr.msk.f32.gmra.mrb[2].mxu1 %vm401_vm0, %v380_v40  ;;  %1303 = vmatprep.mubr.msk.f32.mxu0 %vm401_vm0, %v365_v41  ;;  %v386_v52 = vld [vmem:[%s1539_s9 + $0xc8] sm:$0xff]  ;;  %v387_v54 = vld [vmem:[%s1539_s9 + $0xd0] sm:$0xff]  ;;  %v388_v56 = vld [vmem:[%s1539_s9 + $0xd8] sm:$0xff]  ;;  %s1224_s17 = sshll.u32 %s358_s15, 1  ;;  %s1039_s28 = scalar_lea.vmem (%p1453_p5), %s1929_s3, %s1259_s25 }
  0x43   : > { %1327 = vmatprep.mubr.msk.f32.mxu1 %vm401_vm0, %v381_v42  ;;  %v373_v57 = vld [vmem:[%s1539_s9 + $0x60] sm:$0xff]  ;;  %v374_v59 = vld [vmem:[%s1539_s9 + $0x68] sm:$0xff]  ;;  %v375_v61 = vld [vmem:[%s1539_s9 + $0x70] sm:$0xff]  ;;  %s360_s24 = scalar_lea.vmem %s1930_s4, %s1224_s17 }
  0x44   : > { %v389_v58 = vld [vmem:[%s1539_s9 + $0xe0] sm:$0xff]  ;;  %v390_v60 = vld [vmem:[%s1539_s9 + $0xe8] sm:$0xff]  ;;  %v391_v62 = vld [vmem:[%s1539_s9 + $0xf0] sm:$0xff] }
  0x45   : > { %1304 = vmatmul.mubr.msk.f32.gmra.mrb[4].mxu0 %vm401_vm0, %v366_v43  ;;  %v376_v63 = vld [vmem:[%s1539_s9 + $0x78] sm:$0xff] }
  0x46   : > { %1328 = vmatmul.mubr.msk.f32.gmra.mrb[4].mxu1 %vm401_vm0, %v382_v44  ;;  %1306 = vmatprep.mubr.msk.f32.mxu0 %vm401_vm0, %v367_v45  ;;  %v392_v0 = vld [vmem:[%s1539_s9 + $0xf8] sm:$0xff] }
  0x47   : > { %1330 = vmatprep.mubr.msk.f32.mxu1 %vm401_vm0, %v383_v46 }
  0x49   : > { %1307 = vmatmul.mubr.msk.f32.gmra.mrb[6].mxu0 %vm401_vm0, %v368_v47 }
  0x4a   : > { %1331 = vmatmul.mubr.msk.f32.gmra.mrb[6].mxu1 %vm401_vm0, %v384_v48  ;;  %1309 = vmatprep.mubr.msk.f32.mxu0 %vm401_vm0, %v369_v49 }
  0x4b   : > { %1333 = vmatprep.mubr.msk.f32.mxu1 %vm401_vm0, %v385_v50 }
  0x4d   : > { %1310 = vmatmul.mubr.msk.f32.gmra.mrb[8].mxu0 %vm401_vm0, %v370_v51 }
  0x4e   : > { %1334 = vmatmul.mubr.msk.f32.gmra.mrb[8].mxu1 %vm401_vm0, %v386_v52  ;;  %1312 = vmatprep.mubr.msk.f32.mxu0 %vm401_vm0, %v371_v53 }
  0x4f   : > { %1336 = vmatprep.mubr.msk.f32.mxu1 %vm401_vm0, %v387_v54 }
  0x51   : > { %1313 = vmatmul.mubr.msk.f32.gmra.mrb[10].mxu0 %vm401_vm0, %v372_v55 }
  0x52   : > { %1337 = vmatmul.mubr.msk.f32.gmra.mrb[10].mxu1 %vm401_vm0, %v388_v56  ;;  %1315 = vmatprep.mubr.msk.f32.mxu0 %vm401_vm0, %v373_v57 }
  0x53   : > { %1339 = vmatprep.mubr.msk.f32.mxu1 %vm401_vm0, %v389_v58 }
  0x55   : > { %1316 = vmatmul.mubr.msk.f32.gmra.mrb[12].mxu0 %vm401_vm0, %v374_v59 }
  0x56   : > { %1340 = vmatmul.mubr.msk.f32.gmra.mrb[12].mxu1 %vm401_vm0, %v390_v60  ;;  %1318 = vmatprep.mubr.msk.f32.mxu0 %vm401_vm0, %v375_v61 }
  0x57   : > { %1342 = vmatprep.mubr.msk.f32.mxu1 %vm401_vm0, %v391_v62 }
  0x59   : > { %1319 = vmatmul.mubr.msk.f32.gmra.mrb[14].mxu0 %vm401_vm0, %v376_v63 }
  0x5a   : > { %1343 = vmatmul.mubr.msk.f32.gmra.mrb[14].mxu1 %vm401_vm0, %v392_v0 }
 0x110   : > { %v1299_v3 = vpop.f32.mrb[0].mxu0 }
 0x111   : > { %v1323_v2 = vpop.f32.mrb[0].mxu1  ;;  %v570_v6 = vadd.f32 %v1299_v3, %v1608_v1  ;;  %v564_v7 = vpop.f32.mrb[1].mxu0 }
 0x112   : > { %v650_v4 = vadd.f32 %v1323_v2, %v1608_v1  ;;  %v644_v5 = vpop.f32.mrb[1].mxu1  ;;  %v565_v8 = vadd.f32 %v1608_v1, %v564_v7 }
 0x113   : > { %v645_v10 = vadd.f32 %v1608_v1, %v644_v5  ;;  %v724_v11 = vmax.f32 %v570_v6, 0.0 }
 0x114   : > { %v1615_v9 = vmax.f32 %v650_v4, 0.0  ;;  %v723_v12 = vmax.f32 %v565_v8, 0.0  ;;  %v1302_v13 = vpop.f32.mrb[2].mxu0 }
 0x115   : > { %v1326_v14 = vpop.f32.mrb[2].mxu1  ;;  %v757_v15 = vsel %vm755_vm1, %v724_v11, 0.0  ;;  %v826_v16 = vmul.f32 %v724_v11, %v724_v11  ;;  %931 = vst.msk [vmem:[%s1619_s13 + $0x8] sm:$0xff] %vm755_vm1, %v724_v11  ;;  %v574_v17 = vpop.f32.mrb[3].mxu0  ;;  %v1628_v21 = vmax.f32 %v645_v10, 0.0  ;;  %v580_v24 = vadd.f32 %v1302_v13, %v1608_v1 }
 0x116   : > { %964 = vrot.lane.b32.xlu0 %v1615_v9, %s1396_s14  ;;  %v654_v18 = vpop.f32.mrb[3].mxu1  ;;  %v756_v19 = vsel %vm755_vm1, %v723_v12, 0.0  ;;  %v825_v20 = vmul.f32 %v723_v12, %v723_v12  ;;  %930 = vst.msk [vmem:[%s1619_s13] sm:$0xff] %vm755_vm1, %v723_v12  ;;  %v660_v26 = vadd.f32 %v1326_v14, %v1608_v1  ;;  %v575_v27 = vadd.f32 %v1608_v1, %v574_v17 }
 0x117   : > { %v858_v22 = vsel %vm755_vm1, %v826_v16, 0.0  ;;  %v758_v23 = vadd.f32 %v757_v15, %v756_v19  ;;  %v726_v31 = vmax.f32 %v580_v24, 0.0  ;;  %v655_v37 = vadd.f32 %v1608_v1, %v654_v18 }
 0x118   : > { %v857_v25 = vsel %vm755_vm1, %v825_v20, 0.0  ;;  %v1305_v28 = vpop.f32.mrb[4].mxu0  ;;  %v1638_v35 = vmax.f32 %v660_v26, 0.0  ;;  %v725_v36 = vmax.f32 %v575_v27, 0.0 }
 0x119   : > { %v1329_v29 = vpop.f32.mrb[4].mxu1  ;;  %v859_v30 = vadd.f32 %v858_v22, %v857_v25  ;;  %v590_v32 = vadd.f32 %v1305_v28, %v1608_v1  ;;  %v584_v33 = vpop.f32.mrb[5].mxu0  ;;  %v828_v38 = vmul.f32 %v726_v31, %v726_v31  ;;  %933 = vst.msk [vmem:[%s1619_s13 + $0x18] sm:$0xff] %vm755_vm1, %v726_v31  ;;  %v761_v41 = vsel %vm755_vm1, %v726_v31, 0.0 }
 0x11a   : > { %962 = vrot.lane.b32.xlu0 %v1628_v21, %s1396_s14  ;;  %v664_v34 = vpop.f32.mrb[5].mxu1  ;;  %v585_v40 = vadd.f32 %v1608_v1, %v584_v33  ;;  %v759_v42 = vsel %vm755_vm1, %v725_v36, 0.0  ;;  %v827_v43 = vmul.f32 %v725_v36, %v725_v36  ;;  %932 = vst.msk [vmem:[%s1619_s13 + $0x10] sm:$0xff] %vm755_vm1, %v725_v36  ;;  %968 = vrot.lane.b32.xlu1 %v1638_v35, %s1396_s14  ;;  %v1655_v52 = vmax.f32 %v655_v37, 0.0 }
 0x11b   : > { %v728_v39 = vmax.f32 %v590_v32, 0.0  ;;  %v670_v44 = vadd.f32 %v1329_v29, %v1608_v1  ;;  %v760_v47 = vadd.f32 %v759_v42, %v758_v23  ;;  %v862_v50 = vsel %vm755_vm1, %v828_v38, 0.0 }
 0x11c   : > { %v1308_v45 = vpop.f32.mrb[6].mxu0  ;;  %v860_v51 = vsel %vm755_vm1, %v827_v43, 0.0  ;;  %v727_v55 = vmax.f32 %v585_v40, 0.0  ;;  %v665_v58 = vadd.f32 %v1608_v1, %v664_v34 }
 0x11d   : > { %v1332_v46 = vpop.f32.mrb[6].mxu1  ;;  %935 = vst.msk [vmem:[%s1619_s13 + $0x28] sm:$0xff] %vm755_vm1, %v728_v39  ;;  %v594_v48 = vpop.f32.mrb[7].mxu0  ;;  %v830_v53 = vmul.f32 %v728_v39, %v728_v39  ;;  %v861_v54 = vadd.f32 %v860_v51, %v859_v30  ;;  %v762_v56 = vadd.f32 %v761_v41, %v760_v47  ;;  %v1657_v57 = vmax.f32 %v670_v44, 0.0 }
 0x11e   : > { %v674_v49 = vpop.f32.mrb[7].mxu1  ;;  %v600_v59 = vadd.f32 %v1308_v45, %v1608_v1  ;;  %966 = vrot.lane.b32.xlu1 %v1655_v52, %s1396_s14  ;;  %v763_v62 = vsel %vm755_vm1, %v727_v55, 0.0  ;;  %v829_v63 = vmul.f32 %v727_v55, %v727_v55  ;;  %934 = vst.msk [vmem:[%s1619_s13 + $0x20] sm:$0xff] %vm755_vm1, %v727_v55  ;;  %v595_v2 = vadd.f32 %v1608_v1, %v594_v48 }
 0x11f   : > { %v863_v0 = vadd.f32 %v862_v50, %v861_v54  ;;  %v765_v5 = vsel %vm755_vm1, %v728_v39, 0.0  ;;  %v866_v6 = vsel %vm755_vm1, %v830_v53, 0.0  ;;  %v764_v7 = vadd.f32 %v763_v62, %v762_v56 }
 0x120   : > { %v1311_v60 = vpop.f32.mrb[8].mxu0  ;;  %v1669_v8 = vmax.f32 %v665_v58, 0.0  ;;  %v864_v10 = vsel %vm755_vm1, %v829_v63, 0.0  ;;  %v730_v11 = vmax.f32 %v600_v59, 0.0  ;;  %v729_v12 = vmax.f32 %v595_v2, 0.0 }
 0x121   : > { %v1335_v61 = vpop.f32.mrb[8].mxu1  ;;  %v604_v3 = vpop.f32.mrb[9].mxu0  ;;  %v680_v13 = vadd.f32 %v1332_v46, %v1608_v1  ;;  %v865_v14 = vadd.f32 %v864_v10, %v863_v0  ;;  %v766_v18 = vadd.f32 %v765_v5, %v764_v7  ;;  %v675_v28 = vadd.f32 %v1608_v1, %v674_v49 }
 0x122   : > { %v684_v4 = vpop.f32.mrb[9].mxu1  ;;  %970 = vrot.lane.b32.xlu0 %v1669_v8, %s1396_s14  ;;  %972 = vrot.lane.b32.xlu1 %v1657_v57, %s1396_s14  ;;  %v832_v17 = vmul.f32 %v730_v11, %v730_v11  ;;  %937 = vst.msk [vmem:[%s1619_s13 + $0x38] sm:$0xff] %vm755_vm1, %v730_v11  ;;  %v767_v19 = vsel %vm755_vm1, %v729_v12, 0.0  ;;  %936 = vst.msk [vmem:[%s1619_s13 + $0x30] sm:$0xff] %vm755_vm1, %v729_v12  ;;  %v769_v23 = vsel %vm755_vm1, %v730_v11, 0.0 }
 0x123   : > { %v831_v24 = vmul.f32 %v729_v12, %v729_v12  ;;  %v867_v25 = vadd.f32 %v866_v6, %v865_v14  ;;  %v1683_v26 = vmax.f32 %v680_v13, 0.0  ;;  %v768_v27 = vadd.f32 %v767_v19, %v766_v18 }
 0x124   : > { %v1314_v15 = vpop.f32.mrb[10].mxu0  ;;  %v610_v29 = vadd.f32 %v1311_v60, %v1608_v1  ;;  %v870_v30 = vsel %vm755_vm1, %v832_v17, 0.0  ;;  %v605_v32 = vadd.f32 %v1608_v1, %v604_v3  ;;  %v1694_v37 = vmax.f32 %v675_v28, 0.0 }
 0x125   : > { %v1338_v16 = vpop.f32.mrb[10].mxu1  ;;  %v614_v20 = vpop.f32.mrb[11].mxu0  ;;  %v868_v31 = vsel %vm755_vm1, %v831_v24, 0.0  ;;  %v770_v39 = vadd.f32 %v769_v23, %v768_v27  ;;  %v690_v43 = vadd.f32 %v1335_v61, %v1608_v1  ;;  %v685_v44 = vadd.f32 %v1608_v1, %v684_v4 }
 0x126   : > { %v694_v22 = vpop.f32.mrb[11].mxu1  ;;  %976 = vrot.lane.b32.xlu1 %v1683_v26, %s1396_s14  ;;  %v869_v36 = vadd.f32 %v868_v31, %v867_v25  ;;  %v732_v38 = vmax.f32 %v610_v29, 0.0  ;;  %v731_v42 = vmax.f32 %v605_v32, 0.0  ;;  %974 = vrot.lane.b32.xlu0 %v1694_v37, %s1396_s14  ;;  %v620_v63 = vadd.f32 %v1314_v15, %v1608_v1 }
 0x127   : > { %v748_v49 = vmax.f32 %v690_v43, 0.0  ;;  %v1711_v56 = vmax.f32 %v685_v44, 0.0  ;;  %v615_v2 = vadd.f32 %v1608_v1, %v614_v20  ;;  %v700_v6 = vadd.f32 %v1338_v16, %v1608_v1 }
 0x128   : > { %v1317_v33 = vpop.f32.mrb[12].mxu0  ;;  %v834_v45 = vmul.f32 %v732_v38, %v732_v38  ;;  %939 = vst.msk [vmem:[%s1619_s13 + $0x48] sm:$0xff] %vm755_vm1, %v732_v38  ;;  %v771_v46 = vsel %vm755_vm1, %v731_v42, 0.0  ;;  %v833_v47 = vmul.f32 %v731_v42, %v731_v42  ;;  %v871_v48 = vadd.f32 %v870_v30, %v869_v36  ;;  %938 = vst.msk [vmem:[%s1619_s13 + $0x40] sm:$0xff] %vm755_vm1, %v731_v42 }
 0x129   : > { %v1692_v34 = vpop.f32.mrb[12].mxu1  ;;  %v624_v40 = vpop.f32.mrb[13].mxu0  ;;  %v773_v53 = vsel %vm755_vm1, %v732_v38, 0.0  ;;  %v772_v55 = vadd.f32 %v771_v46, %v770_v39  ;;  %v1717_v61 = vsel %vm755_vm1, %v748_v49, 0.0  ;;  %v850_v62 = vmul.f32 %v748_v49, %v748_v49 }
 0x12a   : > { %v1696_v41 = vpop.f32.mrb[13].mxu1  ;;  %v874_v54 = vsel %vm755_vm1, %v834_v45, 0.0  ;;  %v872_v60 = vsel %vm755_vm1, %v833_v47, 0.0  ;;  %980 = vrot.lane.b32.xlu1 %v748_v49, %s1396_s14  ;;  %978 = vrot.lane.b32.xlu0 %v1711_v56, %s1396_s14  ;;  %v734_v4 = vmax.f32 %v620_v63, 0.0  ;;  %v733_v7 = vmax.f32 %v615_v2, 0.0 }
 0x12b   : > { %v873_v0 = vadd.f32 %v872_v60, %v871_v48  ;;  %v1725_v3 = vsel %vm755_vm1, %v850_v62, 0.0  ;;  %v774_v5 = vadd.f32 %v773_v53, %v772_v55  ;;  %v695_v11 = vadd.f32 %v1608_v1, %v694_v22 }
 0x12c   : > { %v1320_v50 = vpop.f32.mrb[14].mxu0  ;;  %v777_v12 = vsel %vm755_vm1, %v734_v4, 0.0  ;;  %v836_v13 = vmul.f32 %v734_v4, %v734_v4  ;;  %941 = vst.msk [vmem:[%s1619_s13 + $0x58] sm:$0xff] %vm755_vm1, %v734_v4  ;;  %v750_v14 = vmax.f32 %v700_v6, 0.0  ;;  %v630_v15 = vadd.f32 %v1317_v33, %v1608_v1  ;;  %940 = vst.msk [vmem:[%s1619_s13 + $0x50] sm:$0xff] %vm755_vm1, %v733_v7 }
 0x12d   : > { %v1707_v51 = vpop.f32.mrb[14].mxu1  ;;  %v634_v58 = vpop.f32.mrb[15].mxu0  ;;  %v875_v10 = vadd.f32 %v874_v54, %v873_v0  ;;  %v775_v17 = vsel %vm755_vm1, %v733_v7, 0.0  ;;  %v835_v18 = vmul.f32 %v733_v7, %v733_v7  ;;  %v749_v19 = vmax.f32 %v695_v11, 0.0 }
 0x12e   : > { %v1713_v59 = vpop.f32.mrb[15].mxu1  ;;  %v625_v16 = vadd.f32 %v1608_v1, %v624_v40  ;;  %v878_v20 = vsel %vm755_vm1, %v836_v13, 0.0  ;;  %v776_v23 = vadd.f32 %v775_v17, %v774_v5  ;;  %v1739_v22 = vsel %vm755_vm1, %v750_v14, 0.0  ;;  %984 = vrot.lane.b32.xlu1 %v750_v14, %s1396_s14 }
 0x12f   : > { %v852_v24 = vmul.f32 %v750_v14, %v750_v14  ;;  %v876_v25 = vsel %vm755_vm1, %v835_v18, 0.0  ;;  %v1744_v27 = vsel %vm755_vm1, %v749_v19, 0.0  ;;  %v851_v28 = vmul.f32 %v749_v19, %v749_v19  ;;  %982 = vrot.lane.b32.xlu0 %v749_v19, %s1396_s14 }
 0x130   : > { %v736_v29 = vmax.f32 %v630_v15, 0.0  ;;  %v877_v30 = vadd.f32 %v876_v25, %v875_v10  ;;  %v735_v32 = vmax.f32 %v625_v16, 0.0  ;;  %v778_v33 = vadd.f32 %v777_v12, %v776_v23 }
 0x131   : > { %v1748_v31 = vsel %vm755_vm1, %v852_v24, 0.0  ;;  %v1751_v36 = vsel %vm755_vm1, %v851_v28, 0.0  ;;  %v710_v40 = vadd.f32 %v1692_v34, %v1608_v1  ;;  %v705_v45 = vadd.f32 %v1608_v1, %v1696_v41 }
 0x132   : > { %v781_v38 = vsel %vm755_vm1, %v736_v29, 0.0  ;;  %v838_v39 = vmul.f32 %v736_v29, %v736_v29  ;;  %943 = vst.msk [vmem:[%s1619_s13 + $0x68] sm:$0xff] %vm755_vm1, %v736_v29  ;;  %v779_v42 = vsel %vm755_vm1, %v735_v32, 0.0  ;;  %v837_v43 = vmul.f32 %v735_v32, %v735_v32  ;;  %942 = vst.msk [vmem:[%s1619_s13 + $0x60] sm:$0xff] %vm755_vm1, %v735_v32 }
 0x133   : > { %v879_v44 = vadd.f32 %v878_v20, %v877_v30  ;;  %v780_v47 = vadd.f32 %v779_v42, %v778_v33  ;;  %v752_v48 = vmax.f32 %v710_v40, 0.0  ;;  %v640_v49 = vadd.f32 %v1320_v50, %v1608_v1 }
 0x134   : > { %v882_v46 = vsel %vm755_vm1, %v838_v39, 0.0  ;;  %v880_v53 = vsel %vm755_vm1, %v837_v43, 0.0  ;;  %v751_v54 = vmax.f32 %v705_v45, 0.0  ;;  %v635_v34 = vadd.f32 %v1608_v1, %v634_v58 }
 0x135   : > { %v720_v55 = vadd.f32 %v1707_v51, %v1608_v1  ;;  %v881_v60 = vadd.f32 %v880_v53, %v879_v44  ;;  %v1770_v62 = vsel %vm755_vm1, %v752_v48, 0.0  ;;  %v854_v41 = vmul.f32 %v752_v48, %v752_v48  ;;  %988 = vrot.lane.b32.xlu1 %v752_v48, %s1396_s14 }
 0x136   : > { %v738_v63 = vmax.f32 %v640_v49, 0.0  ;;  %v1774_v50 = vsel %vm755_vm1, %v751_v54, 0.0  ;;  %v853_v0 = vmul.f32 %v751_v54, %v751_v54  ;;  %v737_v2 = vmax.f32 %v635_v34, 0.0  ;;  %986 = vrot.lane.b32.xlu0 %v751_v54, %s1396_s14 }
 0x137   : > { %v782_v4 = vadd.f32 %v781_v38, %v780_v47  ;;  %v1778_v58 = vsel %vm755_vm1, %v854_v41, 0.0  ;;  %v883_v6 = vadd.f32 %v882_v46, %v881_v60  ;;  %v754_v12 = vmax.f32 %v720_v55, 0.0 }
 0x138   : > { %v785_v51 = vsel %vm755_vm1, %v738_v63, 0.0  ;;  %v840_v5 = vmul.f32 %v738_v63, %v738_v63  ;;  %945 = vst.msk [vmem:[%s1619_s13 + $0x78] sm:$0xff] %vm755_vm1, %v738_v63  ;;  %v1784_v7 = vsel %vm755_vm1, %v853_v0, 0.0  ;;  %v783_v10 = vsel %vm755_vm1, %v737_v2, 0.0  ;;  %944 = vst.msk [vmem:[%s1619_s13 + $0x70] sm:$0xff] %vm755_vm1, %v737_v2 }
 0x139   : > { %v839_v11 = vmul.f32 %v737_v2, %v737_v2  ;;  %v841_v13 = vmul.f32 %v1628_v21, %v1628_v21  ;;  %v784_v14 = vadd.f32 %v783_v10, %v782_v4  ;;  %v715_v15 = vadd.f32 %v1608_v1, %v1713_v59  ;;  %992 = vrot.lane.b32.xlu1 %v754_v12, %s1396_s14 }
 0x13a   : > { %v886_v17 = vsel %vm755_vm1, %v840_v5, 0.0  ;;  %v1796_v19 = vsel %vm755_vm1, %v754_v12, 0.0  ;;  %v856_v16 = vmul.f32 %v754_v12, %v754_v12  ;;  %v842_v25 = vmul.f32 %v1615_v9, %v1615_v9 }
 0x13b   : > { %v884_v18 = vsel %vm755_vm1, %v839_v11, 0.0  ;;  %v786_v20 = vadd.f32 %v785_v51, %v784_v14  ;;  %v753_v24 = vmax.f32 %v715_v15, 0.0  ;;  %v787_v28 = vsel %vm755_vm1, %v1628_v21, 0.0 }
 0x13c   : > { %v885_v23 = vadd.f32 %v884_v18, %v883_v6  ;;  %v918_v1 = vsel %vm755_vm1, %v856_v16, 0.0  ;;  %v789_v33 = vsel %vm755_vm1, %v1615_v9, 0.0  ;;  %v888_v38 = vsel %vm755_vm1, %v841_v13, 0.0 }
 0x13d   : > { %v788_v59 = vadd.f32 %v787_v28, %v786_v20  ;;  %v815_v30 = vsel %vm755_vm1, %v753_v24, 0.0  ;;  %v855_v32 = vmul.f32 %v753_v24, %v753_v24  ;;  %990 = vrot.lane.b32.xlu0 %v753_v24, %s1396_s14  ;;  %v843_v39 = vmul.f32 %v1655_v52, %v1655_v52 }
 0x13e   : > { %v887_v29 = vadd.f32 %v886_v17, %v885_v23  ;;  %v890_v43 = vsel %vm755_vm1, %v842_v25, 0.0  ;;  %v844_v44 = vmul.f32 %v1638_v35, %v1638_v35  ;;  %v791_v45 = vsel %vm755_vm1, %v1655_v52, 0.0 }
 0x13f   : > { %v790_v40 = vadd.f32 %v789_v33, %v788_v59  ;;  %v916_v21 = vsel %vm755_vm1, %v855_v32, 0.0  ;;  %v793_v9 = vsel %vm755_vm1, %v1638_v35, 0.0  ;;  %v892_v48 = vsel %vm755_vm1, %v843_v39, 0.0 }
 0x140   : > { %v889_v42 = vadd.f32 %v888_v38, %v887_v29  ;;  %v845_v49 = vmul.f32 %v1669_v8, %v1669_v8  ;;  %v894_v34 = vsel %vm755_vm1, %v844_v44, 0.0  ;;  %v846_v55 = vmul.f32 %v1657_v57, %v1657_v57 }
 0x141   : > { %v792_v46 = vadd.f32 %v791_v45, %v790_v40  ;;  %v795_v52 = vsel %vm755_vm1, %v1669_v8, 0.0  ;;  %v797_v35 = vsel %vm755_vm1, %v1657_v57, 0.0  ;;  %v847_v0 = vmul.f32 %v1694_v37, %v1694_v37 }
 0x142   : > { %v891_v47 = vadd.f32 %v890_v43, %v889_v42  ;;  %v896_v63 = vsel %vm755_vm1, %v845_v49, 0.0  ;;  %v898_v51 = vsel %vm755_vm1, %v846_v55, 0.0  ;;  %v848_v5 = vmul.f32 %v1683_v26, %v1683_v26 }
 0x143   : > { %v794_v53 = vadd.f32 %v793_v9, %v792_v46  ;;  %v799_v8 = vsel %vm755_vm1, %v1694_v37, 0.0  ;;  %v801_v57 = vsel %vm755_vm1, %v1683_v26, 0.0  ;;  %v900_v11 = vsel %vm755_vm1, %v847_v0, 0.0 }
 0x144   : > { %v893_v54 = vadd.f32 %v892_v48, %v891_v47  ;;  %v849_v12 = vmul.f32 %v1711_v56, %v1711_v56  ;;  %v902_v15 = vsel %vm755_vm1, %v848_v5, 0.0  ;;  %v803_v17 = vsel %vm755_vm1, %v1711_v56, 0.0 }
 0x145   : > { %v796_v60 = vadd.f32 %v795_v52, %v794_v53 }
 0x146   : > { %v895_v41 = vadd.f32 %v894_v34, %v893_v54  ;;  %v904_v37 = vsel %vm755_vm1, %v849_v12, 0.0 }
 0x147   : > { %v798_v2 = vadd.f32 %v797_v35, %v796_v60 }
 0x148   : > { %v897_v4 = vadd.f32 %v896_v63, %v895_v41 }
 0x149   : > { %v800_v10 = vadd.f32 %v799_v8, %v798_v2 }
 0x14a   : > { %v899_v6 = vadd.f32 %v898_v51, %v897_v4 }
 0x14b   : > { %v802_v13 = vadd.f32 %v801_v57, %v800_v10 }
 0x14c   : > { %v901_v14 = vadd.f32 %v900_v11, %v899_v6 }
 0x14d   : > { %v804_v18 = vadd.f32 %v803_v17, %v802_v13 }
 0x14e   : > { %v903_v16 = vadd.f32 %v902_v15, %v901_v14 }
 0x14f   : > { %v806_v20 = vadd.f32 %v1717_v61, %v804_v18 }
 0x150   : > { %v905_v26 = vadd.f32 %v904_v37, %v903_v16 }
 0x151   : > { %v808_v23 = vadd.f32 %v1744_v27, %v806_v20 }
 0x152   : > { %v907_v24 = vadd.f32 %v1725_v3, %v905_v26 }
 0x153   : > { %v810_v25 = vadd.f32 %v1739_v22, %v808_v23 }
 0x154   : > { %v909_v28 = vadd.f32 %v1751_v36, %v907_v24 }
 0x155   : > { %v812_v59 = vadd.f32 %v1774_v50, %v810_v25 }
 0x156   : > { %v911_v56 = vadd.f32 %v1748_v31, %v909_v28 }
 0x157   : > { %v814_v29 = vadd.f32 %v1770_v62, %v812_v59 }
 0x158   : > { %v913_v32 = vadd.f32 %v1784_v7, %v911_v56 }
 0x159   : > { %v816_v61 = vadd.f32 %v815_v30, %v814_v29 }
 0x15a   : > { %v915_v33 = vadd.f32 %v1778_v58, %v913_v32 }
 0x15b   : > { %v818_v27 = vadd.f32 %v1796_v19, %v816_v61 }
 0x15c   : > { %v917_v38 = vadd.f32 %v916_v21, %v915_v33 }
 0x15d   : > { %v819_v3 = vrot.slane %v818_v27, 4 }
 0x15e   : > { %v919_v39 = vadd.f32 %v918_v1, %v917_v38 }
 0x15f   : > { %v820_v22 = vadd.f32 %v819_v3, %v818_v27 }
 0x160   : > { %v920_v36 = vrot.slane %v919_v39, 4 }
 0x161   : > { %v821_v40 = vrot.slane %v820_v22, 2 }
 0x162   : > { %v921_v42 = vadd.f32 %v920_v36, %v919_v39 }
 0x163   : > { %v822_v31 = vadd.f32 %v821_v40, %v820_v22 }
 0x164   : > { %v922_v50 = vrot.slane %v921_v42, 2 }
 0x165   : > { %v823_v62 = vrot.slane %v822_v31, 1 }
 0x166   : > { %v923_v7 = vadd.f32 %v922_v50, %v921_v42 }
 0x167   : > { %v824_v19 = vadd.f32 %v823_v62, %v822_v31 }
 0x168   : > { %v924_v58 = vrot.slane %v923_v7, 1 }
 0x16a   : > { %v925_v1 = vadd.f32 %v924_v58, %v923_v7 }
 0x16c   : > { %v927_v30 = vsel %vm926_vm2, %v824_v19, %v925_v1 }
 0x16d   : > { %929 = vst.msk [vmem:[%s360_s24] sm:$0x3] %vm928_vm3, %v927_v30 }
 0x188   : > { %v965_v21 = vpop.permute.xlu0 %964 }
 0x189   : > { %1012 = vst.msk [vmem:[%s1619_s13 + $0x8] sm:$0xff] %vm1010_vm4, %v965_v21 }
 0x18c   : > { %v963_v43 = vpop.permute.xlu0 %962  ;;  %v969_v44 = vpop.permute.xlu1 %968 }
 0x18d   : > { %1011 = vst.msk [vmem:[%s1619_s13] sm:$0xff] %vm1010_vm4, %v963_v43  ;;  %1014 = vst.msk [vmem:[%s1619_s13 + $0x18] sm:$0xff] %vm1010_vm4, %v969_v44 }
 0x190   : > { %v967_v45 = vpop.permute.xlu1 %966  ;;  %v1099_v63 = vld [vmem:[%s1619_s13 + $0x8] sm:$0xff] (%p1453_p5) }
 0x191   : > { %1013 = vst.msk [vmem:[%s1619_s13 + $0x10] sm:$0xff] %vm1010_vm4, %v967_v45  ;;  %1100 = vst [vmem:[%s1039_s28 + $0x20] sm:$0xff] (%p1453_p5), %v1099_v63 }
 0x194   : > { %v971_v46 = vpop.permute.xlu0 %970  ;;  %v973_v47 = vpop.permute.xlu1 %972  ;;  %v1097_v35 = vld [vmem:[%s1619_s13] sm:$0xff] (%p1453_p5)  ;;  %v1103_v2 = vld [vmem:[%s1619_s13 + $0x18] sm:$0xff] (%p1453_p5) }
 0x195   : > { %1015 = vst.msk [vmem:[%s1619_s13 + $0x20] sm:$0xff] %vm1010_vm4, %v971_v46  ;;  %1016 = vst.msk [vmem:[%s1619_s13 + $0x28] sm:$0xff] %vm1010_vm4, %v973_v47 }
 0x196   : > { %1098 = vst [vmem:[%s1039_s28] sm:$0xff] (%p1453_p5), %v1097_v35  ;;  %1104 = vst [vmem:[%s1039_s28 + $0x60] sm:$0xff] (%p1453_p5), %v1103_v2 }
 0x198   : > { %v977_v9 = vpop.permute.xlu1 %976  ;;  %v975_v48 = vpop.permute.xlu0 %974  ;;  %v1101_v0 = vld [vmem:[%s1619_s13 + $0x10] sm:$0xff] (%p1453_p5) }
 0x199   : > { %1018 = vst.msk [vmem:[%s1619_s13 + $0x38] sm:$0xff] %vm1010_vm4, %v977_v9  ;;  %1017 = vst.msk [vmem:[%s1619_s13 + $0x30] sm:$0xff] %vm1010_vm4, %v975_v48 }
 0x19a   : > { %1102 = vst [vmem:[%s1039_s28 + $0x40] sm:$0xff] (%p1453_p5), %v1101_v0 }
 0x19c   : > { %v981_v49 = vpop.permute.xlu1 %980  ;;  %v979_v53 = vpop.permute.xlu0 %978  ;;  %v1105_v4 = vld [vmem:[%s1619_s13 + $0x20] sm:$0xff] (%p1453_p5)  ;;  %v1107_v51 = vld [vmem:[%s1619_s13 + $0x28] sm:$0xff] (%p1453_p5) }
 0x19d   : > { %1020 = vst.msk [vmem:[%s1619_s13 + $0x48] sm:$0xff] %vm1010_vm4, %v981_v49  ;;  %1019 = vst.msk [vmem:[%s1619_s13 + $0x40] sm:$0xff] %vm1010_vm4, %v979_v53 }
 0x19e   : > { %1106 = vst [vmem:[%s1039_s28 + $0x80] sm:$0xff] (%p1453_p5), %v1105_v4  ;;  %1108 = vst [vmem:[%s1039_s28 + $0xa0] sm:$0xff] (%p1453_p5), %v1107_v51 }
 0x1a0   : > { %v985_v54 = vpop.permute.xlu1 %984  ;;  %v1109_v5 = vld [vmem:[%s1619_s13 + $0x30] sm:$0xff] (%p1453_p5)  ;;  %v1111_v8 = vld [vmem:[%s1619_s13 + $0x38] sm:$0xff] (%p1453_p5) }
 0x1a1   : > { %v983_v34 = vpop.permute.xlu0 %982  ;;  %1022 = vst.msk [vmem:[%s1619_s13 + $0x58] sm:$0xff] %vm1010_vm4, %v985_v54  ;;  %1110 = vst [vmem:[%s1039_s28 + $0xc0] sm:$0xff] (%p1453_p5), %v1109_v5 }
 0x1a2   : > { %1021 = vst.msk [vmem:[%s1619_s13 + $0x50] sm:$0xff] %vm1010_vm4, %v983_v34  ;;  %1112 = vst [vmem:[%s1039_s28 + $0xe0] sm:$0xff] (%p1453_p5), %v1111_v8 }
 0x1a4   : > { %v1113_v6 = vld [vmem:[%s1619_s13 + $0x40] sm:$0xff] (%p1453_p5)  ;;  %v1115_v10 = vld [vmem:[%s1619_s13 + $0x48] sm:$0xff] (%p1453_p5) }
 0x1a5   : > { %1114 = vst [vmem:[%s1039_s28 + $0x100] sm:$0xff] (%p1453_p5), %v1113_v6  ;;  %1116 = vst [vmem:[%s1039_s28 + $0x120] sm:$0xff] (%p1453_p5), %v1115_v10 }
 0x1a7   : > { %v989_v55 = vpop.permute.xlu1 %988 }
 0x1a8   : > { %v987_v52 = vpop.permute.xlu0 %986  ;;  %1024 = vst.msk [vmem:[%s1619_s13 + $0x68] sm:$0xff] %vm1010_vm4, %v989_v55  ;;  %v1119_v11 = vld [vmem:[%s1619_s13 + $0x58] sm:$0xff] (%p1453_p5) }
 0x1a9   : > { %1023 = vst.msk [vmem:[%s1619_s13 + $0x60] sm:$0xff] %vm1010_vm4, %v987_v52  ;;  %v1117_v57 = vld [vmem:[%s1619_s13 + $0x50] sm:$0xff] (%p1453_p5)  ;;  %1120 = vst [vmem:[%s1039_s28 + $0x160] sm:$0xff] (%p1453_p5), %v1119_v11 }
 0x1aa   : > { %1037 = sbr.rel (!%p1453_p5) target bundleno = 441 (0x1b9), region = 74  ;;  %1118 = vst [vmem:[%s1039_s28 + $0x140] sm:$0xff] (%p1453_p5), %v1117_v57 }
 0x1ab   : > { %v993_v60 = vpop.permute.xlu1 %992 }
 0x1ac   : > { %1026 = vst.msk [vmem:[%s1619_s13 + $0x78] sm:$0xff] %vm1010_vm4, %v993_v60 }
 0x1af   : > { %v991_v41 = vpop.permute.xlu0 %990  ;;  %v1123_v13 = vld [vmem:[%s1619_s13 + $0x68] sm:$0xff] (%p1453_p5) }
 0x1b0   : > { %1025 = vst.msk [vmem:[%s1619_s13 + $0x70] sm:$0xff] %vm1010_vm4, %v991_v41  ;;  %v1121_v12 = vld [vmem:[%s1619_s13 + $0x60] sm:$0xff] (%p1453_p5)  ;;  %1124 = vst [vmem:[%s1039_s28 + $0x1a0] sm:$0xff] (%p1453_p5), %v1123_v13 }
 0x1b1   : > { %1122 = vst [vmem:[%s1039_s28 + $0x180] sm:$0xff] %v1121_v12 }
 0x1b3   : > { %v1127_v15 = vld [vmem:[%s1619_s13 + $0x78] sm:$0xff] }
 0x1b4   : > { %1128 = vst [vmem:[%s1039_s28 + $0x1e0] sm:$0xff] %v1127_v15 }
 0x1b7   : > { %v1125_v14 = vld [vmem:[%s1619_s13 + $0x70] sm:$0xff] }
 0x1b8   : > { %1126 = vst [vmem:[%s1039_s28 + $0x1c0] sm:$0xff] %v1125_v14 }
 0x1b9 PF: > { %p12_p11 = scmp.ge.s32.totalorder %s1441_s19, 6   ;;  %s1932_s15 = smov %s1390_s16 }
 0x1ba   : > { %s1933_s16 = smov %s1451_s22  ;;  %s1934_s17 = smov %s1441_s19 }
 0x1bb   :  { %14 = sbr.rel (!%p12_p11) target bundleno = 2 (0x2), region = 155 }

// kernel: fire_deconv_forward.5
= control target key start
LH: loop header
LB: loop body
LE: loop exit
PB: predicated region body
PF: predicated region fallthrough
CT: control target
= control target key end

     0   :  { %s1844_s24 = smov 0   ;;  %s1846_s25 = smov 0   ;;  %s2526_s0 = inlined_call_operand.vmem [shape: f32[16,32,8], index: 0, kind: input, shape index: {}]   ;;  %s2527_s1 = inlined_call_operand.vmem [shape: f32[8,16], index: 1, kind: input, shape index: {}]   ;;  %s2528_s2 = inlined_call_operand.vmem [shape: f32[1,16], index: 2, kind: input, shape index: {}]   ;;  %s2529_s3 = inlined_call_operand.vmem [shape: f32[8,16], index: 3, kind: input, shape index: {}]   ;;  %s2530_s4 = inlined_call_operand.vmem [shape: f32[1,16], index: 4, kind: input, shape index: {}]   ;;  %s2531_s5 = inlined_call_operand.vmem [shape: f32[1,8], index: 5, kind: input, shape index: {}]   ;;  %s2532_s6 = inlined_call_operand.vmem [shape: f32[2,16,32,8], index: 6, kind: output, shape index: {0}]   ;;  %s2533_s7 = inlined_call_operand.vmem [shape: f32[4,2,8], index: 7, kind: output, shape index: {1}]  }
   0x1   :  { %s1848_s26 = smov 0  }
   0x2 LB: > { %s1860_s27 = sadd.s32 4294967295, %s1799_s26   ;;  %s1863_s28 = sadd.s32 1, %s1799_s26   ;;  %s1799_s26 = sphi %s1848_s26, %s2537_s26   ;;  %s1795_s25 = sphi %s1846_s25, %s2536_s25   ;;  %s1791_s24 = sphi %s1844_s24, %s2535_s24  }
   0x3   : > { %s22_s29 = ssub.s32 %s1799_s26, %s1863_s28  ;;  %s25_s30 = sadd.s32 1, %s1795_s25 }
   0x4   : > { %p23_p0 = scmp.eq.s32.totalorder %s22_s29, 0  ;;  %p32_p1 = scmp.ne.s32.totalorder %s1795_s25, %s1791_s24 }
   0x5   : > { %p33_p2 = scmp.eq.s32.totalorder %s1799_s26, 0  ;;  %p167_p3 = scmp.eq.s32.totalorder %s1860_s27, 3 }
   0x6   : > { %s1873_s8 = scalar_select %p23_p0, %s1795_s25, %s25_s30  }
   0x7   : > { %p34_p4 = por %p33_p2, %p32_p1  ;;  %p1875_p5 = por %p167_p3, %p32_p1 }
   0x8   : > { %p1602_p6 = scmp.ge.s32.totalorder %s1799_s26, 4 }
   0xa   : > { %230 = sbr.rel (%p1602_p6) target bundleno = 37 (0x25), region = 36 }
  0x11   : > { %233 = sbr.rel (!%p34_p4) target bundleno = 37 (0x25), region = 40  ;;  %s235_s10 = sand.u32 (%p34_p4), 1, %s1795_s25  }
  0x12   : > { %s1604_s11 = sshll.u32 (%p34_p4), %s1799_s26, 3  ;;  %s1603_s12 = sshll.u32 (%p34_p4), %s235_s10, 7 }
  0x13   : > { %s1885_s15 = scalar_lea.vmem (%p34_p4), %s2526_s0, %s1604_s11  ;;  %s237_s16 = scalar_lea.vmem (%p34_p4), [#allocation4], %s1603_s12 }
  0x14   : > { %v297_v0 = vld [vmem:[%s1885_s15] sm:$0xff] (%p34_p4) }
  0x15   : > { %v299_v1 = vld [vmem:[%s1885_s15 + $0x20] sm:$0xff] (%p34_p4)  ;;  %298 = vst [vmem:[%s237_s16] sm:$0xff] (%p34_p4), %v297_v0 }
  0x16   : > { %v301_v2 = vld [vmem:[%s1885_s15 + $0x40] sm:$0xff] (%p34_p4)  ;;  %300 = vst [vmem:[%s237_s16 + $0x8] sm:$0xff] (%p34_p4), %v299_v1 }
  0x17   : > { %302 = vst [vmem:[%s237_s16 + $0x10] sm:$0xff] (%p34_p4), %v301_v2  ;;  %v303_v3 = vld [vmem:[%s1885_s15 + $0x60] sm:$0xff] (%p34_p4) }
  0x18   : > { %v305_v4 = vld [vmem:[%s1885_s15 + $0x80] sm:$0xff]  ;;  %304 = vst [vmem:[%s237_s16 + $0x18] sm:$0xff] %v303_v3 }
  0x19   : > { %v307_v5 = vld [vmem:[%s1885_s15 + $0xa0] sm:$0xff]  ;;  %306 = vst [vmem:[%s237_s16 + $0x20] sm:$0xff] %v305_v4 }
  0x1a   : > { %308 = vst [vmem:[%s237_s16 + $0x28] sm:$0xff] %v307_v5  ;;  %v309_v6 = vld [vmem:[%s1885_s15 + $0xc0] sm:$0xff] }
  0x1b   : > { %v311_v7 = vld [vmem:[%s1885_s15 + $0xe0] sm:$0xff]  ;;  %310 = vst [vmem:[%s237_s16 + $0x30] sm:$0xff] %v309_v6 }
  0x1c   : > { %v313_v8 = vld [vmem:[%s1885_s15 + $0x100] sm:$0xff]  ;;  %312 = vst [vmem:[%s237_s16 + $0x38] sm:$0xff] %v311_v7 }
  0x1d   : > { %314 = vst [vmem:[%s237_s16 + $0x40] sm:$0xff] %v313_v8  ;;  %v315_v9 = vld [vmem:[%s1885_s15 + $0x120] sm:$0xff] }
  0x1e   : > { %v317_v10 = vld [vmem:[%s1885_s15 + $0x140] sm:$0xff]  ;;  %316 = vst [vmem:[%s237_s16 + $0x48] sm:$0xff] %v315_v9 }
  0x1f   : > { %v319_v11 = vld [vmem:[%s1885_s15 + $0x160] sm:$0xff]  ;;  %318 = vst [vmem:[%s237_s16 + $0x50] sm:$0xff] %v317_v10 }
  0x20   : > { %320 = vst [vmem:[%s237_s16 + $0x58] sm:$0xff] %v319_v11  ;;  %v321_v12 = vld [vmem:[%s1885_s15 + $0x180] sm:$0xff] }
  0x21   : > { %v323_v13 = vld [vmem:[%s1885_s15 + $0x1a0] sm:$0xff]  ;;  %322 = vst [vmem:[%s237_s16 + $0x60] sm:$0xff] %v321_v12 }
  0x22   : > { %v325_v14 = vld [vmem:[%s1885_s15 + $0x1c0] sm:$0xff]  ;;  %324 = vst [vmem:[%s237_s16 + $0x68] sm:$0xff] %v323_v13 }
  0x23   : > { %326 = vst [vmem:[%s237_s16 + $0x70] sm:$0xff] %v325_v14  ;;  %v327_v15 = vld [vmem:[%s1885_s15 + $0x1e0] sm:$0xff] }
  0x24   : > { %328 = vst [vmem:[%s237_s16 + $0x78] sm:$0xff] %v327_v15 }
  0x25 PF: > { %p1605_p7 = scmp.ge.s32.totalorder %s1799_s26, 1  ;;  %p333_p8 = scmp.lt.s32.totalorder %s1799_s26, 5 }
  0x27   : > { %p334_p9 = pnand %p1605_p7, %p333_p8 }
  0x28   : > { %v596_v16 = vld [vmem:[%s2529_s3] sm:$0xff] (!%p334_p9)  ;;  %s340_s19 = sand.u32 (!%p334_p9), 1, %s1791_s24   ;;  %vm402_vm0 = vcmask (!%p334_p9), 64512   ;;  %s1801_s30 = smov (!%p334_p9), 8   ;;  %v1802_v35 = vmov (!%p334_p9), 0.0   ;;  %vm1186_vm1 = vcmask (!%p334_p9), 130112  }
  0x29   : > { %337 = sbr.rel (%p334_p9) target bundleno = 571 (0x23b), region = 78  ;;  %v394_v17 = vld [vmem:[%s2527_s1] sm:$0xff] (!%p334_p9)  ;;  %1724 = vmatprep.subr.mxu1 (!%p334_p9), %v596_v16  ;;  %s1606_s22 = sshll.u32 (!%p334_p9), %s340_s19, 7  ;;  %749 = vst.msk [vmem:[#allocation2] sm:$0xff] (!%p334_p9), %vm402_vm0, %v1802_v35  ;;  %832 = vst.msk [vmem:[#allocation3 + $0x80] sm:$0xff] (!%p334_p9), %vm402_vm0, %v1802_v35  ;;  %vm1343_vm2 = vcmask (!%p334_p9), 1040384  }
  0x2a   : > { %1698 = vmatprep.subr.mxu0 (!%p334_p9), %v394_v17  ;;  %1725 = vmatpush3.msra.mxu1 (!%p334_p9), %v596_v16  ;;  %s1914_s23 = scalar_lea.vmem (!%p334_p9), [#allocation4], %s1606_s22  ;;  %v1967_v34 = vld [vmem:[%s2531_s5] ss:$0 sm:$0xff] (!%p334_p9)  ;;  %s1607_s14 = sshll.u32 (!%p334_p9), %s340_s19, 8  ;;  %vm1345_vm3 = vcmask (!%p334_p9), 58368  }
  0x2b   : > { %1699 = vmatpush3.msra.mxu0 (!%p334_p9), %v394_v17  ;;  %v378_v18 = vld [vmem:[%s1914_s23] sm:$0xff] (!%p334_p9)  ;;  %v379_v19 = vld [vmem:[%s1914_s23 + $0x8] sm:$0xff] (!%p334_p9)  ;;  %v380_v20 = vld [vmem:[%s1914_s23 + $0x10] sm:$0xff] (!%p334_p9)  ;;  %1017 = vrot.lane.b32.xlu1 (!%p334_p9), %v1967_v34, %s1801_s30  ;;  %s2026_s24 = scalar_lea.vmem (!%p334_p9), [#allocation5], %s1607_s14  ;;  %s1803_s15 = smov (!%p334_p9), 120  }
  0x2c   : > { %1726 = vmatprep.mubr.msk.f32.mxu1 (!%p334_p9), %vm402_vm0, %v378_v18  ;;  %1700 = vmatprep.mubr.msk.f32.mxu0 (!%p334_p9), %vm402_vm0, %v378_v18  ;;  %v381_v21 = vld [vmem:[%s1914_s23 + $0x18] sm:$0xff] (!%p334_p9)  ;;  %v382_v22 = vld [vmem:[%s1914_s23 + $0x20] sm:$0xff] (!%p334_p9)  ;;  %v383_v23 = vld [vmem:[%s1914_s23 + $0x28] sm:$0xff] (!%p334_p9)  ;;  %p374_p10 = scmp.lt.s32.totalorder (!%p334_p9), %s1860_s27, 3 }
  0x2d   : > { %1727 = vmatmul.mubr.msk.f32.vlgmr.msra.gmra.mrb[0].mxu1 (!%p334_p9), %vm402_vm0, %v379_v19  ;;  %1701 = vmatmul.mubr.msk.f32.vlgmr.msra.gmra.mrb[0].mxu0 (!%p334_p9), %vm402_vm0, %v379_v19  ;;  %v384_v24 = vld [vmem:[%s1914_s23 + $0x30] sm:$0xff] (!%p334_p9)  ;;  %v385_v25 = vld [vmem:[%s1914_s23 + $0x38] sm:$0xff] (!%p334_p9)  ;;  %v386_v26 = vld [vmem:[%s1914_s23 + $0x40] sm:$0xff] (!%p334_p9) }
  0x2e   : > { %1729 = vmatprep.mubr.msk.f32.mxu1 (!%p334_p9), %vm402_vm0, %v380_v20  ;;  %1703 = vmatprep.mubr.msk.f32.mxu0 (!%p334_p9), %vm402_vm0, %v380_v20  ;;  %v387_v27 = vld [vmem:[%s1914_s23 + $0x48] sm:$0xff] (!%p334_p9)  ;;  %v388_v28 = vld [vmem:[%s1914_s23 + $0x50] sm:$0xff] (!%p334_p9)  ;;  %v389_v29 = vld [vmem:[%s1914_s23 + $0x58] sm:$0xff] (!%p334_p9) }
  0x2f   : > { %v390_v30 = vld [vmem:[%s1914_s23 + $0x60] sm:$0xff] (!%p334_p9)  ;;  %v391_v31 = vld [vmem:[%s1914_s23 + $0x68] sm:$0xff] (!%p334_p9)  ;;  %v392_v32 = vld [vmem:[%s1914_s23 + $0x70] sm:$0xff] (!%p334_p9) }
  0x30   : > { %v393_v33 = vld [vmem:[%s1914_s23 + $0x78] sm:$0xff]  ;;  %v1976_v36 = vld [vmem:[%s2530_s4] ss:$0 sm:$0xff]  ;;  %s375_s16 = scalar_select %p374_p10, %s1860_s27, 3 }
  0x31   : > { %1730 = vmatmul.mubr.msk.f32.gmra.mrb[2].mxu1 %vm402_vm0, %v381_v21  ;;  %1704 = vmatmul.mubr.msk.f32.gmra.mrb[2].mxu0 %vm402_vm0, %v381_v21  ;;  %v1981_v37 = vld [vmem:[%s2528_s2] ss:$0 sm:$0xff]  ;;  %s1661_s21 = sshll.u32 (%p1875_p5), %s1860_s27, 3 }
  0x32   : > { %1732 = vmatprep.mubr.msk.f32.mxu1 %vm402_vm0, %v382_v22  ;;  %1706 = vmatprep.mubr.msk.f32.mxu0 %vm402_vm0, %v382_v22  ;;  %v850_v43 = vld [vmem:[#allocation2] sm:$0xff]  ;;  %s1608_s17 = sshll.u32 %s375_s16, 1  ;;  %s2453_s26 = scalar_lea.vmem (%p1875_p5), %s2532_s6, %s1661_s21 }
  0x33   : > { %s377_s20 = scalar_lea.vmem %s2533_s7, %s1608_s17 }
  0x35   : > { %1733 = vmatmul.mubr.msk.f32.gmra.mrb[4].mxu1 %vm402_vm0, %v383_v23  ;;  %1707 = vmatmul.mubr.msk.f32.gmra.mrb[4].mxu0 %vm402_vm0, %v383_v23 }
  0x36   : > { %1735 = vmatprep.mubr.msk.f32.mxu1 %vm402_vm0, %v384_v24  ;;  %1709 = vmatprep.mubr.msk.f32.mxu0 %vm402_vm0, %v384_v24 }
  0x39   : > { %1736 = vmatmul.mubr.msk.f32.gmra.mrb[6].mxu1 %vm402_vm0, %v385_v25  ;;  %1710 = vmatmul.mubr.msk.f32.gmra.mrb[6].mxu0 %vm402_vm0, %v385_v25 }
  0x3a   : > { %1738 = vmatprep.mubr.msk.f32.mxu1 %vm402_vm0, %v386_v26  ;;  %1712 = vmatprep.mubr.msk.f32.mxu0 %vm402_vm0, %v386_v26 }
  0x3d   : > { %1739 = vmatmul.mubr.msk.f32.gmra.mrb[8].mxu1 %vm402_vm0, %v387_v27  ;;  %1713 = vmatmul.mubr.msk.f32.gmra.mrb[8].mxu0 %vm402_vm0, %v387_v27 }
  0x3e   : > { %1741 = vmatprep.mubr.msk.f32.mxu1 %vm402_vm0, %v388_v28  ;;  %1715 = vmatprep.mubr.msk.f32.mxu0 %vm402_vm0, %v388_v28 }
  0x41   : > { %1742 = vmatmul.mubr.msk.f32.gmra.mrb[10].mxu1 %vm402_vm0, %v389_v29  ;;  %1716 = vmatmul.mubr.msk.f32.gmra.mrb[10].mxu0 %vm402_vm0, %v389_v29 }
  0x42   : > { %1744 = vmatprep.mubr.msk.f32.mxu1 %vm402_vm0, %v390_v30  ;;  %1718 = vmatprep.mubr.msk.f32.mxu0 %vm402_vm0, %v390_v30 }
  0x45   : > { %1745 = vmatmul.mubr.msk.f32.gmra.mrb[12].mxu1 %vm402_vm0, %v391_v31  ;;  %1719 = vmatmul.mubr.msk.f32.gmra.mrb[12].mxu0 %vm402_vm0, %v391_v31 }
  0x46   : > { %1747 = vmatprep.mubr.msk.f32.mxu1 %vm402_vm0, %v392_v32  ;;  %1721 = vmatprep.mubr.msk.f32.mxu0 %vm402_vm0, %v392_v32 }
  0x49   : > { %1748 = vmatmul.mubr.msk.f32.gmra.mrb[14].mxu1 %vm402_vm0, %v393_v33  ;;  %1722 = vmatmul.mubr.msk.f32.gmra.mrb[14].mxu0 %vm402_vm0, %v393_v33 }
 0x100   : > { %v1728_v38 = vpop.f32.mrb[0].mxu1  ;;  %v1983_v39 = vpop.f32.mrb[0].mxu0 }
 0x101   : > { %v1986_v40 = vadd.f32 %v1728_v38, %v1976_v36  ;;  %v670_v41 = vpop.f32.mrb[1].mxu1  ;;  %v517_v42 = vpop.f32.mrb[1].mxu0 }
 0x102   : > { %v1989_v44 = vadd.f32 %v1976_v36, %v670_v41  ;;  %v1992_v45 = vadd.f32 %v1981_v37, %v517_v42 }
 0x103   : > { %834 = vst.msk [vmem:[#allocation3 + $0x8] sm:$0xff] %vm402_vm0, %v1986_v40 }
 0x104   : > { %v1731_v46 = vpop.f32.mrb[2].mxu1  ;;  %v866_v47 = vadd.f32 %v850_v43, %v1992_v45  ;;  %v1999_v48 = vpop.f32.mrb[2].mxu0 }
 0x105   : > { %v2002_v49 = vadd.f32 %v1731_v46, %v1976_v36  ;;  %v680_v50 = vpop.f32.mrb[3].mxu1  ;;  %v2004_v51 = vpop.f32.mrb[3].mxu0 }
 0x106   : > { %v2007_v52 = vadd.f32 %v1976_v36, %v680_v50  ;;  %v888_v53 = vadd.f32 %v1967_v34, %v866_v47 }
 0x107   : > { %836 = vst.msk [vmem:[#allocation3 + $0x18] sm:$0xff] %vm402_vm0, %v2002_v49 }
 0x108   : > { %835 = vst.msk [vmem:[#allocation3 + $0x10] sm:$0xff] %vm402_vm0, %v2007_v52  ;;  %v1734_v54 = vpop.f32.mrb[4].mxu1  ;;  %v2014_v55 = vmax.f32 %v888_v53, 0.0  ;;  %v2016_v56 = vpop.f32.mrb[4].mxu0 }
 0x109   : > { %v2019_v57 = vadd.f32 %v1734_v54, %v1976_v36  ;;  %v690_v58 = vpop.f32.mrb[5].mxu1  ;;  %v2021_v59 = vpop.f32.mrb[5].mxu0 }
 0x10a   : > { %v2024_v60 = vadd.f32 %v1976_v36, %v690_v58  ;;  %v921_v61 = vld [vmem:[#allocation3 + $0x8] sm:$0xff]  ;;  %1052 = vst.msk [vmem:[%s2026_s24] sm:$0xff] %vm402_vm0, %v2014_v55 }
 0x10b   : > { %838 = vst.msk [vmem:[#allocation3 + $0x28] sm:$0xff] %vm402_vm0, %v2019_v57  ;;  %953 = vrot.lane.b32.xlu0 %v921_v61, %s1801_s30  ;;  %v936_v61 = vld [vmem:[#allocation3 + $0x80] sm:$0xff] }
 0x10c   : > { %837 = vst.msk [vmem:[#allocation3 + $0x20] sm:$0xff] %vm402_vm0, %v2024_v60  ;;  %v1737_v62 = vpop.f32.mrb[6].mxu1  ;;  %v2036_v63 = vpop.f32.mrb[6].mxu0 }
 0x10d   : > { %v2039_v0 = vadd.f32 %v1737_v62, %v1976_v36  ;;  %v700_v1 = vpop.f32.mrb[7].mxu1  ;;  %v2041_v2 = vpop.f32.mrb[7].mxu0  ;;  %v2124_v62 = vadd.f32 %v1981_v37, %v2004_v51  ;;  %v2151_v51 = vadd.f32 %v2016_v56, %v1981_v37 }
 0x10e   : > { %v2044_v3 = vadd.f32 %v1976_v36, %v700_v1  ;;  %v923_v4 = vld [vmem:[#allocation3 + $0x18] sm:$0xff]  ;;  %v2128_v1 = vadd.f32 %v1983_v39, %v1981_v37  ;;  %v2147_v39 = vadd.f32 %v1981_v37, %v2041_v2 }
 0x10f   : > { %840 = vst.msk [vmem:[#allocation3 + $0x38] sm:$0xff] %vm402_vm0, %v2039_v0  ;;  %957 = vrot.lane.b32.xlu1 %v923_v4, %s1801_s30  ;;  %v922_v5 = vld [vmem:[#allocation3 + $0x10] sm:$0xff]  ;;  %v2135_v4 = vadd.f32 %v1981_v37, %v2021_v59  ;;  %v2163_v59 = vadd.f32 %v2036_v63, %v1981_v37 }
 0x110   : > { %839 = vst.msk [vmem:[#allocation3 + $0x30] sm:$0xff] %vm402_vm0, %v2044_v3  ;;  %v1740_v6 = vpop.f32.mrb[8].mxu1  ;;  %955 = vrot.lane.b32.xlu0 %v922_v5, %s1801_s30  ;;  %v2052_v7 = vpop.f32.mrb[8].mxu0 }
 0x111   : > { %v2055_v8 = vadd.f32 %v1740_v6, %v1976_v36  ;;  %v710_v9 = vpop.f32.mrb[9].mxu1  ;;  %v2057_v10 = vpop.f32.mrb[9].mxu0  ;;  %v2174_v2 = vadd.f32 %v2052_v7, %v1981_v37 }
 0x112   : > { %v2060_v11 = vadd.f32 %v1976_v36, %v710_v9  ;;  %v925_v12 = vld [vmem:[#allocation3 + $0x28] sm:$0xff] }
 0x113   : > { %842 = vst.msk [vmem:[#allocation3 + $0x48] sm:$0xff] %vm402_vm0, %v2055_v8  ;;  %961 = vrot.lane.b32.xlu1 %v925_v12, %s1801_s30  ;;  %v924_v13 = vld [vmem:[#allocation3 + $0x20] sm:$0xff] }
 0x114   : > { %841 = vst.msk [vmem:[#allocation3 + $0x40] sm:$0xff] %vm402_vm0, %v2060_v11  ;;  %v1743_v14 = vpop.f32.mrb[10].mxu1  ;;  %959 = vrot.lane.b32.xlu0 %v924_v13, %s1801_s30  ;;  %v1717_v15 = vpop.f32.mrb[10].mxu0 }
 0x115   : > { %v2069_v16 = vadd.f32 %v1743_v14, %v1976_v36  ;;  %v720_v17 = vpop.f32.mrb[11].mxu1  ;;  %v2072_v18 = vadd.f32 %v1717_v15, %v1981_v37  ;;  %v567_v19 = vpop.f32.mrb[11].mxu0 }
 0x116   : > { %v2075_v20 = vadd.f32 %v1976_v36, %v720_v17  ;;  %v927_v21 = vld [vmem:[#allocation3 + $0x38] sm:$0xff]  ;;  %v2170_v56 = vadd.f32 %v1981_v37, %v567_v19 }
 0x117   : > { %844 = vst.msk [vmem:[#allocation3 + $0x58] sm:$0xff] %vm402_vm0, %v2069_v16  ;;  %965 = vrot.lane.b32.xlu1 %v927_v21, %s1801_s30  ;;  %v926_v22 = vld [vmem:[#allocation3 + $0x30] sm:$0xff] }
 0x118   : > { %843 = vst.msk [vmem:[#allocation3 + $0x50] sm:$0xff] %vm402_vm0, %v2075_v20  ;;  %v1746_v23 = vpop.f32.mrb[12].mxu1  ;;  %963 = vrot.lane.b32.xlu0 %v926_v22, %s1801_s30  ;;  %v1720_v24 = vpop.f32.mrb[12].mxu0 }
 0x119   : > { %v2084_v25 = vadd.f32 %v1746_v23, %v1976_v36  ;;  %v730_v26 = vpop.f32.mrb[13].mxu1  ;;  %v2087_v27 = vadd.f32 %v1720_v24, %v1981_v37  ;;  %v577_v28 = vpop.f32.mrb[13].mxu0 }
 0x11a   : > { %v2090_v29 = vadd.f32 %v1976_v36, %v730_v26  ;;  %v929_v30 = vld [vmem:[#allocation3 + $0x48] sm:$0xff]  ;;  %v2181_v63 = vadd.f32 %v1981_v37, %v577_v28 }
 0x11b   : > { %846 = vst.msk [vmem:[#allocation3 + $0x68] sm:$0xff] %vm402_vm0, %v2084_v25  ;;  %969 = vrot.lane.b32.xlu1 %v929_v30, %s1801_s30  ;;  %v928_v31 = vld [vmem:[#allocation3 + $0x40] sm:$0xff] }
 0x11c   : > { %845 = vst.msk [vmem:[#allocation3 + $0x60] sm:$0xff] %vm402_vm0, %v2090_v29  ;;  %v1749_v32 = vpop.f32.mrb[14].mxu1  ;;  %967 = vrot.lane.b32.xlu0 %v928_v31, %s1801_s30  ;;  %v1723_v33 = vpop.f32.mrb[14].mxu0 }
 0x11d   : > { %v2099_v35 = vadd.f32 %v1749_v32, %v1976_v36  ;;  %v740_v38 = vpop.f32.mrb[15].mxu1  ;;  %v2102_v41 = vadd.f32 %v1723_v33, %v1981_v37  ;;  %v587_v42 = vpop.f32.mrb[15].mxu0 }
 0x11e   : > { %v2105_v43 = vadd.f32 %v1976_v36, %v740_v38  ;;  %v931_v46 = vld [vmem:[#allocation3 + $0x58] sm:$0xff]  ;;  %v2108_v47 = vadd.f32 %v1981_v37, %v587_v42 }
 0x11f   : > { %848 = vst.msk [vmem:[#allocation3 + $0x78] sm:$0xff] %vm402_vm0, %v2099_v35  ;;  %973 = vrot.lane.b32.xlu1 %v931_v46, %s1801_s30  ;;  %v930_v50 = vld [vmem:[#allocation3 + $0x50] sm:$0xff] }
 0x120   : > { %847 = vst.msk [vmem:[#allocation3 + $0x70] sm:$0xff] %vm402_vm0, %v2105_v43  ;;  %971 = vrot.lane.b32.xlu0 %v930_v50, %s1801_s30 }
 0x122   : > { %v933_v53 = vld [vmem:[#allocation3 + $0x68] sm:$0xff] }
 0x123   : > { %977 = vrot.lane.b32.xlu1 %v933_v53, %s1801_s30  ;;  %v932_v36 = vld [vmem:[#allocation3 + $0x60] sm:$0xff] }
 0x124   : > { %975 = vrot.lane.b32.xlu0 %v932_v36, %s1801_s30 }
 0x126   : > { %v935_v54 = vld [vmem:[#allocation3 + $0x78] sm:$0xff] }
 0x127   : > { %981 = vrot.lane.b32.xlu1 %v935_v54, %s1801_s30  ;;  %v934_v58 = vld [vmem:[#allocation3 + $0x70] sm:$0xff] }
 0x128   : > { %979 = vrot.lane.b32.xlu0 %v934_v58, %s1801_s30 }
 0x12b   : > { %766 = vrot.lane.b32.xlu1 %v1992_v45, %s1803_s15  ;;  %v2139_v45 = vadd.f32 %v1999_v48, %v1981_v37  ;;  %v2159_v48 = vadd.f32 %v1981_v37, %v2057_v10  ;;  %v2195_v37 = vpop.permute.xlu1 %1017 }
 0x12c   : > { %983 = vrot.lane.b32.xlu0 %v936_v61, %s1801_s30 }
 0x12f   : > { %770 = vrot.lane.b32.xlu1 %v2124_v62, %s1803_s15 }
 0x130   : > { %768 = vrot.lane.b32.xlu0 %v2128_v1, %s1803_s15 }
 0x133   : > { %774 = vrot.lane.b32.xlu1 %v2135_v4, %s1803_s15 }
 0x134   : > { %772 = vrot.lane.b32.xlu0 %v2139_v45, %s1803_s15 }
 0x137   : > { %778 = vrot.lane.b32.xlu1 %v2147_v39, %s1803_s15 }
 0x138   : > { %776 = vrot.lane.b32.xlu0 %v2151_v51, %s1803_s15 }
 0x13b   : > { %782 = vrot.lane.b32.xlu1 %v2159_v48, %s1803_s15 }
 0x13c   : > { %780 = vrot.lane.b32.xlu0 %v2163_v59, %s1803_s15 }
 0x13f   : > { %786 = vrot.lane.b32.xlu1 %v2170_v56, %s1803_s15 }
 0x140   : > { %784 = vrot.lane.b32.xlu0 %v2174_v2, %s1803_s15 }
 0x143   : > { %790 = vrot.lane.b32.xlu1 %v2181_v63, %s1803_s15 }
 0x144   : > { %788 = vrot.lane.b32.xlu0 %v2072_v18, %s1803_s15 }
 0x147   : > { %794 = vrot.lane.b32.xlu1 %v2108_v47, %s1803_s15 }
 0x148   : > { %792 = vrot.lane.b32.xlu0 %v2087_v27, %s1803_s15 }
 0x14c   : > { %796 = vrot.lane.b32.xlu0 %v2102_v41, %s1803_s15 }
 0x17d   : > { %v954_v5 = vpop.permute.xlu0 %953 }
 0x17e   : > { %v1001_v6 = vadd.f32 %v954_v5, %v1989_v44 }
 0x180   : > { %v1020_v7 = vadd.f32 %v2195_v37, %v1001_v6 }
 0x181   : > { %v958_v9 = vpop.permute.xlu1 %957 }
 0x182   : > { %v1036_v10 = vmax.f32 %v1020_v7, 0.0  ;;  %v1003_v12 = vadd.f32 %v958_v9, %v2007_v52  ;;  %v956_v13 = vpop.permute.xlu0 %955 }
 0x183   : > { %v1002_v14 = vadd.f32 %v956_v13, %v1986_v40 }
 0x184   : > { %v1022_v15 = vadd.f32 %v2195_v37, %v1003_v12  ;;  %1084 = vrot.lane.b32.xlu1 %v1036_v10, %s1803_s15  ;;  %v1282_v21 = vmul.f32 %v1036_v10, %v1036_v10  ;;  %v1187_v40 = vsel %vm1186_vm1, %v1036_v10, 0.0 }
 0x185   : > { %v1021_v17 = vadd.f32 %v2195_v37, %v1002_v14  ;;  %v962_v19 = vpop.permute.xlu1 %961 }
 0x186   : > { %v1038_v22 = vmax.f32 %v1022_v15, 0.0  ;;  %v1005_v44 = vadd.f32 %v962_v19, %v2024_v60  ;;  %v960_v23 = vpop.permute.xlu0 %959  ;;  %v1298_v60 = vsel %vm1186_vm1, %v1282_v21, 0.0 }
 0x187   : > { %v1037_v24 = vmax.f32 %v1021_v17, 0.0  ;;  %v1004_v26 = vadd.f32 %v960_v23, %v2002_v49 }
 0x188   : > { %v1284_v52 = vmul.f32 %v1038_v22, %v1038_v22  ;;  %v1024_v28 = vadd.f32 %v2195_v37, %v1005_v44  ;;  %1088 = vrot.lane.b32.xlu1 %v1038_v22, %s1803_s15  ;;  %v1190_v50 = vsel %vm1186_vm1, %v1038_v22, 0.0 }
 0x189   : > { %v1188_v30 = vsel %vm1186_vm1, %v1037_v24, 0.0  ;;  %v1283_v31 = vmul.f32 %v1037_v24, %v1037_v24  ;;  %v1023_v32 = vadd.f32 %v2195_v37, %v1004_v26  ;;  %v966_v33 = vpop.permute.xlu1 %965  ;;  %1086 = vrot.lane.b32.xlu0 %v1037_v24, %s1803_s15 }
 0x18a   : > { %v1189_v38 = vadd.f32 %v1188_v30, %v1187_v40  ;;  %v1040_v42 = vmax.f32 %v1024_v28, 0.0  ;;  %v1007_v49 = vadd.f32 %v966_v33, %v2044_v3  ;;  %v964_v46 = vpop.permute.xlu0 %963  ;;  %v1301_v58 = vsel %vm1186_vm1, %v1284_v52, 0.0 }
 0x18b   : > { %v1299_v53 = vsel %vm1186_vm1, %v1283_v31, 0.0  ;;  %v1039_v36 = vmax.f32 %v1023_v32, 0.0  ;;  %v1006_v54 = vadd.f32 %v964_v46, %v2019_v57 }
 0x18c   : > { %v1300_v61 = vadd.f32 %v1299_v53, %v1298_v60  ;;  %v1286_v5 = vmul.f32 %v1040_v42, %v1040_v42  ;;  %v1191_v6 = vadd.f32 %v1190_v50, %v1189_v38  ;;  %1092 = vrot.lane.b32.xlu1 %v1040_v42, %s1803_s15  ;;  %v1026_v3 = vadd.f32 %v2195_v37, %v1007_v49 }
 0x18d   : > { %v1192_v7 = vsel %vm1186_vm1, %v1039_v36, 0.0  ;;  %v1285_v9 = vmul.f32 %v1039_v36, %v1039_v36  ;;  %v1025_v10 = vadd.f32 %v2195_v37, %v1006_v54  ;;  %v970_v12 = vpop.permute.xlu1 %969  ;;  %1090 = vrot.lane.b32.xlu0 %v1039_v36, %s1803_s15  ;;  %v1194_v13 = vsel %vm1186_vm1, %v1040_v42, 0.0 }
 0x18e   : > { %v1193_v57 = vadd.f32 %v1192_v7, %v1191_v6  ;;  %v1302_v14 = vadd.f32 %v1301_v58, %v1300_v61  ;;  %v1009_v15 = vadd.f32 %v970_v12, %v2060_v11  ;;  %v968_v17 = vpop.permute.xlu0 %967  ;;  %v1042_v21 = vmax.f32 %v1026_v3, 0.0 }
 0x18f   : > { %v1303_v19 = vsel %vm1186_vm1, %v1285_v9, 0.0  ;;  %v1041_v22 = vmax.f32 %v1025_v10, 0.0  ;;  %v1008_v44 = vadd.f32 %v968_v17, %v2039_v0  ;;  %v1305_v52 = vsel %vm1186_vm1, %v1286_v5, 0.0 }
 0x190   : > { %v1304_v23 = vadd.f32 %v1303_v19, %v1302_v14  ;;  %v1195_v24 = vadd.f32 %v1194_v13, %v1193_v57  ;;  %v1028_v26 = vadd.f32 %v2195_v37, %v1009_v15  ;;  %v1288_v28 = vmul.f32 %v1042_v21, %v1042_v21  ;;  %1096 = vrot.lane.b32.xlu1 %v1042_v21, %s1803_s15 }
 0x191   : > { %v1196_v40 = vsel %vm1186_vm1, %v1041_v22, 0.0  ;;  %v1287_v30 = vmul.f32 %v1041_v22, %v1041_v22  ;;  %v974_v11 = vpop.permute.xlu1 %973  ;;  %1094 = vrot.lane.b32.xlu0 %v1041_v22, %s1803_s15  ;;  %v1027_v0 = vadd.f32 %v2195_v37, %v1008_v44  ;;  %v1198_v46 = vsel %vm1186_vm1, %v1042_v21, 0.0 }
 0x192   : > { %v1197_v31 = vadd.f32 %v1196_v40, %v1195_v24  ;;  %v1306_v32 = vadd.f32 %v1305_v52, %v1304_v23  ;;  %v1044_v33 = vmax.f32 %v1028_v26, 0.0  ;;  %v972_v60 = vpop.permute.xlu0 %971  ;;  %v1011_v42 = vadd.f32 %v974_v11, %v2075_v20 }
 0x193   : > { %v1307_v38 = vsel %vm1186_vm1, %v1287_v30, 0.0  ;;  %v1010_v49 = vadd.f32 %v972_v60, %v2055_v8  ;;  %v1309_v50 = vsel %vm1186_vm1, %v1288_v28, 0.0  ;;  %v1043_v36 = vmax.f32 %v1027_v0, 0.0 }
 0x194   : > { %v1308_v53 = vadd.f32 %v1307_v38, %v1306_v32  ;;  %v1290_v54 = vmul.f32 %v1044_v33, %v1044_v33  ;;  %v1199_v58 = vadd.f32 %v1198_v46, %v1197_v31  ;;  %v1030_v61 = vadd.f32 %v2195_v37, %v1011_v42  ;;  %1100 = vrot.lane.b32.xlu1 %v1044_v33, %s1803_s15 }
 0x195   : > { %v1029_v5 = vadd.f32 %v2195_v37, %v1010_v49  ;;  %v978_v6 = vpop.permute.xlu1 %977  ;;  %v1200_v7 = vsel %vm1186_vm1, %v1043_v36, 0.0  ;;  %v1289_v20 = vmul.f32 %v1043_v36, %v1043_v36  ;;  %1098 = vrot.lane.b32.xlu0 %v1043_v36, %s1803_s15  ;;  %v1202_v57 = vsel %vm1186_vm1, %v1044_v33, 0.0 }
 0x196   : > { %v1310_v9 = vadd.f32 %v1309_v50, %v1308_v53  ;;  %v976_v8 = vpop.permute.xlu0 %975  ;;  %v1201_v3 = vadd.f32 %v1200_v7, %v1199_v58  ;;  %v1046_v10 = vmax.f32 %v1030_v61, 0.0  ;;  %v1013_v13 = vadd.f32 %v978_v6, %v2090_v29 }
 0x197   : > { %v1045_v12 = vmax.f32 %v1029_v5, 0.0  ;;  %v1311_v14 = vsel %vm1186_vm1, %v1289_v20, 0.0  ;;  %v1012_v15 = vadd.f32 %v976_v8, %v2069_v16  ;;  %v1313_v17 = vsel %vm1186_vm1, %v1290_v54, 0.0 }
 0x198   : > { %v1312_v19 = vadd.f32 %v1311_v14, %v1310_v9  ;;  %v1292_v21 = vmul.f32 %v1046_v10, %v1046_v10  ;;  %v1203_v22 = vadd.f32 %v1202_v57, %v1201_v3  ;;  %1104 = vrot.lane.b32.xlu1 %v1046_v10, %s1803_s15  ;;  %v1032_v26 = vadd.f32 %v2195_v37, %v1013_v13 }
 0x199   : > { %v982_v44 = vpop.permute.xlu1 %981  ;;  %v1204_v23 = vsel %vm1186_vm1, %v1045_v12, 0.0  ;;  %v1291_v24 = vmul.f32 %v1045_v12, %v1045_v12  ;;  %v1031_v29 = vadd.f32 %v2195_v37, %v1012_v15  ;;  %1102 = vrot.lane.b32.xlu0 %v1045_v12, %s1803_s15  ;;  %v1206_v16 = vsel %vm1186_vm1, %v1046_v10, 0.0 }
 0x19a   : > { %v980_v52 = vpop.permute.xlu0 %979  ;;  %v1205_v28 = vadd.f32 %v1204_v23, %v1203_v22  ;;  %v1314_v40 = vadd.f32 %v1313_v17, %v1312_v19  ;;  %v1015_v30 = vadd.f32 %v982_v44, %v2105_v43  ;;  %v1048_v31 = vmax.f32 %v1032_v26, 0.0 }
 0x19b   : > { %v1315_v11 = vsel %vm1186_vm1, %v1291_v24, 0.0  ;;  %v1047_v32 = vmax.f32 %v1031_v29, 0.0  ;;  %v1014_v33 = vadd.f32 %v980_v52, %v2084_v25  ;;  %v1317_v49 = vsel %vm1186_vm1, %v1292_v21, 0.0 }
 0x19c   : > { %v1316_v0 = vadd.f32 %v1315_v11, %v1314_v40  ;;  %v1207_v60 = vadd.f32 %v1206_v16, %v1205_v28  ;;  %v1034_v38 = vadd.f32 %v2195_v37, %v1015_v30  ;;  %v1294_v46 = vmul.f32 %v1048_v31, %v1048_v31  ;;  %1108 = vrot.lane.b32.xlu1 %v1048_v31, %s1803_s15 }
 0x19d   : > { %v767_v42 = vpop.permute.xlu1 %766  ;;  %v1208_v50 = vsel %vm1186_vm1, %v1047_v32, 0.0  ;;  %v1293_v53 = vmul.f32 %v1047_v32, %v1047_v32  ;;  %1106 = vrot.lane.b32.xlu0 %v1047_v32, %s1803_s15  ;;  %v1033_v58 = vadd.f32 %v2195_v37, %v1014_v33  ;;  %v1210_v6 = vsel %vm1186_vm1, %v1048_v31, 0.0 }
 0x19e   : > { %815 = vst.msk [vmem:[#allocation2 + $0x8] sm:$0xff] %vm402_vm0, %v767_v42  ;;  %v984_v43 = vpop.permute.xlu0 %983  ;;  %v1209_v36 = vadd.f32 %v1208_v50, %v1207_v60  ;;  %v1318_v25 = vadd.f32 %v1317_v49, %v1316_v0  ;;  %v2263_v54 = vmax.f32 %v1034_v38, 0.0  ;;  %v1321_v8 = vsel %vm1186_vm1, %v1294_v46, 0.0 }
 0x19f   : > { %v1319_v61 = vsel %vm1186_vm1, %v1293_v53, 0.0  ;;  %v1016_v5 = vadd.f32 %v984_v43, %v2099_v35  ;;  %v2269_v20 = vmax.f32 %v1033_v58, 0.0  ;;  %v1149_v49 = vsel %vm402_vm0, %v2014_v55, 0.0 }
 0x1a0   : > { %v1320_v7 = vadd.f32 %v1319_v61, %v1318_v25  ;;  %v1211_v3 = vadd.f32 %v1210_v6, %v1209_v36  ;;  %v1296_v13 = vmul.f32 %v2263_v54, %v2263_v54  ;;  %v1229_v36 = vmul.f32 %v2014_v55, %v2014_v55 }
 0x1a1   : > { %v771_v9 = vpop.permute.xlu1 %770  ;;  %v1035_v10 = vadd.f32 %v2195_v37, %v1016_v5  ;;  %v1212_v35 = vsel %vm1186_vm1, %v2269_v20, 0.0  ;;  %v1295_v57 = vmul.f32 %v2269_v20, %v2269_v20  ;;  %v1214_v37 = vsel %vm1186_vm1, %v2263_v54, 0.0 }
 0x1a2   : > { %817 = vst.msk [vmem:[#allocation2 + $0x18] sm:$0xff] %vm402_vm0, %v771_v9  ;;  %v769_v12 = vpop.permute.xlu0 %768  ;;  %v1322_v14 = vadd.f32 %v1321_v8, %v1320_v7  ;;  %v1213_v15 = vadd.f32 %v1212_v35, %v1211_v3  ;;  %v1325_v52 = vsel %vm1186_vm1, %v1296_v13, 0.0 }
 0x1a3   : > { %816 = vst.msk [vmem:[#allocation2 + $0x10] sm:$0xff] %vm402_vm0, %v769_v12  ;;  %v2281_v17 = vmax.f32 %v1035_v10, 0.0  ;;  %v1323_v19 = vsel %vm1186_vm1, %v1295_v57, 0.0 }
 0x1a4   : > { %v1324_v44 = vadd.f32 %v1323_v19, %v1322_v14  ;;  %v1215_v24 = vadd.f32 %v1214_v37, %v1213_v15 }
 0x1a5   : > { %v851_v21 = vld [vmem:[#allocation2 + $0x8] sm:$0xff]  ;;  %v775_v22 = vpop.permute.xlu1 %774  ;;  %v1216_v26 = vsel %vm1186_vm1, %v2281_v17, 0.0  ;;  %v1297_v16 = vmul.f32 %v2281_v17, %v2281_v17 }
 0x1a6   : > { %v867_v23 = vadd.f32 %v851_v21, %v2128_v1  ;;  %819 = vst.msk [vmem:[#allocation2 + $0x28] sm:$0xff] %vm402_vm0, %v775_v22  ;;  %v773_v29 = vpop.permute.xlu0 %772  ;;  %v1217_v40 = vadd.f32 %v1216_v26, %v1215_v24  ;;  %v1326_v30 = vadd.f32 %v1325_v52, %v1324_v44 }
 0x1a7   : > { %818 = vst.msk [vmem:[#allocation2 + $0x20] sm:$0xff] %vm402_vm0, %v773_v29  ;;  %v1327_v1 = vsel %vm1186_vm1, %v1297_v16, 0.0 }
 0x1a8   : > { %v889_v28 = vadd.f32 %v1967_v34, %v867_v23  ;;  %v1218_v38 = vrot.slane %v1217_v40, 4  ;;  %v1328_v42 = vadd.f32 %v1327_v1, %v1326_v30 }
 0x1a9   : > { %v853_v11 = vld [vmem:[#allocation2 + $0x18] sm:$0xff]  ;;  %v779_v31 = vpop.permute.xlu1 %778 }
 0x1aa   : > { %v905_v32 = vmax.f32 %v889_v28, 0.0  ;;  %v869_v33 = vadd.f32 %v853_v11, %v2139_v45  ;;  %v852_v0 = vld [vmem:[#allocation2 + $0x10] sm:$0xff]  ;;  %821 = vst.msk [vmem:[#allocation2 + $0x38] sm:$0xff] %vm402_vm0, %v779_v31  ;;  %v777_v60 = vpop.permute.xlu0 %776  ;;  %v1219_v53 = vadd.f32 %v1218_v38, %v1217_v40  ;;  %v1329_v43 = vrot.slane %v1328_v42, 4 }
 0x1ab   : > { %v868_v46 = vadd.f32 %v852_v0, %v2124_v62  ;;  %820 = vst.msk [vmem:[#allocation2 + $0x30] sm:$0xff] %vm402_vm0, %v777_v60 }
 0x1ac   : > { %1053 = vst.msk [vmem:[%s2026_s24 + $0x8] sm:$0xff] %vm402_vm0, %v905_v32  ;;  %v891_v50 = vadd.f32 %v1967_v34, %v869_v33  ;;  %v1150_v45 = vsel %vm402_vm0, %v905_v32, 0.0  ;;  %v1230_v62 = vmul.f32 %v905_v32, %v905_v32  ;;  %v1220_v3 = vrot.slane %v1219_v53, 2 }
 0x1ad   : > { %v890_v25 = vadd.f32 %v1967_v34, %v868_v46  ;;  %v855_v58 = vld [vmem:[#allocation2 + $0x28] sm:$0xff]  ;;  %v783_v61 = vpop.permute.xlu1 %782  ;;  %v1151_v5 = vadd.f32 %v1150_v45, %v1149_v49  ;;  %v1330_v10 = vadd.f32 %v1329_v43, %v1328_v42 }
 0x1ae   : > { %v907_v6 = vmax.f32 %v891_v50, 0.0  ;;  %v871_v7 = vadd.f32 %v855_v58, %v2151_v51  ;;  %v854_v9 = vld [vmem:[#allocation2 + $0x20] sm:$0xff]  ;;  %823 = vst.msk [vmem:[#allocation2 + $0x48] sm:$0xff] %vm402_vm0, %v783_v61  ;;  %v781_v8 = vpop.permute.xlu0 %780  ;;  %v1221_v13 = vadd.f32 %v1220_v3, %v1219_v53  ;;  %v1246_v14 = vsel %vm402_vm0, %v1230_v62, 0.0 }
 0x1af   : > { %v906_v12 = vmax.f32 %v890_v25, 0.0  ;;  %v870_v55 = vadd.f32 %v854_v9, %v2135_v4  ;;  %822 = vst.msk [vmem:[#allocation2 + $0x40] sm:$0xff] %vm402_vm0, %v781_v8  ;;  %v1331_v35 = vrot.slane %v1330_v10, 2  ;;  %v1245_v51 = vsel %vm402_vm0, %v1229_v36, 0.0 }
 0x1b0   : > { %1055 = vst.msk [vmem:[%s2026_s24 + $0x18] sm:$0xff] %vm402_vm0, %v907_v6  ;;  %v893_v57 = vadd.f32 %v1967_v34, %v871_v7  ;;  %v1222_v23 = vrot.slane %v1221_v13, 1  ;;  %v1247_v40 = vadd.f32 %v1246_v14, %v1245_v51  ;;  %v1154_v31 = vsel %vm402_vm0, %v907_v6, 0.0 }
 0x1b1   : > { %1054 = vst.msk [vmem:[%s2026_s24 + $0x10] sm:$0xff] %vm402_vm0, %v906_v12  ;;  %v892_v15 = vadd.f32 %v1967_v34, %v870_v55  ;;  %v857_v37 = vld [vmem:[#allocation2 + $0x38] sm:$0xff]  ;;  %v787_v19 = vpop.permute.xlu1 %786  ;;  %v1152_v4 = vsel %vm402_vm0, %v906_v12, 0.0  ;;  %v1231_v21 = vmul.f32 %v906_v12, %v906_v12  ;;  %v1332_v24 = vadd.f32 %v1331_v35, %v1330_v10 }
 0x1b2   : > { %v856_v22 = vld [vmem:[#allocation2 + $0x30] sm:$0xff]  ;;  %825 = vst.msk [vmem:[#allocation2 + $0x58] sm:$0xff] %vm402_vm0, %v787_v19  ;;  %v785_v44 = vpop.permute.xlu0 %784  ;;  %v873_v26 = vadd.f32 %v857_v37, %v2163_v59  ;;  %v909_v29 = vmax.f32 %v893_v57, 0.0  ;;  %v1153_v28 = vadd.f32 %v1152_v4, %v1151_v5  ;;  %v1223_v30 = vadd.f32 %v1222_v23, %v1221_v13 }
 0x1b3   : > { %v872_v52 = vadd.f32 %v856_v22, %v2147_v39  ;;  %824 = vst.msk [vmem:[#allocation2 + $0x50] sm:$0xff] %vm402_vm0, %v785_v44  ;;  %v908_v16 = vmax.f32 %v892_v15, 0.0  ;;  %v1333_v1 = vrot.slane %v1332_v24, 1  ;;  %v1232_v60 = vmul.f32 %v907_v6, %v907_v6 }
 0x1b4   : > { %v895_v11 = vadd.f32 %v1967_v34, %v873_v26  ;;  %1057 = vst.msk [vmem:[%s2026_s24 + $0x28] sm:$0xff] %vm402_vm0, %v909_v29  ;;  %v1155_v0 = vadd.f32 %v1154_v31, %v1153_v28  ;;  %1225 = vrot.lane.b32.xlu1 %v1223_v30, %s1803_s15  ;;  %v1248_v25 = vsel %vm402_vm0, %v1231_v21, 0.0  ;;  %v1158_v61 = vsel %vm402_vm0, %v909_v29, 0.0 }
 0x1b5   : > { %v791_v32 = vpop.permute.xlu1 %790  ;;  %v859_v33 = vld [vmem:[#allocation2 + $0x48] sm:$0xff]  ;;  %v894_v59 = vadd.f32 %v1967_v34, %v872_v52  ;;  %1056 = vst.msk [vmem:[%s2026_s24 + $0x20] sm:$0xff] %vm402_vm0, %v908_v16  ;;  %v1156_v39 = vsel %vm402_vm0, %v908_v16, 0.0  ;;  %v1334_v42 = vadd.f32 %v1333_v1, %v1332_v24  ;;  %v1233_v53 = vmul.f32 %v908_v16, %v908_v16 }
 0x1b6   : > { %827 = vst.msk [vmem:[#allocation2 + $0x68] sm:$0xff] %vm402_vm0, %v791_v32  ;;  %v789_v38 = vpop.permute.xlu0 %788  ;;  %v858_v49 = vld [vmem:[#allocation2 + $0x40] sm:$0xff]  ;;  %v875_v46 = vadd.f32 %v859_v33, %v2174_v2  ;;  %v911_v50 = vmax.f32 %v895_v11, 0.0  ;;  %v1157_v36 = vadd.f32 %v1156_v39, %v1155_v0  ;;  %v1234_v2 = vmul.f32 %v909_v29, %v909_v29 }
 0x1b7   : > { %826 = vst.msk [vmem:[#allocation2 + $0x60] sm:$0xff] %vm402_vm0, %v789_v38  ;;  %v874_v43 = vadd.f32 %v858_v49, %v2159_v48  ;;  %v910_v45 = vmax.f32 %v894_v59, 0.0  ;;  %1336 = vrot.lane.b32.xlu0 %v1334_v42, %s1803_s15  ;;  %v1249_v5 = vadd.f32 %v1248_v25, %v1247_v40  ;;  %v1250_v13 = vsel %vm402_vm0, %v1232_v60, 0.0 }
 0x1b8   : > { %v897_v58 = vadd.f32 %v1967_v34, %v875_v46  ;;  %1059 = vst.msk [vmem:[%s2026_s24 + $0x38] sm:$0xff] %vm402_vm0, %v911_v50  ;;  %v1159_v9 = vadd.f32 %v1158_v61, %v1157_v36  ;;  %1112 = vrot.lane.b32.xlu1 %v2263_v54, %s1803_s15  ;;  %v1252_v35 = vsel %vm402_vm0, %v1233_v53, 0.0  ;;  %v1236_v37 = vmul.f32 %v911_v50, %v911_v50 }
 0x1b9   : > { %v795_v62 = vpop.permute.xlu1 %794  ;;  %v861_v6 = vld [vmem:[#allocation2 + $0x58] sm:$0xff]  ;;  %v896_v7 = vadd.f32 %v1967_v34, %v874_v43  ;;  %1058 = vst.msk [vmem:[%s2026_s24 + $0x30] sm:$0xff] %vm402_vm0, %v910_v45  ;;  %v1160_v48 = vsel %vm402_vm0, %v910_v45, 0.0  ;;  %v1235_v8 = vmul.f32 %v910_v45, %v910_v45  ;;  %v1251_v15 = vadd.f32 %v1250_v13, %v1249_v5 }
 0x1ba   : > { %829 = vst.msk [vmem:[#allocation2 + $0x78] sm:$0xff] %vm402_vm0, %v795_v62  ;;  %v793_v3 = vpop.permute.xlu0 %792  ;;  %v860_v10 = vld [vmem:[#allocation2 + $0x50] sm:$0xff]  ;;  %v877_v12 = vadd.f32 %v861_v6, %v2072_v18  ;;  %v913_v55 = vmax.f32 %v897_v58, 0.0  ;;  %v1161_v51 = vadd.f32 %v1160_v48, %v1159_v9  ;;  %v1162_v18 = vsel %vm402_vm0, %v911_v50, 0.0 }
 0x1bb   : > { %828 = vst.msk [vmem:[#allocation2 + $0x70] sm:$0xff] %vm402_vm0, %v793_v3  ;;  %v876_v57 = vadd.f32 %v860_v10, %v2170_v56  ;;  %v912_v14 = vmax.f32 %v896_v7, 0.0  ;;  %1110 = vrot.lane.b32.xlu0 %v2269_v20, %s1803_s15  ;;  %v1254_v22 = vsel %vm402_vm0, %v1234_v2, 0.0  ;;  %v1253_v29 = vadd.f32 %v1252_v35, %v1251_v15 }
 0x1bc   : > { %v899_v54 = vadd.f32 %v1967_v34, %v877_v12  ;;  %1061 = vst.msk [vmem:[%s2026_s24 + $0x48] sm:$0xff] %vm402_vm0, %v913_v55  ;;  %v1163_v21 = vadd.f32 %v1162_v18, %v1161_v51  ;;  %v1256_v40 = vsel %vm402_vm0, %v1235_v8, 0.0  ;;  %v1166_v1 = vsel %vm402_vm0, %v913_v55, 0.0 }
 0x1bd   : > { %v863_v19 = vld [vmem:[#allocation2 + $0x68] sm:$0xff]  ;;  %v898_v4 = vadd.f32 %v1967_v34, %v876_v57  ;;  %1060 = vst.msk [vmem:[%s2026_s24 + $0x40] sm:$0xff] %vm402_vm0, %v912_v14  ;;  %v1164_v56 = vsel %vm402_vm0, %v912_v14, 0.0  ;;  %v1237_v26 = vmul.f32 %v912_v14, %v912_v14  ;;  %v1255_v11 = vadd.f32 %v1254_v22, %v1253_v29 }
 0x1be   : > { %v797_v44 = vpop.permute.xlu0 %796  ;;  %v862_v20 = vld [vmem:[#allocation2 + $0x60] sm:$0xff]  ;;  %v879_v23 = vadd.f32 %v863_v19, %v2087_v27  ;;  %v915_v24 = vmax.f32 %v899_v54, 0.0  ;;  %v1165_v28 = vadd.f32 %v1164_v56, %v1163_v21  ;;  %v1238_v27 = vmul.f32 %v913_v55, %v913_v55 }
 0x1bf   : > { %v878_v52 = vadd.f32 %v862_v20, %v2181_v63  ;;  %v914_v16 = vmax.f32 %v898_v4, 0.0  ;;  %1114 = vrot.lane.b32.xlu0 %v2281_v17, %s1803_s15  ;;  %v1258_v17 = vsel %vm402_vm0, %v1236_v37, 0.0  ;;  %v1257_v38 = vadd.f32 %v1256_v40, %v1255_v11 }
 0x1c0   : > { %v901_v30 = vadd.f32 %v1967_v34, %v879_v23  ;;  %1063 = vst.msk [vmem:[%s2026_s24 + $0x58] sm:$0xff] %vm402_vm0, %v915_v24  ;;  %v1167_v33 = vadd.f32 %v1166_v1, %v1165_v28  ;;  %v1260_v50 = vsel %vm402_vm0, %v1237_v26, 0.0  ;;  %v1170_v43 = vsel %vm402_vm0, %v915_v24, 0.0 }
 0x1c1   : > { %v865_v31 = vld [vmem:[#allocation2 + $0x78] sm:$0xff]  ;;  %v900_v32 = vadd.f32 %v1967_v34, %v878_v52  ;;  %1062 = vst.msk [vmem:[%s2026_s24 + $0x50] sm:$0xff] %vm402_vm0, %v914_v16  ;;  %v1168_v63 = vsel %vm402_vm0, %v914_v16, 0.0  ;;  %v1239_v60 = vmul.f32 %v914_v16, %v914_v16  ;;  %v1259_v45 = vadd.f32 %v1258_v17, %v1257_v38 }
 0x1c2   : > { %v864_v59 = vld [vmem:[#allocation2 + $0x70] sm:$0xff]  ;;  %v881_v39 = vadd.f32 %v865_v31, %v2102_v41  ;;  %v917_v0 = vmax.f32 %v901_v30, 0.0  ;;  %v1169_v46 = vadd.f32 %v1168_v63, %v1167_v33  ;;  %v1240_v58 = vmul.f32 %v915_v24, %v915_v24 }
 0x1c3   : > { %v880_v42 = vadd.f32 %v864_v59, %v2108_v47  ;;  %v916_v49 = vmax.f32 %v900_v32, 0.0  ;;  %v1261_v61 = vadd.f32 %v1260_v50, %v1259_v45  ;;  %v1262_v2 = vsel %vm402_vm0, %v1238_v27, 0.0 }
 0x1c4   : > { %v903_v53 = vadd.f32 %v1967_v34, %v881_v39  ;;  %1065 = vst.msk [vmem:[%s2026_s24 + $0x68] sm:$0xff] %vm402_vm0, %v917_v0  ;;  %v1171_v47 = vadd.f32 %v1170_v43, %v1169_v46  ;;  %v1264_v7 = vsel %vm402_vm0, %v1239_v60, 0.0  ;;  %v1174_v48 = vsel %vm402_vm0, %v917_v0, 0.0 }
 0x1c5   : > { %v902_v41 = vadd.f32 %v1967_v34, %v880_v42  ;;  %1064 = vst.msk [vmem:[%s2026_s24 + $0x60] sm:$0xff] %vm402_vm0, %v916_v49  ;;  %v1172_v36 = vsel %vm402_vm0, %v916_v49, 0.0  ;;  %v1241_v6 = vmul.f32 %v916_v49, %v916_v49  ;;  %v1263_v34 = vadd.f32 %v1262_v2, %v1261_v61  ;;  %v1455_v61 = vld [vmem:[%s2026_s24 + $0x18] sm:$0xff] (%p1875_p5)  ;;  %v1457_v2 = vld [vmem:[%s2026_s24 + $0x20] sm:$0xff] (%p1875_p5) }
 0x1c6   : > { %v919_v25 = vmax.f32 %v903_v53, 0.0  ;;  %v1173_v62 = vadd.f32 %v1172_v36, %v1171_v47  ;;  %v1242_v3 = vmul.f32 %v917_v0, %v917_v0  ;;  %v1266_v13 = vsel %vm402_vm0, %v1240_v58, 0.0  ;;  %v1449_v47 = vld [vmem:[%s2026_s24] sm:$0xff] (%p1875_p5)  ;;  %v1453_v58 = vld [vmem:[%s2026_s24 + $0x10] sm:$0xff] (%p1875_p5)  ;;  %1456 = vst [vmem:[%s2453_s26 + $0x60] sm:$0xff] (%p1875_p5), %v1455_v61  ;;  %1458 = vst [vmem:[%s2453_s26 + $0x80] sm:$0xff] (%p1875_p5), %v1457_v2 }
 0x1c7   : > { %v918_v5 = vmax.f32 %v902_v41, 0.0  ;;  %v1265_v10 = vadd.f32 %v1264_v7, %v1263_v34  ;;  %v1268_v35 = vsel %vm402_vm0, %v1241_v6, 0.0  ;;  %1450 = vst [vmem:[%s2453_s26] sm:$0xff] (%p1875_p5), %v1449_v47  ;;  %1454 = vst [vmem:[%s2453_s26 + $0x40] sm:$0xff] (%p1875_p5), %v1453_v58  ;;  %v1463_v6 = vld [vmem:[%s2026_s24 + $0x38] sm:$0xff] (%p1875_p5)  ;;  %v1465_v7 = vld [vmem:[%s2026_s24 + $0x40] sm:$0xff] (%p1875_p5) }
 0x1c8   : > { %1067 = vst.msk [vmem:[%s2026_s24 + $0x78] sm:$0xff] %vm402_vm0, %v919_v25  ;;  %v1175_v8 = vadd.f32 %v1174_v48, %v1173_v62  ;;  %v1178_v57 = vsel %vm402_vm0, %v919_v25, 0.0  ;;  %v1244_v54 = vmul.f32 %v919_v25, %v919_v25  ;;  %v1270_v18 = vsel %vm402_vm0, %v1242_v3, 0.0  ;;  %v1451_v25 = vld [vmem:[%s2026_s24 + $0x8] sm:$0xff] (%p1875_p5)  ;;  %v1461_v62 = vld [vmem:[%s2026_s24 + $0x30] sm:$0xff] (%p1875_p5)  ;;  %1464 = vst [vmem:[%s2453_s26 + $0xe0] sm:$0xff] (%p1875_p5), %v1463_v6 }
 0x1c9   : > { %1066 = vst.msk [vmem:[%s2026_s24 + $0x70] sm:$0xff] %vm402_vm0, %v918_v5  ;;  %v1176_v9 = vsel %vm402_vm0, %v918_v5, 0.0  ;;  %v1243_v55 = vmul.f32 %v918_v5, %v918_v5  ;;  %v1267_v14 = vadd.f32 %v1266_v13, %v1265_v10  ;;  %v1459_v5 = vld [vmem:[%s2026_s24 + $0x28] sm:$0xff] (%p1875_p5)  ;;  %1452 = vst [vmem:[%s2453_s26 + $0x20] sm:$0xff] (%p1875_p5), %v1451_v25  ;;  %v1469_v34 = vld [vmem:[%s2026_s24 + $0x50] sm:$0xff] (%p1875_p5) }
 0x1ca   : > { %v1177_v12 = vadd.f32 %v1176_v9, %v1175_v8  ;;  %v1274_v56 = vsel %vm402_vm0, %v1244_v54, 0.0  ;;  %1460 = vst [vmem:[%s2453_s26 + $0xa0] sm:$0xff] (%p1875_p5), %v1459_v5  ;;  %1462 = vst [vmem:[%s2453_s26 + $0xc0] sm:$0xff] (%p1875_p5), %v1461_v62  ;;  %v1467_v48 = vld [vmem:[%s2026_s24 + $0x48] sm:$0xff] (%p1875_p5)  ;;  %v1471_v9 = vld [vmem:[%s2026_s24 + $0x58] sm:$0xff] (%p1875_p5) }
 0x1cb   : > { %v1269_v15 = vadd.f32 %v1268_v35, %v1267_v14  ;;  %v1272_v37 = vsel %vm402_vm0, %v1243_v55, 0.0  ;;  %1466 = vst [vmem:[%s2453_s26 + $0x100] sm:$0xff] (%p1875_p5), %v1465_v7  ;;  %1468 = vst [vmem:[%s2453_s26 + $0x120] sm:$0xff] (%p1875_p5), %v1467_v48  ;;  %v1475_v3 = vld [vmem:[%s2026_s24 + $0x68] sm:$0xff] (%p1875_p5) }
 0x1cc   : > { %v1179_v51 = vadd.f32 %v1178_v57, %v1177_v12  ;;  %1470 = vst [vmem:[%s2453_s26 + $0x140] sm:$0xff] (%p1875_p5), %v1469_v34  ;;  %1472 = vst [vmem:[%s2453_s26 + $0x160] sm:$0xff] (%p1875_p5), %v1471_v9  ;;  %v1473_v8 = vld [vmem:[%s2026_s24 + $0x60] sm:$0xff] (%p1875_p5) }
 0x1cd   : > { %v1271_v19 = vadd.f32 %v1270_v18, %v1269_v15  ;;  %1474 = vst [vmem:[%s2453_s26 + $0x180] sm:$0xff] (%p1875_p5), %v1473_v8  ;;  %1476 = vst [vmem:[%s2453_s26 + $0x1a0] sm:$0xff] (%p1875_p5), %v1475_v3 }
 0x1ce   : > { %v1180_v11 = vrot.slane %v1179_v51, 4 }
 0x1cf   : > { %v1273_v4 = vadd.f32 %v1272_v37, %v1271_v19  ;;  %v1479_v12 = vld [vmem:[%s2026_s24 + $0x78] sm:$0xff] (%p1875_p5) }
 0x1d0   : > { %v1181_v32 = vadd.f32 %v1180_v11, %v1179_v51  ;;  %v1477_v10 = vld [vmem:[%s2026_s24 + $0x70] sm:$0xff] (%p1875_p5)  ;;  %1480 = vst [vmem:[%s2453_s26 + $0x1e0] sm:$0xff] (%p1875_p5), %v1479_v12 }
 0x1d1   : > { %v1275_v21 = vadd.f32 %v1274_v56, %v1273_v4  ;;  %1478 = vst [vmem:[%s2453_s26 + $0x1c0] sm:$0xff] (%p1875_p5), %v1477_v10 }
 0x1d2   : > { %v1182_v33 = vrot.slane %v1181_v32, 2 }
 0x1d3   : > { %v1276_v27 = vrot.slane %v1275_v21, 4 }
 0x1d4   : > { %v1183_v59 = vadd.f32 %v1182_v33, %v1181_v32 }
 0x1d5   : > { %v1277_v31 = vadd.f32 %v1276_v27, %v1275_v21 }
 0x1d6   : > { %v1184_v0 = vrot.slane %v1183_v59, 1 }
 0x1d7   : > { %v1278_v63 = vrot.slane %v1277_v31, 2 }
 0x1d8   : > { %v1185_v49 = vadd.f32 %v1184_v0, %v1183_v59 }
 0x1d9   : > { %v1279_v17 = vadd.f32 %v1278_v63, %v1277_v31 }
 0x1db   : > { %v1280_v39 = vrot.slane %v1279_v17, 1 }
 0x1dd   : > { %v1281_v38 = vadd.f32 %v1280_v39, %v1279_v17 }
 0x1f6   : > { %v1085_v22 = vpop.permute.xlu1 %1084 }
 0x1f7   : > { %1644 = vst.msk [vmem:[%s2026_s24 + $0x80] sm:$0xff] %vm402_vm0, %v1085_v22 }
 0x1fa   : > { %v1089_v44 = vpop.permute.xlu1 %1088 }
 0x1fb   : > { %1646 = vst.msk [vmem:[%s2026_s24 + $0x90] sm:$0xff] %vm402_vm0, %v1089_v44  ;;  %v1087_v20 = vpop.permute.xlu0 %1086 }
 0x1fc   : > { %1645 = vst.msk [vmem:[%s2026_s24 + $0x88] sm:$0xff] %vm402_vm0, %v1087_v20 }
 0x1fe   : > { %v1093_v23 = vpop.permute.xlu1 %1092  ;;  %v1481_v55 = vld [vmem:[%s2026_s24 + $0x80] sm:$0xff] (%p1875_p5) }
 0x1ff   : > { %1648 = vst.msk [vmem:[%s2026_s24 + $0xa0] sm:$0xff] %vm402_vm0, %v1093_v23  ;;  %v1091_v24 = vpop.permute.xlu0 %1090  ;;  %1482 = vst [vmem:[%s2453_s26 + $0x200] sm:$0xff] (%p1875_p5), %v1481_v55 }
 0x200   : > { %1647 = vst.msk [vmem:[%s2026_s24 + $0x98] sm:$0xff] %vm402_vm0, %v1091_v24 }
 0x202   : > { %v1097_v26 = vpop.permute.xlu1 %1096  ;;  %v1485_v35 = vld [vmem:[%s2026_s24 + $0x90] sm:$0xff] (%p1875_p5) }
 0x203   : > { %v1095_v29 = vpop.permute.xlu0 %1094  ;;  %1650 = vst.msk [vmem:[%s2026_s24 + $0xb0] sm:$0xff] %vm402_vm0, %v1097_v26  ;;  %v1483_v13 = vld [vmem:[%s2026_s24 + $0x88] sm:$0xff] (%p1875_p5)  ;;  %1486 = vst [vmem:[%s2453_s26 + $0x240] sm:$0xff] (%p1875_p5), %v1485_v35 }
 0x204   : > { %1649 = vst.msk [vmem:[%s2026_s24 + $0xa8] sm:$0xff] %vm402_vm0, %v1095_v29  ;;  %1484 = vst [vmem:[%s2453_s26 + $0x220] sm:$0xff] (%p1875_p5), %v1483_v13 }
 0x206   : > { %v1101_v52 = vpop.permute.xlu1 %1100  ;;  %v1489_v14 = vld [vmem:[%s2026_s24 + $0xa0] sm:$0xff] (%p1875_p5) }
 0x207   : > { %1652 = vst.msk [vmem:[%s2026_s24 + $0xc0] sm:$0xff] %vm402_vm0, %v1101_v52  ;;  %v1099_v16 = vpop.permute.xlu0 %1098  ;;  %v1487_v57 = vld [vmem:[%s2026_s24 + $0x98] sm:$0xff] (%p1875_p5)  ;;  %1490 = vst [vmem:[%s2453_s26 + $0x280] sm:$0xff] (%p1875_p5), %v1489_v14 }
 0x208   : > { %1651 = vst.msk [vmem:[%s2026_s24 + $0xb8] sm:$0xff] %vm402_vm0, %v1099_v16  ;;  %1488 = vst [vmem:[%s2453_s26 + $0x260] sm:$0xff] (%p1875_p5), %v1487_v57 }
 0x20a   : > { %v1105_v28 = vpop.permute.xlu1 %1104  ;;  %v1493_v15 = vld [vmem:[%s2026_s24 + $0xb0] sm:$0xff] (%p1875_p5) }
 0x20b   : > { %1654 = vst.msk [vmem:[%s2026_s24 + $0xd0] sm:$0xff] %vm402_vm0, %v1105_v28  ;;  %v1103_v40 = vpop.permute.xlu0 %1102  ;;  %v1491_v51 = vld [vmem:[%s2026_s24 + $0xa8] sm:$0xff] (%p1875_p5)  ;;  %1494 = vst [vmem:[%s2453_s26 + $0x2c0] sm:$0xff] (%p1875_p5), %v1493_v15 }
 0x20c   : > { %1653 = vst.msk [vmem:[%s2026_s24 + $0xc8] sm:$0xff] %vm402_vm0, %v1103_v40  ;;  %1492 = vst [vmem:[%s2453_s26 + $0x2a0] sm:$0xff] (%p1875_p5), %v1491_v51 }
 0x20e   : > { %v1109_v30 = vpop.permute.xlu1 %1108  ;;  %v1497_v18 = vld [vmem:[%s2026_s24 + $0xc0] sm:$0xff] (%p1875_p5) }
 0x20f   : > { %v1107_v1 = vpop.permute.xlu0 %1106  ;;  %1656 = vst.msk [vmem:[%s2026_s24 + $0xe0] sm:$0xff] %vm402_vm0, %v1109_v30  ;;  %v1495_v54 = vld [vmem:[%s2026_s24 + $0xb8] sm:$0xff] (%p1875_p5)  ;;  %1498 = vst [vmem:[%s2453_s26 + $0x300] sm:$0xff] (%p1875_p5), %v1497_v18 }
 0x210   : > { %1655 = vst.msk [vmem:[%s2026_s24 + $0xd8] sm:$0xff] %vm402_vm0, %v1107_v1  ;;  %1496 = vst [vmem:[%s2453_s26 + $0x2e0] sm:$0xff] (%p1875_p5), %v1495_v54 }
 0x212   : > { %v1501_v19 = vld [vmem:[%s2026_s24 + $0xd0] sm:$0xff] (%p1875_p5) }
 0x213   : > { %v1499_v37 = vld [vmem:[%s2026_s24 + $0xc8] sm:$0xff] (%p1875_p5)  ;;  %1502 = vst [vmem:[%s2453_s26 + $0x340] sm:$0xff] (%p1875_p5), %v1501_v19 }
 0x214   : > { %1500 = vst [vmem:[%s2453_s26 + $0x320] sm:$0xff] (%p1875_p5), %v1499_v37 }
 0x216   : > { %v1505_v56 = vld [vmem:[%s2026_s24 + $0xe0] sm:$0xff] (%p1875_p5) }
 0x217   : > { %v1503_v4 = vld [vmem:[%s2026_s24 + $0xd8] sm:$0xff] (%p1875_p5)  ;;  %1506 = vst [vmem:[%s2453_s26 + $0x380] sm:$0xff] (%p1875_p5), %v1505_v56 }
 0x218   : > { %1504 = vst [vmem:[%s2453_s26 + $0x360] sm:$0xff] (%p1875_p5), %v1503_v4 }
 0x226   : > { %v1226_v60 = vpop.permute.xlu1 %1225 }
 0x227   : > { %v1228_v53 = vadd.f32 %v1226_v60, %v1185_v49 }
 0x229   : > { %v1337_v42 = vpop.permute.xlu0 %1336 }
 0x22a   : > { %v1339_v46 = vadd.f32 %v1337_v42, %v1281_v38  ;;  %v1113_v50 = vpop.permute.xlu1 %1112 }
 0x22b   : > { %1658 = vst.msk [vmem:[%s2026_s24 + $0xf0] sm:$0xff] %vm402_vm0, %v1113_v50 }
 0x22c   : > { %v1341_v43 = vrot.slane %v1339_v46, 7  ;;  %1357 = sbr.rel (!%p1875_p5) target bundleno = 571 (0x23b), region = 86 }
 0x22d   : > { %v1111_v45 = vpop.permute.xlu0 %1110 }
 0x22e   : > { %v1344_v41 = vsel %vm1343_vm2, %v1228_v53, %v1341_v43  ;;  %1657 = vst.msk [vmem:[%s2026_s24 + $0xe8] sm:$0xff] %vm402_vm0, %v1111_v45 }
 0x22f   : > { %1346 = vst.msk [vmem:[%s377_s20] sm:$0x3] %vm1345_vm3, %v1344_v41 }
 0x231   : > { %v1115_v36 = vpop.permute.xlu0 %1114 }
 0x232   : > { %1659 = vst.msk [vmem:[%s2026_s24 + $0xf8] sm:$0xff] %vm402_vm0, %v1115_v36  ;;  %v1509_v22 = vld [vmem:[%s2026_s24 + $0xf0] sm:$0xff] (%p1875_p5) }
 0x233   : > { %1510 = vst [vmem:[%s2453_s26 + $0x3c0] sm:$0xff] %v1509_v22 }
 0x235   : > { %v1507_v21 = vld [vmem:[%s2026_s24 + $0xe8] sm:$0xff] }
 0x236   : > { %1508 = vst [vmem:[%s2453_s26 + $0x3a0] sm:$0xff] %v1507_v21 }
 0x239   : > { %v1511_v44 = vld [vmem:[%s2026_s24 + $0xf8] sm:$0xff] }
 0x23a   : > { %1512 = vst [vmem:[%s2453_s26 + $0x3e0] sm:$0xff] %v1511_v44 }
 0x23b PF: > { %p15_p11 = scmp.ge.s32.totalorder %s1863_s28, 6   ;;  %s2535_s24 = smov %s1795_s25 }
 0x23c   : > { %s2536_s25 = smov %s1873_s8  ;;  %s2537_s26 = smov %s1863_s28 }
 0x23d   :  { %17 = sbr.rel (!%p15_p11) target bundleno = 2 (0x2), region = 171 }

</bundles_post_ra>
